<compile_context>
chip_gen: v7x
topology: tpu7x:2x2x1
jax: 0.10.0
libtpu: 0.0.40
codegen_flags: <defaults>
</compile_context>

<pallas_src>
import jax
import jax.numpy as jnp
from jax.experimental import pallas as pl
from jax.experimental.pallas import tpu as pltpu

_LANE = 128      # TPU lane width
_XOFF = 8        # sublane-aligned column offset of real data inside padded scratch


# ---------------------------------------------------------------------------
# Fused kernel: double_conv + 2x2 max pool for one batch element
# ---------------------------------------------------------------------------
def _double_conv_pool_kernel(x_ref, w1_ref, b1_ref, w2_ref, b2_ref,
                             o_ref, p_ref, xpad_ref, h1pad_ref, hp_ref):
    """x_ref   : (1, H, W, Cin)
       w1_ref  : (9, Cin, Cp)     taps flattened as kh*3 + kw
       b1_ref  : (1, Cp)
       w2_ref  : (9, Cp, Cp)
       b2_ref  : (1, Cp)
       o_ref   : (1, H, W, Cp)        conv output (lane-dense, Cp = k*128)
       p_ref   : (1, H//2, W//2, Cp)  2x2 max-pooled output
       xpad_ref : (H+2, W+2*_XOFF, Cin)  zero-halo scratch for conv1
       h1pad_ref: (H+2, W+2*_XOFF, Cp)   zero-halo scratch for conv2
       hp_ref   : (H//2, W, Cp)          H-pooled rows scratch
    """
    _, H, W, _ = x_ref.shape
    Cp = o_ref.shape[-1]

    def conv3x3_relu(src_ref, w_ref, bias):
        # 3x3 "same" conv as 9 accumulated (H*W, C) x (C, Cp) MXU matmuls
        # (fully unrolled static taps; bias/ReLU applied once at the end).
        C = src_ref.shape[-1]
        acc = jnp.zeros((H * W, Cp), jnp.float32)
        for kh in range(3):
            for kw in range(3):
                c0 = _XOFF - 1 + kw
                patch = src_ref[kh:kh + H, c0:c0 + W, :]          # (H, W, C)
                acc = acc + jnp.dot(patch.reshape(H * W, C),
                                    w_ref[kh * 3 + kw],
                                    preferred_element_type=jnp.float32)
        return jnp.maximum(acc + bias, 0.0)                        # (H*W, Cp)

    # ---- conv1: zero halo lives in VMEM (no host jnp.pad / HBM round trip)
    xpad_ref[...] = jnp.zeros_like(xpad_ref)
    xpad_ref[1:H + 1, _XOFF:_XOFF + W, :] = x_ref[0].astype(jnp.float32)
    h1 = conv3x3_relu(xpad_ref, w1_ref, b1_ref[...])               # (H*W, Cp)

    # ---- conv2: intermediate stays entirely in VMEM (fused, no HBM pass)
    h1pad_ref[...] = jnp.zeros_like(h1pad_ref)
    h1pad_ref[1:H + 1, _XOFF:_XOFF + W, :] = h1.reshape(H, W, Cp)
    y = conv3x3_relu(h1pad_ref, w2_ref, b2_ref[...])               # (H*W, Cp)

    # ---- lane-dense store of the conv output
    o_ref[0] = y.reshape(H, W, Cp).astype(o_ref.dtype)

    # ---- fused 2x2 max pool
    # H direction: (H*W, Cp) -> (H/2, 2, W, Cp) is a tile-aligned (free) split;
    # the max reduces an outer dim (pure vreg maximums).
    hmax = jnp.max(y.reshape(H // 2, 2, W, Cp), axis=1)            # (H/2, W, Cp)
    hp_ref[...] = hmax
    # W direction: stride-2 sublane reads -> pairwise max (O(H*W*Cp), no masks).
    pooled = jnp.maximum(hp_ref[:, pl.ds(0, W // 2, stride=2), :],
                         hp_ref[:, pl.ds(1, W // 2, stride=2), :])  # (H/2, W/2, Cp)
    p_ref[0] = pooled.astype(p_ref.dtype)


# ---------------------------------------------------------------------------
# Wrapper (layout plumbing: NCHW<->NHWC, channel padding, BlockSpecs, grid)
# ---------------------------------------------------------------------------
def _round_up(x, m):
    return -(-x // m) * m


def _padded_vmem_bytes(shape, itemsize=4):
    """Bytes a f32 buffer of `shape` occupies in VMEM ((8,128) tile padding)."""
    s = list(shape)
    if len(s) >= 1:
        s[-1] = _round_up(s[-1], 128)
    if len(s) >= 2:
        s[-2] = _round_up(s[-2], 8)
    n = 1
    for d in s:
        n *= d
    return n * itemsize


def mini_encoder_forward(x_nchw, params):
    """Matches mini_encoder.forward: returns (conv_output, pooled), both NCHW."""
    x = jnp.transpose(x_nchw, (0, 2, 3, 1))                    # NCHW -> NHWC
    N, H, W, Cin = x.shape
    Cout = params["b1"].shape[0]
    assert H % 2 == 0 and W % 2 == 0, "MaxPool2d(2) requires even H and W"
    Cp = _round_up(Cout, _LANE)                                # lane-dense channels

    # HWIO (3,3,Ci,Co) -> (9, Ci, Cp) taps, zero-padded on the output-channel
    # dim (and on the input-channel dim for conv2, whose input is padded h1).
    w1p = jnp.pad(params["w1"].reshape(9, Cin, Cout),
                  ((0, 0), (0, 0), (0, Cp - Cout)))
    w2p = jnp.pad(params["w2"].reshape(9, Cout, Cout),
                  ((0, 0), (0, Cp - Cout), (0, Cp - Cout)))
    b1p = jnp.pad(params["b1"], (0, Cp - Cout)).reshape(1, Cp)
    b2p = jnp.pad(params["b2"], (0, Cp - Cout)).reshape(1, Cp)

    block_shapes = [(1, H, W, Cin), (9, Cin, Cp), (1, Cp), (9, Cp, Cp), (1, Cp),
                    (1, H, W, Cp), (1, H // 2, W // 2, Cp)]
    scratch_shapes = [(H + 2, W + 2 * _XOFF, Cin),
                      (H + 2, W + 2 * _XOFF, Cp),
                      (H // 2, W, Cp)]
    vmem_need = (2 * sum(_padded_vmem_bytes(s) for s in block_shapes)  # dbl-buffered
                 + sum(_padded_vmem_bytes(s) for s in scratch_shapes))
    vmem_limit = int(max(2 * vmem_need, 8 * 1024 * 1024))      # 2x headroom, >=8 MiB

    conv_p, pool_p = pl.pallas_call(
        _double_conv_pool_kernel,
        out_shape=(jax.ShapeDtypeStruct((N, H, W, Cp), x.dtype),
                   jax.ShapeDtypeStruct((N, H // 2, W // 2, Cp), x.dtype)),
        grid=(N,),
        in_specs=[
            pl.BlockSpec((1, H, W, Cin), lambda n: (n, 0, 0, 0)),
            pl.BlockSpec((9, Cin, Cp), lambda n: (0, 0, 0)),
            pl.BlockSpec((1, Cp), lambda n: (0, 0)),
            pl.BlockSpec((9, Cp, Cp), lambda n: (0, 0, 0)),
            pl.BlockSpec((1, Cp), lambda n: (0, 0)),
        ],
        out_specs=(
            pl.BlockSpec((1, H, W, Cp), lambda n: (n, 0, 0, 0)),
            pl.BlockSpec((1, H // 2, W // 2, Cp), lambda n: (n, 0, 0, 0)),
        ),
        scratch_shapes=[pltpu.VMEM(scratch_shapes[0], jnp.float32),
                        pltpu.VMEM(scratch_shapes[1], jnp.float32),
                        pltpu.VMEM(scratch_shapes[2], jnp.float32)],
        compiler_params=pltpu.CompilerParams(
            dimension_semantics=("parallel",),
            vmem_limit_bytes=vmem_limit),
    )(x, w1p, b1p, w2p, b2p)

    conv_out = conv_p[..., :Cout]                              # drop padded lanes
    pooled = pool_p[..., :Cout]
    return (jnp.transpose(conv_out, (0, 3, 1, 2)),
            jnp.transpose(pooled, (0, 3, 1, 2)))


# ---------------------------------------------------------------------------
# Deterministic parameter init (PyTorch Conv2d shapes: (Cout, Cin, 3, 3))
# ---------------------------------------------------------------------------
def init_params(key, cin, cout):
    k1, k2, k3, k4 = jax.random.split(key, 4)
    bnd1 = 1.0 / jnp.sqrt(cin * 9.0)
    bnd2 = 1.0 / jnp.sqrt(cout * 9.0)
    w1_t = jax.random.uniform(k1, (cout, cin, 3, 3), jnp.float32, -bnd1, bnd1)
    b1 = jax.random.uniform(k2, (cout,), jnp.float32, -bnd1, bnd1)
    w2_t = jax.random.uniform(k3, (cout, cout, 3, 3), jnp.float32, -bnd2, bnd2)
    b2 = jax.random.uniform(k4, (cout,), jnp.float32, -bnd2, bnd2)
    # (Cout, Cin, kh, kw) -> HWIO (kh, kw, Cin, Cout)
    return dict(w1=jnp.transpose(w1_t, (2, 3, 1, 0)), b1=b1,
                w2=jnp.transpose(w2_t, (2, 3, 1, 0)), b2=b2)


# ---------------------------------------------------------------------------
# Pure-JAX reference (for correctness check)
# ---------------------------------------------------------------------------
def ref_forward(x_nchw, params):
    x = jnp.transpose(x_nchw, (0, 2, 3, 1))
    dn = ("NHWC", "HWIO", "NHWC")
    h1 = jax.nn.relu(jax.lax.conv_general_dilated(
        x, params["w1"], (1, 1), "SAME", dimension_numbers=dn) + params["b1"])
    h2 = jax.nn.relu(jax.lax.conv_general_dilated(
        h1, params["w2"], (1, 1), "SAME", dimension_numbers=dn) + params["b2"])
    pooled = jax.lax.reduce_window(h2, -jnp.inf, jax.lax.max,
                                   (1, 2, 2, 1), (1, 2, 2, 1), "VALID")
    return jnp.transpose(h2, (0, 3, 1, 2)), jnp.transpose(pooled, (0, 3, 1, 2))


if __name__ == "__main__":
    key = jax.random.PRNGKey(0)
    kx, kp = jax.random.split(key)
    N, Cin, Cout, H, W = 2, 4, 8, 16, 16

    x = jax.random.normal(kx, (N, Cin, H, W), jnp.float32)
    params = init_params(kp, Cin, Cout)

    fwd = jax.jit(mini_encoder_forward)
    conv_out, pooled = jax.block_until_ready(fwd(x, params))
    ref_conv, ref_pool = ref_forward(x, params)

    assert conv_out.shape == (N, Cout, H, W)
    assert pooled.shape == (N, Cout, H // 2, W // 2)
    assert jnp.allclose(conv_out, ref_conv, atol=1e-4, rtol=1e-4)
    assert jnp.allclose(pooled, ref_pool, atol=1e-4, rtol=1e-4)

    print("KERNEL_OK")
</pallas_src>

<mosaic_0001>
module attributes {stable_mosaic.version = 11 : i64} {
  func.func @_double_conv_pool_kernel(%arg0: i32, %arg1: memref<1x16x16x4xf32, #tpu.memory_space<vmem>>, %arg2: memref<9x4x128xf32, #tpu.memory_space<vmem>>, %arg3: memref<1x128xf32, #tpu.memory_space<vmem>>, %arg4: memref<9x128x128xf32, #tpu.memory_space<vmem>>, %arg5: memref<1x128xf32, #tpu.memory_space<vmem>>, %arg6: memref<1x16x16x128xf32, #tpu.memory_space<vmem>>, %arg7: memref<1x8x8x128xf32, #tpu.memory_space<vmem>>, %arg8: memref<18x32x4xf32, #tpu.memory_space<vmem>>, %arg9: memref<18x32x128xf32, #tpu.memory_space<vmem>>, %arg10: memref<8x16x128xf32, #tpu.memory_space<vmem>>) attributes {dimension_semantics = [#tpu.dimension_semantics<parallel>], iteration_bounds = array<i64: 2>, scalar_prefetch = 0 : i64, scratch_operands = 3 : i64, tpu.core_type = #tpu.core_type<tc>, window_params = [{transform_indices = @transform_0, window_bounds = array<i64: 1, 16, 16, 4>}, {pipeline_mode = #tpu.pipeline_mode<synchronous>, transform_indices = @transform_1, window_bounds = array<i64: 9, 4, 128>}, {pipeline_mode = #tpu.pipeline_mode<synchronous>, transform_indices = @transform_2, window_bounds = array<i64: 1, 128>}, {pipeline_mode = #tpu.pipeline_mode<synchronous>, transform_indices = @transform_3, window_bounds = array<i64: 9, 128, 128>}, {pipeline_mode = #tpu.pipeline_mode<synchronous>, transform_indices = @transform_4, window_bounds = array<i64: 1, 128>}, {transform_indices = @transform_5, window_bounds = array<i64: 1, 16, 16, 128>}, {transform_indices = @transform_6, window_bounds = array<i64: 1, 8, 8, 128>}]} {
    %cst = arith.constant 0.000000e+00 : f32
    %0 = vector.broadcast %cst : f32 to vector<18x32x4xf32>
    %c0 = arith.constant 0 : index
    %c0_0 = arith.constant 0 : index
    %c0_1 = arith.constant 0 : index
    %1 = vector.load %arg8[%c0, %c0_0, %c0_1] : memref<18x32x4xf32, #tpu.memory_space<vmem>>, vector<18x32x4xf32>
    tpu.vector_store %arg8[%c0, %c0_0, %c0_1], %0 {strides = array<i32>} : memref<18x32x4xf32, #tpu.memory_space<vmem>>, vector<18x32x4xf32>,
    %c0_2 = arith.constant 0 : index
    %c0_3 = arith.constant 0 : index
    %c0_4 = arith.constant 0 : index
    %c0_5 = arith.constant 0 : index
    %2 = vector.load %arg1[%c0_2, %c0_3, %c0_4, %c0_5] : memref<1x16x16x4xf32, #tpu.memory_space<vmem>>, vector<1x16x16x4xf32>
    %3 = vector.shape_cast %2 : vector<1x16x16x4xf32> to vector<16x16x4xf32>
    %c1 = arith.constant 1 : index
    %c8 = arith.constant 8 : index
    %c0_6 = arith.constant 0 : index
    %4 = vector.load %arg8[%c1, %c8, %c0_6] : memref<18x32x4xf32, #tpu.memory_space<vmem>>, vector<16x16x4xf32>
    tpu.vector_store %arg8[%c1, %c8, %c0_6], %3 {strides = array<i32>} : memref<18x32x4xf32, #tpu.memory_space<vmem>>, vector<16x16x4xf32>,
    %c0_7 = arith.constant 0 : index
    %c0_8 = arith.constant 0 : index
    %5 = vector.load %arg3[%c0_7, %c0_8] : memref<1x128xf32, #tpu.memory_space<vmem>>, vector<1x128xf32>
    %cst_9 = arith.constant 0.000000e+00 : f32
    %6 = vector.broadcast %cst_9 : f32 to vector<256x128xf32>
    %c0_10 = arith.constant 0 : index
    %c7 = arith.constant 7 : index
    %c0_11 = arith.constant 0 : index
    %7 = vector.load %arg8[%c0_10, %c7, %c0_11] : memref<18x32x4xf32, #tpu.memory_space<vmem>>, vector<16x16x4xf32>
    %8 = vector.shape_cast %7 : vector<16x16x4xf32> to vector<256x4xf32>
    %c0_12 = arith.constant 0 : index
    %c0_13 = arith.constant 0 : index
    %c0_14 = arith.constant 0 : index
    %9 = vector.load %arg2[%c0_12, %c0_13, %c0_14] : memref<9x4x128xf32, #tpu.memory_space<vmem>>, vector<1x4x128xf32>
    %10 = vector.shape_cast %9 : vector<1x4x128xf32> to vector<4x128xf32>
    %cst_15 = arith.constant dense<0.000000e+00> : vector<256x128xf32>
    %11 = tpu.matmul %8, %10, %cst_15 {dimension_numbers = #tpu.dot_dimension_numbers<[1], [0], [0], [1], [0, 0, 1, 1], [], []>} : vector<256x4xf32>, vector<4x128xf32>, vector<256x128xf32> -> vector<256x128xf32>
    %12 = arith.addf %6, %11 : vector<256x128xf32>
    %c0_16 = arith.constant 0 : index
    %c8_17 = arith.constant 8 : index
    %c0_18 = arith.constant 0 : index
    %13 = vector.load %arg8[%c0_16, %c8_17, %c0_18] : memref<18x32x4xf32, #tpu.memory_space<vmem>>, vector<16x16x4xf32>
    %14 = vector.shape_cast %13 : vector<16x16x4xf32> to vector<256x4xf32>
    %c1_19 = arith.constant 1 : index
    %c0_20 = arith.constant 0 : index
    %c0_21 = arith.constant 0 : index
    %15 = vector.load %arg2[%c1_19, %c0_20, %c0_21] : memref<9x4x128xf32, #tpu.memory_space<vmem>>, vector<1x4x128xf32>
    %16 = vector.shape_cast %15 : vector<1x4x128xf32> to vector<4x128xf32>
    %cst_22 = arith.constant dense<0.000000e+00> : vector<256x128xf32>
    %17 = tpu.matmul %14, %16, %cst_22 {dimension_numbers = #tpu.dot_dimension_numbers<[1], [0], [0], [1], [0, 0, 1, 1], [], []>} : vector<256x4xf32>, vector<4x128xf32>, vector<256x128xf32> -> vector<256x128xf32>
    %18 = arith.addf %12, %17 : vector<256x128xf32>
    %c0_23 = arith.constant 0 : index
    %c9 = arith.constant 9 : index
    %c0_24 = arith.constant 0 : index
    %19 = vector.load %arg8[%c0_23, %c9, %c0_24] : memref<18x32x4xf32, #tpu.memory_space<vmem>>, vector<16x16x4xf32>
    %20 = vector.shape_cast %19 : vector<16x16x4xf32> to vector<256x4xf32>
    %c2 = arith.constant 2 : index
    %c0_25 = arith.constant 0 : index
    %c0_26 = arith.constant 0 : index
    %21 = vector.load %arg2[%c2, %c0_25, %c0_26] : memref<9x4x128xf32, #tpu.memory_space<vmem>>, vector<1x4x128xf32>
    %22 = vector.shape_cast %21 : vector<1x4x128xf32> to vector<4x128xf32>
    %cst_27 = arith.constant dense<0.000000e+00> : vector<256x128xf32>
    %23 = tpu.matmul %20, %22, %cst_27 {dimension_numbers = #tpu.dot_dimension_numbers<[1], [0], [0], [1], [0, 0, 1, 1], [], []>} : vector<256x4xf32>, vector<4x128xf32>, vector<256x128xf32> -> vector<256x128xf32>
    %24 = arith.addf %18, %23 : vector<256x128xf32>
    %c1_28 = arith.constant 1 : index
    %c7_29 = arith.constant 7 : index
    %c0_30 = arith.constant 0 : index
    %25 = vector.load %arg8[%c1_28, %c7_29, %c0_30] : memref<18x32x4xf32, #tpu.memory_space<vmem>>, vector<16x16x4xf32>
    %26 = vector.shape_cast %25 : vector<16x16x4xf32> to vector<256x4xf32>
    %c3 = arith.constant 3 : index
    %c0_31 = arith.constant 0 : index
    %c0_32 = arith.constant 0 : index
    %27 = vector.load %arg2[%c3, %c0_31, %c0_32] : memref<9x4x128xf32, #tpu.memory_space<vmem>>, vector<1x4x128xf32>
    %28 = vector.shape_cast %27 : vector<1x4x128xf32> to vector<4x128xf32>
    %cst_33 = arith.constant dense<0.000000e+00> : vector<256x128xf32>
    %29 = tpu.matmul %26, %28, %cst_33 {dimension_numbers = #tpu.dot_dimension_numbers<[1], [0], [0], [1], [0, 0, 1, 1], [], []>} : vector<256x4xf32>, vector<4x128xf32>, vector<256x128xf32> -> vector<256x128xf32>
    %30 = arith.addf %24, %29 : vector<256x128xf32>
    %c1_34 = arith.constant 1 : index
    %c8_35 = arith.constant 8 : index
    %c0_36 = arith.constant 0 : index
    %31 = vector.load %arg8[%c1_34, %c8_35, %c0_36] : memref<18x32x4xf32, #tpu.memory_space<vmem>>, vector<16x16x4xf32>
    %32 = vector.shape_cast %31 : vector<16x16x4xf32> to vector<256x4xf32>
    %c4 = arith.constant 4 : index
    %c0_37 = arith.constant 0 : index
    %c0_38 = arith.constant 0 : index
    %33 = vector.load %arg2[%c4, %c0_37, %c0_38] : memref<9x4x128xf32, #tpu.memory_space<vmem>>, vector<1x4x128xf32>
    %34 = vector.shape_cast %33 : vector<1x4x128xf32> to vector<4x128xf32>
    %cst_39 = arith.constant dense<0.000000e+00> : vector<256x128xf32>
    %35 = tpu.matmul %32, %34, %cst_39 {dimension_numbers = #tpu.dot_dimension_numbers<[1], [0], [0], [1], [0, 0, 1, 1], [], []>} : vector<256x4xf32>, vector<4x128xf32>, vector<256x128xf32> -> vector<256x128xf32>
    %36 = arith.addf %30, %35 : vector<256x128xf32>
    %c1_40 = arith.constant 1 : index
    %c9_41 = arith.constant 9 : index
    %c0_42 = arith.constant 0 : index
    %37 = vector.load %arg8[%c1_40, %c9_41, %c0_42] : memref<18x32x4xf32, #tpu.memory_space<vmem>>, vector<16x16x4xf32>
    %38 = vector.shape_cast %37 : vector<16x16x4xf32> to vector<256x4xf32>
    %c5 = arith.constant 5 : index
    %c0_43 = arith.constant 0 : index
    %c0_44 = arith.constant 0 : index
    %39 = vector.load %arg2[%c5, %c0_43, %c0_44] : memref<9x4x128xf32, #tpu.memory_space<vmem>>, vector<1x4x128xf32>
    %40 = vector.shape_cast %39 : vector<1x4x128xf32> to vector<4x128xf32>
    %cst_45 = arith.constant dense<0.000000e+00> : vector<256x128xf32>
    %41 = tpu.matmul %38, %40, %cst_45 {dimension_numbers = #tpu.dot_dimension_numbers<[1], [0], [0], [1], [0, 0, 1, 1], [], []>} : vector<256x4xf32>, vector<4x128xf32>, vector<256x128xf32> -> vector<256x128xf32>
    %42 = arith.addf %36, %41 : vector<256x128xf32>
    %c2_46 = arith.constant 2 : index
    %c7_47 = arith.constant 7 : index
    %c0_48 = arith.constant 0 : index
    %43 = vector.load %arg8[%c2_46, %c7_47, %c0_48] : memref<18x32x4xf32, #tpu.memory_space<vmem>>, vector<16x16x4xf32>
    %44 = vector.shape_cast %43 : vector<16x16x4xf32> to vector<256x4xf32>
    %c6 = arith.constant 6 : index
    %c0_49 = arith.constant 0 : index
    %c0_50 = arith.constant 0 : index
    %45 = vector.load %arg2[%c6, %c0_49, %c0_50] : memref<9x4x128xf32, #tpu.memory_space<vmem>>, vector<1x4x128xf32>
    %46 = vector.shape_cast %45 : vector<1x4x128xf32> to vector<4x128xf32>
    %cst_51 = arith.constant dense<0.000000e+00> : vector<256x128xf32>
    %47 = tpu.matmul %44, %46, %cst_51 {dimension_numbers = #tpu.dot_dimension_numbers<[1], [0], [0], [1], [0, 0, 1, 1], [], []>} : vector<256x4xf32>, vector<4x128xf32>, vector<256x128xf32> -> vector<256x128xf32>
    %48 = arith.addf %42, %47 : vector<256x128xf32>
    %c2_52 = arith.constant 2 : index
    %c8_53 = arith.constant 8 : index
    %c0_54 = arith.constant 0 : index
    %49 = vector.load %arg8[%c2_52, %c8_53, %c0_54] : memref<18x32x4xf32, #tpu.memory_space<vmem>>, vector<16x16x4xf32>
    %50 = vector.shape_cast %49 : vector<16x16x4xf32> to vector<256x4xf32>
    %c7_55 = arith.constant 7 : index
    %c0_56 = arith.constant 0 : index
    %c0_57 = arith.constant 0 : index
    %51 = vector.load %arg2[%c7_55, %c0_56, %c0_57] : memref<9x4x128xf32, #tpu.memory_space<vmem>>, vector<1x4x128xf32>
    %52 = vector.shape_cast %51 : vector<1x4x128xf32> to vector<4x128xf32>
    %cst_58 = arith.constant dense<0.000000e+00> : vector<256x128xf32>
    %53 = tpu.matmul %50, %52, %cst_58 {dimension_numbers = #tpu.dot_dimension_numbers<[1], [0], [0], [1], [0, 0, 1, 1], [], []>} : vector<256x4xf32>, vector<4x128xf32>, vector<256x128xf32> -> vector<256x128xf32>
    %54 = arith.addf %48, %53 : vector<256x128xf32>
    %c2_59 = arith.constant 2 : index
    %c9_60 = arith.constant 9 : index
    %c0_61 = arith.constant 0 : index
    %55 = vector.load %arg8[%c2_59, %c9_60, %c0_61] : memref<18x32x4xf32, #tpu.memory_space<vmem>>, vector<16x16x4xf32>
    %56 = vector.shape_cast %55 : vector<16x16x4xf32> to vector<256x4xf32>
    %c8_62 = arith.constant 8 : index
    %c0_63 = arith.constant 0 : index
    %c0_64 = arith.constant 0 : index
    %57 = vector.load %arg2[%c8_62, %c0_63, %c0_64] : memref<9x4x128xf32, #tpu.memory_space<vmem>>, vector<1x4x128xf32>
    %58 = vector.shape_cast %57 : vector<1x4x128xf32> to vector<4x128xf32>
    %cst_65 = arith.constant dense<0.000000e+00> : vector<256x128xf32>
    %59 = tpu.matmul %56, %58, %cst_65 {dimension_numbers = #tpu.dot_dimension_numbers<[1], [0], [0], [1], [0, 0, 1, 1], [], []>} : vector<256x4xf32>, vector<4x128xf32>, vector<256x128xf32> -> vector<256x128xf32>
    %60 = arith.addf %54, %59 : vector<256x128xf32>
    %61 = vector.broadcast %5 : vector<1x128xf32> to vector<256x128xf32>
    %62 = arith.addf %60, %61 : vector<256x128xf32>
    %cst_66 = arith.constant 0.000000e+00 : f32
    %63 = vector.broadcast %cst_66 : f32 to vector<256x128xf32>
    %64 = arith.maximumf %62, %63 : vector<256x128xf32>
    %cst_67 = arith.constant 0.000000e+00 : f32
    %65 = vector.broadcast %cst_67 : f32 to vector<18x32x128xf32>
    %c0_68 = arith.constant 0 : index
    %c0_69 = arith.constant 0 : index
    %c0_70 = arith.constant 0 : index
    %66 = vector.load %arg9[%c0_68, %c0_69, %c0_70] : memref<18x32x128xf32, #tpu.memory_space<vmem>>, vector<18x32x128xf32>
    tpu.vector_store %arg9[%c0_68, %c0_69, %c0_70], %65 {strides = array<i32>} : memref<18x32x128xf32, #tpu.memory_space<vmem>>, vector<18x32x128xf32>,
    %67 = vector.shape_cast %64 : vector<256x128xf32> to vector<16x16x128xf32>
    %c1_71 = arith.constant 1 : index
    %c8_72 = arith.constant 8 : index
    %c0_73 = arith.constant 0 : index
    %68 = vector.load %arg9[%c1_71, %c8_72, %c0_73] : memref<18x32x128xf32, #tpu.memory_space<vmem>>, vector<16x16x128xf32>
    tpu.vector_store %arg9[%c1_71, %c8_72, %c0_73], %67 {strides = array<i32>} : memref<18x32x128xf32, #tpu.memory_space<vmem>>, vector<16x16x128xf32>,
    %c0_74 = arith.constant 0 : index
    %c0_75 = arith.constant 0 : index
    %69 = vector.load %arg5[%c0_74, %c0_75] : memref<1x128xf32, #tpu.memory_space<vmem>>, vector<1x128xf32>
    %cst_76 = arith.constant 0.000000e+00 : f32
    %70 = vector.broadcast %cst_76 : f32 to vector<256x128xf32>
    %c0_77 = arith.constant 0 : index
    %c7_78 = arith.constant 7 : index
    %c0_79 = arith.constant 0 : index
    %71 = vector.load %arg9[%c0_77, %c7_78, %c0_79] : memref<18x32x128xf32, #tpu.memory_space<vmem>>, vector<16x16x128xf32>
    %72 = vector.shape_cast %71 : vector<16x16x128xf32> to vector<256x128xf32>
    %c0_80 = arith.constant 0 : index
    %c0_81 = arith.constant 0 : index
    %c0_82 = arith.constant 0 : index
    %73 = vector.load %arg4[%c0_80, %c0_81, %c0_82] : memref<9x128x128xf32, #tpu.memory_space<vmem>>, vector<1x128x128xf32>
    %74 = vector.shape_cast %73 : vector<1x128x128xf32> to vector<128x128xf32>
    %cst_83 = arith.constant dense<0.000000e+00> : vector<256x128xf32>
    %75 = tpu.matmul %72, %74, %cst_83 {dimension_numbers = #tpu.dot_dimension_numbers<[1], [0], [0], [1], [0, 0, 1, 1], [], []>} : vector<256x128xf32>, vector<128x128xf32>, vector<256x128xf32> -> vector<256x128xf32>
    %76 = arith.addf %70, %75 : vector<256x128xf32>
    %c0_84 = arith.constant 0 : index
    %c8_85 = arith.constant 8 : index
    %c0_86 = arith.constant 0 : index
    %77 = vector.load %arg9[%c0_84, %c8_85, %c0_86] : memref<18x32x128xf32, #tpu.memory_space<vmem>>, vector<16x16x128xf32>
    %78 = vector.shape_cast %77 : vector<16x16x128xf32> to vector<256x128xf32>
    %c1_87 = arith.constant 1 : index
    %c0_88 = arith.constant 0 : index
    %c0_89 = arith.constant 0 : index
    %79 = vector.load %arg4[%c1_87, %c0_88, %c0_89] : memref<9x128x128xf32, #tpu.memory_space<vmem>>, vector<1x128x128xf32>
    %80 = vector.shape_cast %79 : vector<1x128x128xf32> to vector<128x128xf32>
    %cst_90 = arith.constant dense<0.000000e+00> : vector<256x128xf32>
    %81 = tpu.matmul %78, %80, %cst_90 {dimension_numbers = #tpu.dot_dimension_numbers<[1], [0], [0], [1], [0, 0, 1, 1], [], []>} : vector<256x128xf32>, vector<128x128xf32>, vector<256x128xf32> -> vector<256x128xf32>
    %82 = arith.addf %76, %81 : vector<256x128xf32>
    %c0_91 = arith.constant 0 : index
    %c9_92 = arith.constant 9 : index
    %c0_93 = arith.constant 0 : index
    %83 = vector.load %arg9[%c0_91, %c9_92, %c0_93] : memref<18x32x128xf32, #tpu.memory_space<vmem>>, vector<16x16x128xf32>
    %84 = vector.shape_cast %83 : vector<16x16x128xf32> to vector<256x128xf32>
    %c2_94 = arith.constant 2 : index
    %c0_95 = arith.constant 0 : index
    %c0_96 = arith.constant 0 : index
    %85 = vector.load %arg4[%c2_94, %c0_95, %c0_96] : memref<9x128x128xf32, #tpu.memory_space<vmem>>, vector<1x128x128xf32>
    %86 = vector.shape_cast %85 : vector<1x128x128xf32> to vector<128x128xf32>
    %cst_97 = arith.constant dense<0.000000e+00> : vector<256x128xf32>
    %87 = tpu.matmul %84, %86, %cst_97 {dimension_numbers = #tpu.dot_dimension_numbers<[1], [0], [0], [1], [0, 0, 1, 1], [], []>} : vector<256x128xf32>, vector<128x128xf32>, vector<256x128xf32> -> vector<256x128xf32>
    %88 = arith.addf %82, %87 : vector<256x128xf32>
    %c1_98 = arith.constant 1 : index
    %c7_99 = arith.constant 7 : index
    %c0_100 = arith.constant 0 : index
    %89 = vector.load %arg9[%c1_98, %c7_99, %c0_100] : memref<18x32x128xf32, #tpu.memory_space<vmem>>, vector<16x16x128xf32>
    %90 = vector.shape_cast %89 : vector<16x16x128xf32> to vector<256x128xf32>
    %c3_101 = arith.constant 3 : index
    %c0_102 = arith.constant 0 : index
    %c0_103 = arith.constant 0 : index
    %91 = vector.load %arg4[%c3_101, %c0_102, %c0_103] : memref<9x128x128xf32, #tpu.memory_space<vmem>>, vector<1x128x128xf32>
    %92 = vector.shape_cast %91 : vector<1x128x128xf32> to vector<128x128xf32>
    %cst_104 = arith.constant dense<0.000000e+00> : vector<256x128xf32>
    %93 = tpu.matmul %90, %92, %cst_104 {dimension_numbers = #tpu.dot_dimension_numbers<[1], [0], [0], [1], [0, 0, 1, 1], [], []>} : vector<256x128xf32>, vector<128x128xf32>, vector<256x128xf32> -> vector<256x128xf32>
    %94 = arith.addf %88, %93 : vector<256x128xf32>
    %c1_105 = arith.constant 1 : index
    %c8_106 = arith.constant 8 : index
    %c0_107 = arith.constant 0 : index
    %95 = vector.load %arg9[%c1_105, %c8_106, %c0_107] : memref<18x32x128xf32, #tpu.memory_space<vmem>>, vector<16x16x128xf32>
    %96 = vector.shape_cast %95 : vector<16x16x128xf32> to vector<256x128xf32>
    %c4_108 = arith.constant 4 : index
    %c0_109 = arith.constant 0 : index
    %c0_110 = arith.constant 0 : index
    %97 = vector.load %arg4[%c4_108, %c0_109, %c0_110] : memref<9x128x128xf32, #tpu.memory_space<vmem>>, vector<1x128x128xf32>
    %98 = vector.shape_cast %97 : vector<1x128x128xf32> to vector<128x128xf32>
    %cst_111 = arith.constant dense<0.000000e+00> : vector<256x128xf32>
    %99 = tpu.matmul %96, %98, %cst_111 {dimension_numbers = #tpu.dot_dimension_numbers<[1], [0], [0], [1], [0, 0, 1, 1], [], []>} : vector<256x128xf32>, vector<128x128xf32>, vector<256x128xf32> -> vector<256x128xf32>
    %100 = arith.addf %94, %99 : vector<256x128xf32>
    %c1_112 = arith.constant 1 : index
    %c9_113 = arith.constant 9 : index
    %c0_114 = arith.constant 0 : index
    %101 = vector.load %arg9[%c1_112, %c9_113, %c0_114] : memref<18x32x128xf32, #tpu.memory_space<vmem>>, vector<16x16x128xf32>
    %102 = vector.shape_cast %101 : vector<16x16x128xf32> to vector<256x128xf32>
    %c5_115 = arith.constant 5 : index
    %c0_116 = arith.constant 0 : index
    %c0_117 = arith.constant 0 : index
    %103 = vector.load %arg4[%c5_115, %c0_116, %c0_117] : memref<9x128x128xf32, #tpu.memory_space<vmem>>, vector<1x128x128xf32>
    %104 = vector.shape_cast %103 : vector<1x128x128xf32> to vector<128x128xf32>
    %cst_118 = arith.constant dense<0.000000e+00> : vector<256x128xf32>
    %105 = tpu.matmul %102, %104, %cst_118 {dimension_numbers = #tpu.dot_dimension_numbers<[1], [0], [0], [1], [0, 0, 1, 1], [], []>} : vector<256x128xf32>, vector<128x128xf32>, vector<256x128xf32> -> vector<256x128xf32>
    %106 = arith.addf %100, %105 : vector<256x128xf32>
    %c2_119 = arith.constant 2 : index
    %c7_120 = arith.constant 7 : index
    %c0_121 = arith.constant 0 : index
    %107 = vector.load %arg9[%c2_119, %c7_120, %c0_121] : memref<18x32x128xf32, #tpu.memory_space<vmem>>, vector<16x16x128xf32>
    %108 = vector.shape_cast %107 : vector<16x16x128xf32> to vector<256x128xf32>
    %c6_122 = arith.constant 6 : index
    %c0_123 = arith.constant 0 : index
    %c0_124 = arith.constant 0 : index
    %109 = vector.load %arg4[%c6_122, %c0_123, %c0_124] : memref<9x128x128xf32, #tpu.memory_space<vmem>>, vector<1x128x128xf32>
    %110 = vector.shape_cast %109 : vector<1x128x128xf32> to vector<128x128xf32>
    %cst_125 = arith.constant dense<0.000000e+00> : vector<256x128xf32>
    %111 = tpu.matmul %108, %110, %cst_125 {dimension_numbers = #tpu.dot_dimension_numbers<[1], [0], [0], [1], [0, 0, 1, 1], [], []>} : vector<256x128xf32>, vector<128x128xf32>, vector<256x128xf32> -> vector<256x128xf32>
    %112 = arith.addf %106, %111 : vector<256x128xf32>
    %c2_126 = arith.constant 2 : index
    %c8_127 = arith.constant 8 : index
    %c0_128 = arith.constant 0 : index
    %113 = vector.load %arg9[%c2_126, %c8_127, %c0_128] : memref<18x32x128xf32, #tpu.memory_space<vmem>>, vector<16x16x128xf32>
    %114 = vector.shape_cast %113 : vector<16x16x128xf32> to vector<256x128xf32>
    %c7_129 = arith.constant 7 : index
    %c0_130 = arith.constant 0 : index
    %c0_131 = arith.constant 0 : index
    %115 = vector.load %arg4[%c7_129, %c0_130, %c0_131] : memref<9x128x128xf32, #tpu.memory_space<vmem>>, vector<1x128x128xf32>
    %116 = vector.shape_cast %115 : vector<1x128x128xf32> to vector<128x128xf32>
    %cst_132 = arith.constant dense<0.000000e+00> : vector<256x128xf32>
    %117 = tpu.matmul %114, %116, %cst_132 {dimension_numbers = #tpu.dot_dimension_numbers<[1], [0], [0], [1], [0, 0, 1, 1], [], []>} : vector<256x128xf32>, vector<128x128xf32>, vector<256x128xf32> -> vector<256x128xf32>
    %118 = arith.addf %112, %117 : vector<256x128xf32>
    %c2_133 = arith.constant 2 : index
    %c9_134 = arith.constant 9 : index
    %c0_135 = arith.constant 0 : index
    %119 = vector.load %arg9[%c2_133, %c9_134, %c0_135] : memref<18x32x128xf32, #tpu.memory_space<vmem>>, vector<16x16x128xf32>
    %120 = vector.shape_cast %119 : vector<16x16x128xf32> to vector<256x128xf32>
    %c8_136 = arith.constant 8 : index
    %c0_137 = arith.constant 0 : index
    %c0_138 = arith.constant 0 : index
    %121 = vector.load %arg4[%c8_136, %c0_137, %c0_138] : memref<9x128x128xf32, #tpu.memory_space<vmem>>, vector<1x128x128xf32>
    %122 = vector.shape_cast %121 : vector<1x128x128xf32> to vector<128x128xf32>
    %cst_139 = arith.constant dense<0.000000e+00> : vector<256x128xf32>
    %123 = tpu.matmul %120, %122, %cst_139 {dimension_numbers = #tpu.dot_dimension_numbers<[1], [0], [0], [1], [0, 0, 1, 1], [], []>} : vector<256x128xf32>, vector<128x128xf32>, vector<256x128xf32> -> vector<256x128xf32>
    %124 = arith.addf %118, %123 : vector<256x128xf32>
    %125 = vector.broadcast %69 : vector<1x128xf32> to vector<256x128xf32>
    %126 = arith.addf %124, %125 : vector<256x128xf32>
    %cst_140 = arith.constant 0.000000e+00 : f32
    %127 = vector.broadcast %cst_140 : f32 to vector<256x128xf32>
    %128 = arith.maximumf %126, %127 : vector<256x128xf32>
    %129 = vector.shape_cast %128 : vector<256x128xf32> to vector<16x16x128xf32>
    %c0_141 = arith.constant 0 : index
    %c0_142 = arith.constant 0 : index
    %c0_143 = arith.constant 0 : index
    %c0_144 = arith.constant 0 : index
    %130 = vector.load %arg6[%c0_141, %c0_142, %c0_143, %c0_144] : memref<1x16x16x128xf32, #tpu.memory_space<vmem>>, vector<1x16x16x128xf32>
    %131 = vector.shape_cast %130 : vector<1x16x16x128xf32> to vector<16x16x128xf32>
    %132 = vector.shape_cast %129 : vector<16x16x128xf32> to vector<1x16x16x128xf32>
    tpu.vector_store %arg6[%c0_141, %c0_142, %c0_143, %c0_144], %132 {strides = array<i32>} : memref<1x16x16x128xf32, #tpu.memory_space<vmem>>, vector<1x16x16x128xf32>,
    %133 = vector.shape_cast %128 : vector<256x128xf32> to vector<8x2x16x128xf32>
    %cst_145 = arith.constant dense<0xFF800000> : vector<8x16x128xf32>
    %134 = vector.multi_reduction <maximumf>, %133, %cst_145 [1] : vector<8x2x16x128xf32> to vector<8x16x128xf32>
    %c0_146 = arith.constant 0 : index
    %c0_147 = arith.constant 0 : index
    %c0_148 = arith.constant 0 : index
    %135 = vector.load %arg10[%c0_146, %c0_147, %c0_148] : memref<8x16x128xf32, #tpu.memory_space<vmem>>, vector<8x16x128xf32>
    tpu.vector_store %arg10[%c0_146, %c0_147, %c0_148], %134 {strides = array<i32>} : memref<8x16x128xf32, #tpu.memory_space<vmem>>, vector<8x16x128xf32>,
    %c0_149 = arith.constant 0 : index
    %c0_150 = arith.constant 0 : index
    %c0_151 = arith.constant 0 : index
    %136 = tpu.strided_load %arg10[%c0_149, %c0_150, %c0_151] {strides = array<i32: 1, 2, 1>} : memref<8x16x128xf32, #tpu.memory_space<vmem>>, vector<8x8x128xf32>
    %c0_152 = arith.constant 0 : index
    %c1_153 = arith.constant 1 : index
    %c0_154 = arith.constant 0 : index
    %137 = tpu.strided_load %arg10[%c0_152, %c1_153, %c0_154] {strides = array<i32: 1, 2, 1>} : memref<8x16x128xf32, #tpu.memory_space<vmem>>, vector<8x8x128xf32>
    %138 = arith.maximumf %136, %137 : vector<8x8x128xf32>
    %c0_155 = arith.constant 0 : index
    %c0_156 = arith.constant 0 : index
    %c0_157 = arith.constant 0 : index
    %c0_158 = arith.constant 0 : index
    %139 = vector.load %arg7[%c0_155, %c0_156, %c0_157, %c0_158] : memref<1x8x8x128xf32, #tpu.memory_space<vmem>>, vector<1x8x8x128xf32>
    %140 = vector.shape_cast %139 : vector<1x8x8x128xf32> to vector<8x8x128xf32>
    %141 = vector.shape_cast %138 : vector<8x8x128xf32> to vector<1x8x8x128xf32>
    tpu.vector_store %arg7[%c0_155, %c0_156, %c0_157, %c0_158], %141 {strides = array<i32>} : memref<1x8x8x128xf32, #tpu.memory_space<vmem>>, vector<1x8x8x128xf32>,
    return
  }
  func.func @transform_0(%arg0: i32) -> (i32, i32, i32, i32) {
    %c0_i32 = arith.constant 0 : i32
    %c0_i32_0 = arith.constant 0 : i32
    %c0_i32_1 = arith.constant 0 : i32
    %c0_i32_2 = arith.constant 0 : i32
    return %arg0, %c0_i32, %c0_i32_0, %c0_i32_1 : i32, i32, i32, i32
  }
  func.func @transform_1(%arg0: i32) -> (i32, i32, i32) {
    %c0_i32 = arith.constant 0 : i32
    %c0_i32_0 = arith.constant 0 : i32
    %c0_i32_1 = arith.constant 0 : i32
    %c0_i32_2 = arith.constant 0 : i32
    return %c0_i32, %c0_i32_0, %c0_i32_1 : i32, i32, i32
  }
  func.func @transform_2(%arg0: i32) -> (i32, i32) {
    %c0_i32 = arith.constant 0 : i32
    %c0_i32_0 = arith.constant 0 : i32
    %c0_i32_1 = arith.constant 0 : i32
    return %c0_i32, %c0_i32_0 : i32, i32
  }
  func.func @transform_3(%arg0: i32) -> (i32, i32, i32) {
    %c0_i32 = arith.constant 0 : i32
    %c0_i32_0 = arith.constant 0 : i32
    %c0_i32_1 = arith.constant 0 : i32
    %c0_i32_2 = arith.constant 0 : i32
    return %c0_i32, %c0_i32_0, %c0_i32_1 : i32, i32, i32
  }
  func.func @transform_4(%arg0: i32) -> (i32, i32) {
    %c0_i32 = arith.constant 0 : i32
    %c0_i32_0 = arith.constant 0 : i32
    %c0_i32_1 = arith.constant 0 : i32
    return %c0_i32, %c0_i32_0 : i32, i32
  }
  func.func @transform_5(%arg0: i32) -> (i32, i32, i32, i32) {
    %c0_i32 = arith.constant 0 : i32
    %c0_i32_0 = arith.constant 0 : i32
    %c0_i32_1 = arith.constant 0 : i32
    %c0_i32_2 = arith.constant 0 : i32
    return %arg0, %c0_i32, %c0_i32_0, %c0_i32_1 : i32, i32, i32, i32
  }
  func.func @transform_6(%arg0: i32) -> (i32, i32, i32, i32) {
    %c0_i32 = arith.constant 0 : i32
    %c0_i32_0 = arith.constant 0 : i32
    %c0_i32_1 = arith.constant 0 : i32
    %c0_i32_2 = arith.constant 0 : i32
    return %arg0, %c0_i32, %c0_i32_0, %c0_i32_1 : i32, i32, i32, i32
  }
}

</mosaic_0001>

<bundles_post_ra>
// kernel: mini_encoder_forward.1
= control target key start
LH: loop header
LB: loop body
LE: loop exit
PB: predicated region body
PF: predicated region fallthrough
CT: control target
= control target key end

     0   :  { %s10207_s21 = smov 0   ;;  %s12289_s0 = inlined_call_operand.vmem [shape: f32[2,16,16,4], index: 0, kind: input, shape index: {}]   ;;  %s12290_s1 = inlined_call_operand.vmem [shape: f32[9,4,128], index: 1, kind: input, shape index: {}]   ;;  %s12291_s2 = inlined_call_operand.vmem [shape: f32[1,128], index: 2, kind: input, shape index: {}]   ;;  %s12292_s3 = inlined_call_operand.vmem [shape: f32[9,128,128], index: 3, kind: input, shape index: {}]   ;;  %s12293_s4 = inlined_call_operand.vmem [shape: f32[1,128], index: 4, kind: input, shape index: {}]   ;;  %s12294_s5 = inlined_call_operand.vmem [shape: f32[2,16,16,128], index: 5, kind: output, shape index: {0}]   ;;  %s12295_s6 = inlined_call_operand.vmem [shape: f32[2,8,8,128], index: 6, kind: output, shape index: {1}]  }
   0x1 LB: > { %s6986_s22 = sadd.s32 4294967295, %s10169_s21   ;;  %p6990_p0 = scmp.ge.s32.totalorder %s10169_s21, 1  ;;  %s10169_s21 = sphi %s10207_s21, %s17_s21  }
   0x2   : > { %p215_p1 = scmp.lt.s32.totalorder %s10169_s21, 3 }
   0x4   : > { %p216_p2 = pnand %p6990_p0, %p215_p1 }
   0x6   : > { %219 = sbr.rel (%p216_p2) target bundleno = 1603 (0x643), region = 40 }
   0xd   : > { %v10218_v0 = vld [vmem:[%s12290_s1 + $0x4] sm:$0xf]  ;;  %vm567_vm0 = vcmask 1043456   ;;  %vm265_vm1 = vcmask 31744   ;;  %p10222_p3 = scmp.lt.s32.totalorder %s6986_s22, 1  ;;  %v10171_v1 = vmov 0.0  }
   0xe   : > { %8166 = vmatprep.subr.msk.mxu0 %vm567_vm0, %v10218_v0  ;;  %267 = vst.msk [vmem:[#allocation2 + $0x8] sm:$0xff] %vm265_vm1, %v10171_v1  ;;  %266 = vst.msk [vmem:[#allocation2] sm:$0xff] %vm265_vm1, %v10171_v1  ;;  %v436_v2 = vld [vmem:[%s12290_s1] sm:$0xf]  ;;  %v10444_v9 = vld [vmem:[%s12290_s1 + $0x8] sm:$0xf] }
   0xf   : > { %268 = vst.msk [vmem:[#allocation2 + $0x10] sm:$0xff] %vm265_vm1, %v10171_v1  ;;  %269 = vst.msk [vmem:[#allocation2 + $0x18] sm:$0xff] %vm265_vm1, %v10171_v1  ;;  %8167 = vmatpush3.msk.msra.mxu0 %vm567_vm0, %v10218_v0  ;;  %s12508_s22 = smov (!%p10222_p3, %s6986_s22), 1 }
  0x10   : > { %270 = vst.msk [vmem:[#allocation2 + $0x20] sm:$0xff] %vm265_vm1, %v10171_v1  ;;  %271 = vst.msk [vmem:[#allocation2 + $0x28] sm:$0xff] %vm265_vm1, %v10171_v1  ;;  %8216 = vmatprep.subr.msk.mxu0 %vm567_vm0, %v436_v2  ;;  %s7434_s28 = sshll.u32 %s12508_s22, 8 }
  0x11   : > { %272 = vst.msk [vmem:[#allocation2 + $0x30] sm:$0xff] %vm265_vm1, %v10171_v1  ;;  %273 = vst.msk [vmem:[#allocation2 + $0x38] sm:$0xff] %vm265_vm1, %v10171_v1  ;;  %s10430_s7 = scalar_lea.vmem %s12289_s0, %s7434_s28  ;;  %s12203_s24 = scalar_lea.vmem %s12294_s5, %s7434_s28 }
  0x12   : > { %274 = vst.msk [vmem:[#allocation2 + $0x40] sm:$0xff] %vm265_vm1, %v10171_v1  ;;  %275 = vst.msk [vmem:[#allocation2 + $0x48] sm:$0xff] %vm265_vm1, %v10171_v1  ;;  %v338_v3 = vld [vmem:[%s10430_s7] sm:$0xff]  ;;  %v339_v4 = vld [vmem:[%s10430_s7 + $0x8] sm:$0xff]  ;;  %s7436_s28 = sshll.u32 %s12508_s22, 6 }
  0x13   : > { %276 = vst.msk [vmem:[#allocation2 + $0x50] sm:$0xff] %vm265_vm1, %v10171_v1  ;;  %277 = vst.msk [vmem:[#allocation2 + $0x58] sm:$0xff] %vm265_vm1, %v10171_v1  ;;  %v340_v5 = vld [vmem:[%s10430_s7 + $0x10] sm:$0xff]  ;;  %v341_v6 = vld [vmem:[%s10430_s7 + $0x18] sm:$0xff]  ;;  %s12230_s27 = scalar_lea.vmem %s12295_s6, %s7436_s28 }
  0x14   : > { %278 = vst.msk [vmem:[#allocation2 + $0x60] sm:$0xff] %vm265_vm1, %v10171_v1  ;;  %279 = vst.msk [vmem:[#allocation2 + $0x68] sm:$0xff] %vm265_vm1, %v10171_v1  ;;  %v342_v7 = vld [vmem:[%s10430_s7 + $0x20] sm:$0xff]  ;;  %v343_v8 = vld [vmem:[%s10430_s7 + $0x28] sm:$0xff] }
  0x15   : > { %280 = vst.msk [vmem:[#allocation2 + $0x70] sm:$0xff] %vm265_vm1, %v10171_v1  ;;  %281 = vst.msk [vmem:[#allocation2 + $0x78] sm:$0xff] %vm265_vm1, %v10171_v1  ;;  %v437_v10 = vld [vmem:[#allocation2 + $0x8] sm:$0xff]  ;;  %v344_v12 = vld [vmem:[%s10430_s7 + $0x30] sm:$0xff] }
  0x16   : > { %282 = vst.msk [vmem:[#allocation2 + $0x80] sm:$0xff] %vm265_vm1, %v10171_v1  ;;  %283 = vst.msk [vmem:[#allocation2 + $0x88] sm:$0xff] %vm265_vm1, %v10171_v1  ;;  %v438_v11 = vld [vmem:[#allocation2 + $0x10] sm:$0xff]  ;;  %8168 = vmatprep.mubr.msk.f32.mxu0 %vm265_vm1, %v437_v10  ;;  %v345_v13 = vld [vmem:[%s10430_s7 + $0x38] sm:$0xff] }
  0x17   : > { %284 = vst.msk [vmem:[#allocation2 + $0x90] sm:$0xff] %vm265_vm1, %v10171_v1  ;;  %285 = vst.msk [vmem:[#allocation2 + $0x98] sm:$0xff] %vm265_vm1, %v10171_v1  ;;  %v346_v14 = vld [vmem:[%s10430_s7 + $0x40] sm:$0xff]  ;;  %v347_v15 = vld [vmem:[%s10430_s7 + $0x48] sm:$0xff]  ;;  %8169 = vmatmul.mubr.msk.f32.vlgmr.msra.gmra.mrb[0].mxu0 %vm265_vm1, %v438_v11 }
  0x18   : > { %286 = vst.msk [vmem:[#allocation2 + $0xa0] sm:$0xff] %vm265_vm1, %v10171_v1  ;;  %287 = vst.msk [vmem:[#allocation2 + $0xa8] sm:$0xff] %vm265_vm1, %v10171_v1  ;;  %v348_v16 = vld [vmem:[%s10430_s7 + $0x50] sm:$0xff]  ;;  %v349_v17 = vld [vmem:[%s10430_s7 + $0x58] sm:$0xff]  ;;  %8217 = vmatpush3.msk.msra.mxu0 %vm567_vm0, %v436_v2 }
  0x19   : > { %288 = vst.msk [vmem:[#allocation2 + $0xb0] sm:$0xff] %vm265_vm1, %v10171_v1  ;;  %289 = vst.msk [vmem:[#allocation2 + $0xb8] sm:$0xff] %vm265_vm1, %v10171_v1  ;;  %v350_v18 = vld [vmem:[%s10430_s7 + $0x60] sm:$0xff]  ;;  %v351_v19 = vld [vmem:[%s10430_s7 + $0x68] sm:$0xff]  ;;  %8266 = vmatprep.subr.msk.mxu0 %vm567_vm0, %v10444_v9 }
  0x1a   : > { %290 = vst.msk [vmem:[#allocation2 + $0xc0] sm:$0xff] %vm265_vm1, %v10171_v1  ;;  %291 = vst.msk [vmem:[#allocation2 + $0xc8] sm:$0xff] %vm265_vm1, %v10171_v1  ;;  %v352_v20 = vld [vmem:[%s10430_s7 + $0x70] sm:$0xff]  ;;  %v353_v21 = vld [vmem:[%s10430_s7 + $0x78] sm:$0xff] }
  0x1b   : > { %292 = vst.msk [vmem:[#allocation2 + $0xd0] sm:$0xff] %vm265_vm1, %v10171_v1  ;;  %293 = vst.msk [vmem:[#allocation2 + $0xd8] sm:$0xff] %vm265_vm1, %v10171_v1  ;;  %v354_v22 = vld [vmem:[%s10430_s7 + $0x80] sm:$0xff]  ;;  %v355_v23 = vld [vmem:[%s10430_s7 + $0x88] sm:$0xff] }
  0x1c   : > { %294 = vst.msk [vmem:[#allocation2 + $0xe0] sm:$0xff] %vm265_vm1, %v10171_v1  ;;  %295 = vst.msk [vmem:[#allocation2 + $0xe8] sm:$0xff] %vm265_vm1, %v10171_v1  ;;  %v356_v24 = vld [vmem:[%s10430_s7 + $0x90] sm:$0xff]  ;;  %v357_v25 = vld [vmem:[%s10430_s7 + $0x98] sm:$0xff] }
  0x1d   : > { %296 = vst.msk [vmem:[#allocation2 + $0xf0] sm:$0xff] %vm265_vm1, %v10171_v1  ;;  %297 = vst.msk [vmem:[#allocation2 + $0xf8] sm:$0xff] %vm265_vm1, %v10171_v1  ;;  %v358_v26 = vld [vmem:[%s10430_s7 + $0xa0] sm:$0xff]  ;;  %v359_v27 = vld [vmem:[%s10430_s7 + $0xa8] sm:$0xff] }
  0x1e   : > { %298 = vst.msk [vmem:[#allocation2 + $0x100] sm:$0xff] %vm265_vm1, %v10171_v1  ;;  %299 = vst.msk [vmem:[#allocation2 + $0x108] sm:$0xff] %vm265_vm1, %v10171_v1  ;;  %v360_v31 = vld [vmem:[%s10430_s7 + $0xb0] sm:$0xff]  ;;  %v361_v32 = vld [vmem:[%s10430_s7 + $0xb8] sm:$0xff] }
  0x1f   : > { %300 = vst.msk [vmem:[#allocation2 + $0x110] sm:$0xff] %vm265_vm1, %v10171_v1  ;;  %301 = vst.msk [vmem:[#allocation2 + $0x118] sm:$0xff] %vm265_vm1, %v10171_v1  ;;  %v362_v37 = vld [vmem:[%s10430_s7 + $0xc0] sm:$0xff]  ;;  %v363_v38 = vld [vmem:[%s10430_s7 + $0xc8] sm:$0xff] }
  0x20   : > { %302 = vst.msk [vmem:[#allocation2 + $0x120] sm:$0xff] %vm265_vm1, %v10171_v1  ;;  %303 = vst.msk [vmem:[#allocation2 + $0x128] sm:$0xff] %vm265_vm1, %v10171_v1  ;;  %v364_v39 = vld [vmem:[%s10430_s7 + $0xd0] sm:$0xff]  ;;  %v365_v40 = vld [vmem:[%s10430_s7 + $0xd8] sm:$0xff] }
  0x21   : > { %304 = vst.msk [vmem:[#allocation2 + $0x130] sm:$0xff] %vm265_vm1, %v10171_v1  ;;  %305 = vst.msk [vmem:[#allocation2 + $0x138] sm:$0xff] %vm265_vm1, %v10171_v1  ;;  %v366_v41 = vld [vmem:[%s10430_s7 + $0xe0] sm:$0xff]  ;;  %v367_v42 = vld [vmem:[%s10430_s7 + $0xe8] sm:$0xff] }
  0x22   : > { %306 = vst.msk [vmem:[#allocation2 + $0x140] sm:$0xff] %vm265_vm1, %v10171_v1  ;;  %307 = vst.msk [vmem:[#allocation2 + $0x148] sm:$0xff] %vm265_vm1, %v10171_v1  ;;  %v404_v2 = vld [vmem:[#allocation2 + $0x7] sm:$0xff] }
  0x23   : > { %308 = vst.msk [vmem:[#allocation2 + $0x150] sm:$0xff] %vm265_vm1, %v10171_v1  ;;  %309 = vst.msk [vmem:[#allocation2 + $0x158] sm:$0xff] %vm265_vm1, %v10171_v1 }
  0x24   : > { %310 = vst.msk [vmem:[#allocation2 + $0x160] sm:$0xff] %vm265_vm1, %v10171_v1  ;;  %311 = vst.msk [vmem:[#allocation2 + $0x168] sm:$0xff] %vm265_vm1, %v10171_v1 }
  0x25   : > { %312 = vst.msk [vmem:[#allocation2 + $0x170] sm:$0xff] %vm265_vm1, %v10171_v1  ;;  %313 = vst.msk [vmem:[#allocation2 + $0x178] sm:$0xff] %vm265_vm1, %v10171_v1 }
  0x26   : > { %314 = vst.msk [vmem:[#allocation2 + $0x180] sm:$0xff] %vm265_vm1, %v10171_v1  ;;  %315 = vst.msk [vmem:[#allocation2 + $0x188] sm:$0xff] %vm265_vm1, %v10171_v1 }
  0x27   : > { %316 = vst.msk [vmem:[#allocation2 + $0x190] sm:$0xff] %vm265_vm1, %v10171_v1  ;;  %317 = vst.msk [vmem:[#allocation2 + $0x198] sm:$0xff] %vm265_vm1, %v10171_v1 }
  0x28   : > { %318 = vst.msk [vmem:[#allocation2 + $0x1a0] sm:$0xff] %vm265_vm1, %v10171_v1  ;;  %319 = vst.msk [vmem:[#allocation2 + $0x1a8] sm:$0xff] %vm265_vm1, %v10171_v1 }
  0x29   : > { %320 = vst.msk [vmem:[#allocation2 + $0x1b0] sm:$0xff] %vm265_vm1, %v10171_v1  ;;  %321 = vst.msk [vmem:[#allocation2 + $0x1b8] sm:$0xff] %vm265_vm1, %v10171_v1 }
  0x2a   : > { %322 = vst.msk [vmem:[#allocation2 + $0x1c0] sm:$0xff] %vm265_vm1, %v10171_v1  ;;  %323 = vst.msk [vmem:[#allocation2 + $0x1c8] sm:$0xff] %vm265_vm1, %v10171_v1 }
  0x2b   : > { %324 = vst.msk [vmem:[#allocation2 + $0x1d0] sm:$0xff] %vm265_vm1, %v10171_v1  ;;  %325 = vst.msk [vmem:[#allocation2 + $0x1d8] sm:$0xff] %vm265_vm1, %v10171_v1 }
  0x2c   : > { %326 = vst.msk [vmem:[#allocation2 + $0x1e0] sm:$0xff] %vm265_vm1, %v10171_v1  ;;  %327 = vst.msk [vmem:[#allocation2 + $0x1e8] sm:$0xff] %vm265_vm1, %v10171_v1 }
  0x2d   : > { %328 = vst.msk [vmem:[#allocation2 + $0x1f0] sm:$0xff] %vm265_vm1, %v10171_v1  ;;  %329 = vst.msk [vmem:[#allocation2 + $0x1f8] sm:$0xff] %vm265_vm1, %v10171_v1 }
  0x2e   : > { %330 = vst.msk [vmem:[#allocation2 + $0x200] sm:$0xff] %vm265_vm1, %v10171_v1  ;;  %331 = vst.msk [vmem:[#allocation2 + $0x208] sm:$0xff] %vm265_vm1, %v10171_v1 }
  0x2f   : > { %332 = vst.msk [vmem:[#allocation2 + $0x210] sm:$0xff] %vm265_vm1, %v10171_v1  ;;  %333 = vst.msk [vmem:[#allocation2 + $0x218] sm:$0xff] %vm265_vm1, %v10171_v1 }
  0x30   : > { %334 = vst.msk [vmem:[#allocation2 + $0x220] sm:$0xff] %vm265_vm1, %v10171_v1  ;;  %335 = vst.msk [vmem:[#allocation2 + $0x228] sm:$0xff] %vm265_vm1, %v10171_v1 }
  0x31   : > { %336 = vst.msk [vmem:[#allocation2 + $0x230] sm:$0xff] %vm265_vm1, %v10171_v1  ;;  %337 = vst.msk [vmem:[#allocation2 + $0x238] sm:$0xff] %vm265_vm1, %v10171_v1 }
  0x32   : > { %3921 = vst [vmem:[#allocation3] sm:$0xff] %v10171_v1  ;;  %3922 = vst [vmem:[#allocation3 + $0x8] sm:$0xff] %v10171_v1 }
  0x33   : > { %3923 = vst [vmem:[#allocation3 + $0x10] sm:$0xff] %v10171_v1  ;;  %3924 = vst [vmem:[#allocation3 + $0x18] sm:$0xff] %v10171_v1 }
  0x34   : > { %3925 = vst [vmem:[#allocation3 + $0x20] sm:$0xff] %v10171_v1  ;;  %3928 = vst [vmem:[#allocation3 + $0x38] sm:$0xff] %v10171_v1 }
  0x35   : > { %3929 = vst [vmem:[#allocation3 + $0x40] sm:$0xff] %v10171_v1  ;;  %3932 = vst [vmem:[#allocation3 + $0x58] sm:$0xff] %v10171_v1 }
  0x36   : > { %3933 = vst [vmem:[#allocation3 + $0x60] sm:$0xff] %v10171_v1  ;;  %3936 = vst [vmem:[#allocation3 + $0x78] sm:$0xff] %v10171_v1 }
  0x37   : > { %3937 = vst [vmem:[#allocation3 + $0x80] sm:$0xff] %v10171_v1  ;;  %3940 = vst [vmem:[#allocation3 + $0x98] sm:$0xff] %v10171_v1 }
  0x38   : > { %3941 = vst [vmem:[#allocation3 + $0xa0] sm:$0xff] %v10171_v1  ;;  %3944 = vst [vmem:[#allocation3 + $0xb8] sm:$0xff] %v10171_v1 }
  0x39   : > { %3945 = vst [vmem:[#allocation3 + $0xc0] sm:$0xff] %v10171_v1  ;;  %3948 = vst [vmem:[#allocation3 + $0xd8] sm:$0xff] %v10171_v1 }
  0x3a   : > { %3949 = vst [vmem:[#allocation3 + $0xe0] sm:$0xff] %v10171_v1  ;;  %3952 = vst [vmem:[#allocation3 + $0xf8] sm:$0xff] %v10171_v1 }
  0x3b   : > { %3953 = vst [vmem:[#allocation3 + $0x100] sm:$0xff] %v10171_v1  ;;  %3956 = vst [vmem:[#allocation3 + $0x118] sm:$0xff] %v10171_v1 }
  0x3c   : > { %3957 = vst [vmem:[#allocation3 + $0x120] sm:$0xff] %v10171_v1  ;;  %3960 = vst [vmem:[#allocation3 + $0x138] sm:$0xff] %v10171_v1 }
  0x3d   : > { %3961 = vst [vmem:[#allocation3 + $0x140] sm:$0xff] %v10171_v1  ;;  %3964 = vst [vmem:[#allocation3 + $0x158] sm:$0xff] %v10171_v1 }
  0x3e   : > { %3965 = vst [vmem:[#allocation3 + $0x160] sm:$0xff] %v10171_v1  ;;  %3968 = vst [vmem:[#allocation3 + $0x178] sm:$0xff] %v10171_v1 }
  0x3f   : > { %3969 = vst [vmem:[#allocation3 + $0x180] sm:$0xff] %v10171_v1  ;;  %3972 = vst [vmem:[#allocation3 + $0x198] sm:$0xff] %v10171_v1 }
  0x40   : > { %3973 = vst [vmem:[#allocation3 + $0x1a0] sm:$0xff] %v10171_v1  ;;  %3976 = vst [vmem:[#allocation3 + $0x1b8] sm:$0xff] %v10171_v1 }
  0x41   : > { %3977 = vst [vmem:[#allocation3 + $0x1c0] sm:$0xff] %v10171_v1  ;;  %3980 = vst [vmem:[#allocation3 + $0x1d8] sm:$0xff] %v10171_v1 }
  0x42   : > { %3981 = vst [vmem:[#allocation3 + $0x1e0] sm:$0xff] %v10171_v1  ;;  %3984 = vst [vmem:[#allocation3 + $0x1f8] sm:$0xff] %v10171_v1 }
  0x43   : > { %3985 = vst [vmem:[#allocation3 + $0x200] sm:$0xff] %v10171_v1  ;;  %3988 = vst [vmem:[#allocation3 + $0x218] sm:$0xff] %v10171_v1 }
  0x44   : > { %3989 = vst [vmem:[#allocation3 + $0x220] sm:$0xff] %v10171_v1  ;;  %3990 = vst [vmem:[#allocation3 + $0x228] sm:$0xff] %v10171_v1 }
  0x45   : > { %3991 = vst [vmem:[#allocation3 + $0x230] sm:$0xff] %v10171_v1  ;;  %3992 = vst [vmem:[#allocation3 + $0x238] sm:$0xff] %v10171_v1 }
  0x46   : > { %371 = vst.msk [vmem:[#allocation2 + $0x28] sm:$0xff] %vm265_vm1, %v338_v3  ;;  %372 = vst.msk [vmem:[#allocation2 + $0x30] sm:$0xff] %vm265_vm1, %v339_v4  ;;  %v405_v3 = vld [vmem:[#allocation2 + $0xf] sm:$0xff] }
  0x47   : > { %373 = vst.msk [vmem:[#allocation2 + $0x48] sm:$0xff] %vm265_vm1, %v340_v5  ;;  %374 = vst.msk [vmem:[#allocation2 + $0x50] sm:$0xff] %vm265_vm1, %v341_v6  ;;  %v10628_v5 = vld [vmem:[%s12290_s1 + $0xc] sm:$0xf] }
  0x48   : > { %375 = vst.msk [vmem:[#allocation2 + $0x68] sm:$0xff] %vm265_vm1, %v342_v7  ;;  %376 = vst.msk [vmem:[#allocation2 + $0x70] sm:$0xff] %vm265_vm1, %v343_v8 }
  0x49   : > { %377 = vst.msk [vmem:[#allocation2 + $0x88] sm:$0xff] %vm265_vm1, %v344_v12  ;;  %378 = vst.msk [vmem:[#allocation2 + $0x90] sm:$0xff] %vm265_vm1, %v345_v13 }
  0x4a   : > { %379 = vst.msk [vmem:[#allocation2 + $0xa8] sm:$0xff] %vm265_vm1, %v346_v14  ;;  %380 = vst.msk [vmem:[#allocation2 + $0xb0] sm:$0xff] %vm265_vm1, %v347_v15 }
  0x4b   : > { %381 = vst.msk [vmem:[#allocation2 + $0xc8] sm:$0xff] %vm265_vm1, %v348_v16  ;;  %382 = vst.msk [vmem:[#allocation2 + $0xd0] sm:$0xff] %vm265_vm1, %v349_v17 }
  0x4c   : > { %383 = vst.msk [vmem:[#allocation2 + $0xe8] sm:$0xff] %vm265_vm1, %v350_v18  ;;  %384 = vst.msk [vmem:[#allocation2 + $0xf0] sm:$0xff] %vm265_vm1, %v351_v19 }
  0x4d   : > { %385 = vst.msk [vmem:[#allocation2 + $0x108] sm:$0xff] %vm265_vm1, %v352_v20  ;;  %386 = vst.msk [vmem:[#allocation2 + $0x110] sm:$0xff] %vm265_vm1, %v353_v21  ;;  %v10483_v28 = vld [vmem:[#allocation2 + $0x28] sm:$0xff]  ;;  %v10485_v29 = vld [vmem:[#allocation2 + $0x30] sm:$0xff] }
  0x4e   : > { %387 = vst.msk [vmem:[#allocation2 + $0x128] sm:$0xff] %vm265_vm1, %v354_v22  ;;  %388 = vst.msk [vmem:[#allocation2 + $0x130] sm:$0xff] %vm265_vm1, %v355_v23  ;;  %v10487_v30 = vld [vmem:[#allocation2 + $0x48] sm:$0xff]  ;;  %8171 = vmatprep.mubr.msk.f32.mxu0 %vm265_vm1, %v10483_v28  ;;  %v10500_v33 = vld [vmem:[#allocation2 + $0x50] sm:$0xff] }
  0x4f   : > { %389 = vst.msk [vmem:[#allocation2 + $0x148] sm:$0xff] %vm265_vm1, %v356_v24  ;;  %390 = vst.msk [vmem:[#allocation2 + $0x150] sm:$0xff] %vm265_vm1, %v357_v25  ;;  %8172 = vmatmul.mubr.msk.f32.gmra.mrb[2].mxu0 %vm265_vm1, %v10485_v29  ;;  %v10504_v34 = vld [vmem:[#allocation2 + $0x68] sm:$0xff]  ;;  %v10510_v35 = vld [vmem:[#allocation2 + $0x70] sm:$0xff] }
  0x50   : > { %391 = vst.msk [vmem:[#allocation2 + $0x168] sm:$0xff] %vm265_vm1, %v358_v26  ;;  %392 = vst.msk [vmem:[#allocation2 + $0x170] sm:$0xff] %vm265_vm1, %v359_v27  ;;  %8174 = vmatprep.mubr.msk.f32.mxu0 %vm265_vm1, %v10487_v30  ;;  %v10512_v36 = vld [vmem:[#allocation2 + $0x88] sm:$0xff]  ;;  %v10530_v43 = vld [vmem:[#allocation2 + $0x90] sm:$0xff] }
  0x51   : > { %393 = vst.msk [vmem:[#allocation2 + $0x188] sm:$0xff] %vm265_vm1, %v360_v31  ;;  %394 = vst.msk [vmem:[#allocation2 + $0x190] sm:$0xff] %vm265_vm1, %v361_v32  ;;  %v10532_v44 = vld [vmem:[#allocation2 + $0xa8] sm:$0xff]  ;;  %v10538_v45 = vld [vmem:[#allocation2 + $0xb0] sm:$0xff] }
  0x52   : > { %395 = vst.msk [vmem:[#allocation2 + $0x1a8] sm:$0xff] %vm265_vm1, %v362_v37  ;;  %396 = vst.msk [vmem:[#allocation2 + $0x1b0] sm:$0xff] %vm265_vm1, %v363_v38  ;;  %v10540_v46 = vld [vmem:[#allocation2 + $0xc8] sm:$0xff]  ;;  %v10546_v47 = vld [vmem:[#allocation2 + $0xd0] sm:$0xff] }
  0x53   : > { %8175 = vmatmul.mubr.msk.f32.gmra.mrb[4].mxu0 %vm265_vm1, %v10500_v33  ;;  %397 = vst.msk [vmem:[#allocation2 + $0x1c8] sm:$0xff] %vm265_vm1, %v364_v39  ;;  %398 = vst.msk [vmem:[#allocation2 + $0x1d0] sm:$0xff] %vm265_vm1, %v365_v40  ;;  %v10548_v48 = vld [vmem:[#allocation2 + $0xe8] sm:$0xff]  ;;  %v10554_v49 = vld [vmem:[#allocation2 + $0xf0] sm:$0xff] }
  0x54   : > { %8177 = vmatprep.mubr.msk.f32.mxu0 %vm265_vm1, %v10504_v34  ;;  %399 = vst.msk [vmem:[#allocation2 + $0x1e8] sm:$0xff] %vm265_vm1, %v366_v41  ;;  %400 = vst.msk [vmem:[#allocation2 + $0x1f0] sm:$0xff] %vm265_vm1, %v367_v42  ;;  %v10556_v50 = vld [vmem:[#allocation2 + $0x108] sm:$0xff]  ;;  %v10562_v51 = vld [vmem:[#allocation2 + $0x110] sm:$0xff] }
  0x55   : > { %v10564_v52 = vld [vmem:[#allocation2 + $0x128] sm:$0xff]  ;;  %v10570_v53 = vld [vmem:[#allocation2 + $0x130] sm:$0xff]  ;;  %v369_v40 = vld [vmem:[%s10430_s7 + $0xf8] sm:$0xff] }
  0x56   : > { %v10572_v54 = vld [vmem:[#allocation2 + $0x148] sm:$0xff]  ;;  %v10578_v55 = vld [vmem:[#allocation2 + $0x150] sm:$0xff]  ;;  %402 = vst.msk [vmem:[#allocation2 + $0x210] sm:$0xff] %vm265_vm1, %v369_v40 }
  0x57   : > { %8178 = vmatmul.mubr.msk.f32.gmra.mrb[6].mxu0 %vm265_vm1, %v10510_v35  ;;  %v10580_v56 = vld [vmem:[#allocation2 + $0x168] sm:$0xff]  ;;  %v10586_v57 = vld [vmem:[#allocation2 + $0x170] sm:$0xff] }
  0x58   : > { %8180 = vmatprep.mubr.msk.f32.mxu0 %vm265_vm1, %v10512_v36  ;;  %v10588_v58 = vld [vmem:[#allocation2 + $0x188] sm:$0xff]  ;;  %v10594_v59 = vld [vmem:[#allocation2 + $0x190] sm:$0xff] }
  0x59   : > { %v10596_v60 = vld [vmem:[#allocation2 + $0x1a8] sm:$0xff]  ;;  %v10602_v61 = vld [vmem:[#allocation2 + $0x1b0] sm:$0xff] }
  0x5a   : > { %v10604_v62 = vld [vmem:[#allocation2 + $0x1c8] sm:$0xff]  ;;  %v10610_v63 = vld [vmem:[#allocation2 + $0x1d0] sm:$0xff] }
  0x5b   : > { %8181 = vmatmul.mubr.msk.f32.gmra.mrb[8].mxu0 %vm265_vm1, %v10530_v43  ;;  %12377 = vst [vmem:[#allocation5_spill] sm:$0xff] %v10604_v62  ;;  %12378 = vst [vmem:[#allocation6_spill] sm:$0xff] %v10610_v63  ;;  %v10612_v0 = vld [vmem:[#allocation2 + $0x1e8] sm:$0xff]  ;;  %v10618_v1 = vld [vmem:[#allocation2 + $0x1f0] sm:$0xff] }
  0x5c   : > { %8183 = vmatprep.mubr.msk.f32.mxu0 %vm265_vm1, %v10532_v44  ;;  %12379 = vst [vmem:[#allocation7_spill] sm:$0xff] %v10612_v0  ;;  %12380 = vst [vmem:[#allocation8_spill] sm:$0xff] %v10618_v1  ;;  %v10623_v4 = vld [vmem:[#allocation2 + $0x27] sm:$0xff]  ;;  %v10635_v6 = vld [vmem:[#allocation2 + $0x2f] sm:$0xff] }
  0x5d   : > { %v10637_v7 = vld [vmem:[#allocation2 + $0x47] sm:$0xff]  ;;  %v10645_v8 = vld [vmem:[#allocation2 + $0x4f] sm:$0xff] }
  0x5e   : > { %v10647_v10 = vld [vmem:[#allocation2 + $0x67] sm:$0xff]  ;;  %v10661_v12 = vld [vmem:[#allocation2 + $0x8f] sm:$0xff] }
  0x5f   : > { %8184 = vmatmul.mubr.msk.f32.gmra.mrb[10].mxu0 %vm265_vm1, %v10538_v45  ;;  %v10655_v11 = vld [vmem:[#allocation2 + $0x87] sm:$0xff]  ;;  %v10669_v14 = vld [vmem:[#allocation2 + $0xaf] sm:$0xff] }
  0x60   : > { %8186 = vmatprep.mubr.msk.f32.mxu0 %vm265_vm1, %v10540_v46  ;;  %v10663_v13 = vld [vmem:[#allocation2 + $0xa7] sm:$0xff]  ;;  %v10677_v16 = vld [vmem:[#allocation2 + $0xcf] sm:$0xff] }
  0x61   : > { %v10671_v15 = vld [vmem:[#allocation2 + $0xc7] sm:$0xff]  ;;  %v10685_v18 = vld [vmem:[#allocation2 + $0xef] sm:$0xff] }
  0x62   : > { %v10679_v17 = vld [vmem:[#allocation2 + $0xe7] sm:$0xff]  ;;  %v10693_v20 = vld [vmem:[#allocation2 + $0x10f] sm:$0xff] }
  0x63   : > { %8187 = vmatmul.mubr.msk.f32.gmra.mrb[12].mxu0 %vm265_vm1, %v10546_v47  ;;  %v10687_v19 = vld [vmem:[#allocation2 + $0x107] sm:$0xff]  ;;  %v10701_v22 = vld [vmem:[#allocation2 + $0x12f] sm:$0xff] }
  0x64   : > { %8189 = vmatprep.mubr.msk.f32.mxu0 %vm265_vm1, %v10548_v48  ;;  %v10695_v21 = vld [vmem:[#allocation2 + $0x127] sm:$0xff]  ;;  %v10709_v24 = vld [vmem:[#allocation2 + $0x14f] sm:$0xff] }
  0x65   : > { %v10703_v23 = vld [vmem:[#allocation2 + $0x147] sm:$0xff]  ;;  %v10717_v26 = vld [vmem:[#allocation2 + $0x16f] sm:$0xff] }
  0x66   : > { %v10711_v25 = vld [vmem:[#allocation2 + $0x167] sm:$0xff]  ;;  %v10725_v31 = vld [vmem:[#allocation2 + $0x18f] sm:$0xff] }
  0x67   : > { %8190 = vmatmul.mubr.msk.f32.gmra.mrb[14].mxu0 %vm265_vm1, %v10554_v49  ;;  %v10719_v27 = vld [vmem:[#allocation2 + $0x187] sm:$0xff]  ;;  %v10733_v37 = vld [vmem:[#allocation2 + $0x1af] sm:$0xff] }
  0x68   : > { %8192 = vmatprep.mubr.msk.f32.mxu0 %vm265_vm1, %v10556_v50  ;;  %v10727_v32 = vld [vmem:[#allocation2 + $0x1a7] sm:$0xff]  ;;  %v368_v39 = vld [vmem:[%s10430_s7 + $0xf0] sm:$0xff] }
  0x69   : > { %v10735_v38 = vld [vmem:[#allocation2 + $0x1c7] sm:$0xff]  ;;  %401 = vst.msk [vmem:[#allocation2 + $0x208] sm:$0xff] %vm265_vm1, %v368_v39  ;;  %v10745_v41 = vld [vmem:[#allocation2 + $0x1cf] sm:$0xff] }
  0x6a   : > { %v10747_v42 = vld [vmem:[#allocation2 + $0x1e7] sm:$0xff]  ;;  %v1121_v39 = vld [vmem:[#allocation2 + $0x11] sm:$0xff] }
  0x6b   : > { %8193 = vmatmul.mubr.msk.f32.gmra.mrb[16].mxu0 %vm265_vm1, %v10562_v51  ;;  %v10758_v40 = vld [vmem:[#allocation2 + $0x29] sm:$0xff] }
  0x6c   : > { %8195 = vmatprep.mubr.msk.f32.mxu0 %vm265_vm1, %v10564_v52  ;;  %12381 = vst [vmem:[#allocation9_spill] sm:$0xff] %v10758_v40 }
  0x6f   : > { %8196 = vmatmul.mubr.msk.f32.gmra.mrb[18].mxu0 %vm265_vm1, %v10570_v53 }
  0x70   : > { %8198 = vmatprep.mubr.msk.f32.mxu0 %vm265_vm1, %v10572_v54 }
  0x73   : > { %8199 = vmatmul.mubr.msk.f32.gmra.mrb[20].mxu0 %vm265_vm1, %v10578_v55 }
  0x74   : > { %8201 = vmatprep.mubr.msk.f32.mxu0 %vm265_vm1, %v10580_v56 }
  0x77   : > { %8202 = vmatmul.mubr.msk.f32.gmra.mrb[22].mxu0 %vm265_vm1, %v10586_v57 }
  0x78   : > { %8204 = vmatprep.mubr.msk.f32.mxu0 %vm265_vm1, %v10588_v58 }
  0x7b   : > { %8205 = vmatmul.mubr.msk.f32.gmra.mrb[24].mxu0 %vm265_vm1, %v10594_v59 }
  0x7c   : > { %8207 = vmatprep.mubr.msk.f32.mxu0 %vm265_vm1, %v10596_v60 }
  0x7f   : > { %8208 = vmatmul.mubr.msk.f32.gmra.mrb[26].mxu0 %vm265_vm1, %v10602_v61 }
  0x80   : > { %8210 = vmatprep.mubr.msk.f32.mxu0 %vm265_vm1, %v10604_v62 }
  0x83   : > { %8211 = vmatmul.mubr.msk.f32.gmra.mrb[28].mxu0 %vm265_vm1, %v10610_v63  ;;  %v10772_v63 = vld [vmem:[#allocation2 + $0x49] sm:$0xff] }
  0x84   : > { %8213 = vmatprep.mubr.msk.f32.mxu0 %vm265_vm1, %v10612_v0  ;;  %v10770_v0 = vld [vmem:[#allocation2 + $0x31] sm:$0xff]  ;;  %12383 = vst [vmem:[#allocation11_spill] sm:$0xff] %v10772_v63 }
  0x85   : > { %12382 = vst [vmem:[#allocation10_spill] sm:$0xff] %v10770_v0 }
  0x87   : > { %8214 = vmatmul.mubr.msk.f32.gmra.mrb[30].mxu0 %vm265_vm1, %v10618_v1  ;;  %v10763_v1 = vld [vmem:[%s12290_s1 + $0x10] sm:$0xf] }
  0x88   : > { %8218 = vmatprep.mubr.msk.f32.mxu0 %vm265_vm1, %v404_v2  ;;  %v10753_v2 = vld [vmem:[#allocation2 + $0x1ef] sm:$0xff] }
  0x8b   : > { %8219 = vmatmul.mubr.msk.f32.vlgmr.msra.gmra.mrb[0].mxu0 %vm265_vm1, %v405_v3  ;;  %v1120_v3 = vld [vmem:[#allocation2 + $0x9] sm:$0xff] }
  0x8c   : > { %8267 = vmatpush3.msk.msra.mxu0 %vm567_vm0, %v10444_v9  ;;  %8221 = vmatprep.mubr.msk.f32.mxu0 %vm265_vm1, %v10623_v4  ;;  %v10653_v9 = vld [vmem:[#allocation2 + $0x6f] sm:$0xff] }
  0x8d   : > { %8316 = vmatprep.subr.msk.mxu0 %vm567_vm0, %v10628_v5 }
  0x8f   : > { %8222 = vmatmul.mubr.msk.f32.gmra.mrb[2].mxu0 %vm265_vm1, %v10635_v6 }
  0x90   : > { %8224 = vmatprep.mubr.msk.f32.mxu0 %vm265_vm1, %v10637_v7 }
  0x93   : > { %8225 = vmatmul.mubr.msk.f32.gmra.mrb[4].mxu0 %vm265_vm1, %v10645_v8 }
  0x94   : > { %8227 = vmatprep.mubr.msk.f32.mxu0 %vm265_vm1, %v10647_v10 }
  0x97   : > { %8228 = vmatmul.mubr.msk.f32.gmra.mrb[6].mxu0 %vm265_vm1, %v10653_v9 }
  0x98   : > { %8230 = vmatprep.mubr.msk.f32.mxu0 %vm265_vm1, %v10655_v11 }
  0x9b   : > { %8231 = vmatmul.mubr.msk.f32.gmra.mrb[8].mxu0 %vm265_vm1, %v10661_v12 }
  0x9c   : > { %8233 = vmatprep.mubr.msk.f32.mxu0 %vm265_vm1, %v10663_v13 }
  0x9f   : > { %8234 = vmatmul.mubr.msk.f32.gmra.mrb[10].mxu0 %vm265_vm1, %v10669_v14 }
  0xa0   : > { %8236 = vmatprep.mubr.msk.f32.mxu0 %vm265_vm1, %v10671_v15 }
  0xa3   : > { %8237 = vmatmul.mubr.msk.f32.gmra.mrb[12].mxu0 %vm265_vm1, %v10677_v16 }
  0xa4   : > { %8239 = vmatprep.mubr.msk.f32.mxu0 %vm265_vm1, %v10679_v17 }
  0xa7   : > { %8240 = vmatmul.mubr.msk.f32.gmra.mrb[14].mxu0 %vm265_vm1, %v10685_v18 }
  0xa8   : > { %8242 = vmatprep.mubr.msk.f32.mxu0 %vm265_vm1, %v10687_v19 }
  0xab   : > { %8243 = vmatmul.mubr.msk.f32.gmra.mrb[16].mxu0 %vm265_vm1, %v10693_v20 }
  0xac   : > { %8245 = vmatprep.mubr.msk.f32.mxu0 %vm265_vm1, %v10695_v21 }
  0xaf   : > { %8246 = vmatmul.mubr.msk.f32.gmra.mrb[18].mxu0 %vm265_vm1, %v10701_v22 }
  0xb0   : > { %8248 = vmatprep.mubr.msk.f32.mxu0 %vm265_vm1, %v10703_v23 }
  0xb3   : > { %8249 = vmatmul.mubr.msk.f32.gmra.mrb[20].mxu0 %vm265_vm1, %v10709_v24 }
  0xb4   : > { %8251 = vmatprep.mubr.msk.f32.mxu0 %vm265_vm1, %v10711_v25 }
  0xb7   : > { %8252 = vmatmul.mubr.msk.f32.gmra.mrb[22].mxu0 %vm265_vm1, %v10717_v26 }
  0xb8   : > { %8254 = vmatprep.mubr.msk.f32.mxu0 %vm265_vm1, %v10719_v27 }
  0xbb   : > { %8255 = vmatmul.mubr.msk.f32.gmra.mrb[24].mxu0 %vm265_vm1, %v10725_v31 }
  0xbc   : > { %8257 = vmatprep.mubr.msk.f32.mxu0 %vm265_vm1, %v10727_v32 }
  0xbf   : > { %8258 = vmatmul.mubr.msk.f32.gmra.mrb[26].mxu0 %vm265_vm1, %v10733_v37 }
  0xc0   : > { %8260 = vmatprep.mubr.msk.f32.mxu0 %vm265_vm1, %v10735_v38 }
  0xc3   : > { %8261 = vmatmul.mubr.msk.f32.gmra.mrb[28].mxu0 %vm265_vm1, %v10745_v41 }
  0xc4   : > { %8263 = vmatprep.mubr.msk.f32.mxu0 %vm265_vm1, %v10747_v42 }
  0xc7   : > { %8264 = vmatmul.mubr.msk.f32.gmra.mrb[30].mxu0 %vm265_vm1, %v10753_v2 }
  0xc8   : > { %8268 = vmatprep.mubr.msk.f32.mxu0 %vm265_vm1, %v1120_v3  ;;  %v10780_v3 = vld [vmem:[#allocation2 + $0x51] sm:$0xff] }
  0xc9   : > { %12384 = vst [vmem:[#allocation12_spill] sm:$0xff] %v10780_v3 }
  0xcb   : > { %8269 = vmatmul.mubr.msk.f32.vlgmr.msra.gmra.mrb[0].mxu0 %vm265_vm1, %v1121_v39  ;;  %v10782_v39 = vld [vmem:[#allocation2 + $0x69] sm:$0xff] }
  0xcc   : > { %8317 = vmatpush3.msk.msra.mxu0 %vm567_vm0, %v10628_v5  ;;  %8271 = vmatprep.mubr.msk.f32.mxu0 %vm265_vm1, %v10758_v40  ;;  %12385 = vst [vmem:[#allocation13_spill] sm:$0xff] %v10782_v39  ;;  %v10788_v5 = vld [vmem:[#allocation2 + $0x71] sm:$0xff]  ;;  %v10790_v40 = vld [vmem:[#allocation2 + $0x89] sm:$0xff] }
  0xcd   : > { %8366 = vmatprep.subr.msk.mxu0 %vm567_vm0, %v10763_v1  ;;  %12386 = vst [vmem:[#allocation14_spill] sm:$0xff] %v10788_v5  ;;  %12387 = vst [vmem:[#allocation15_spill] sm:$0xff] %v10790_v40 }
  0xcf   : > { %8272 = vmatmul.mubr.msk.f32.gmra.mrb[2].mxu0 %vm265_vm1, %v10770_v0  ;;  %v10798_v0 = vld [vmem:[#allocation2 + $0xa9] sm:$0xff] }
  0xd0   : > { %8274 = vmatprep.mubr.msk.f32.mxu0 %vm265_vm1, %v10772_v63  ;;  %v10796_v63 = vld [vmem:[#allocation2 + $0x91] sm:$0xff]  ;;  %12389 = vst [vmem:[#allocation17_spill] sm:$0xff] %v10798_v0 }
  0xd1   : > { %12388 = vst [vmem:[#allocation16_spill] sm:$0xff] %v10796_v63 }
  0xd3   : > { %8275 = vmatmul.mubr.msk.f32.gmra.mrb[4].mxu0 %vm265_vm1, %v10780_v3  ;;  %v10806_v3 = vld [vmem:[#allocation2 + $0xc9] sm:$0xff] }
  0xd4   : > { %8277 = vmatprep.mubr.msk.f32.mxu0 %vm265_vm1, %v10782_v39  ;;  %v10804_v39 = vld [vmem:[#allocation2 + $0xb1] sm:$0xff]  ;;  %12391 = vst [vmem:[#allocation19_spill] sm:$0xff] %v10806_v3 }
  0xd5   : > { %12390 = vst [vmem:[#allocation18_spill] sm:$0xff] %v10804_v39 }
  0xd7   : > { %8278 = vmatmul.mubr.msk.f32.gmra.mrb[6].mxu0 %vm265_vm1, %v10788_v5  ;;  %v10814_v5 = vld [vmem:[#allocation2 + $0xe9] sm:$0xff] }
  0xd8   : > { %8280 = vmatprep.mubr.msk.f32.mxu0 %vm265_vm1, %v10790_v40  ;;  %v10812_v40 = vld [vmem:[#allocation2 + $0xd1] sm:$0xff]  ;;  %12393 = vst [vmem:[#allocation21_spill] sm:$0xff] %v10814_v5 }
  0xd9   : > { %12392 = vst [vmem:[#allocation20_spill] sm:$0xff] %v10812_v40 }
  0xdb   : > { %8281 = vmatmul.mubr.msk.f32.gmra.mrb[8].mxu0 %vm265_vm1, %v10796_v63  ;;  %v10822_v63 = vld [vmem:[#allocation2 + $0x109] sm:$0xff] }
  0xdc   : > { %8283 = vmatprep.mubr.msk.f32.mxu0 %vm265_vm1, %v10798_v0  ;;  %v10820_v0 = vld [vmem:[#allocation2 + $0xf1] sm:$0xff]  ;;  %12395 = vst [vmem:[#allocation23_spill] sm:$0xff] %v10822_v63 }
  0xdd   : > { %12394 = vst [vmem:[#allocation22_spill] sm:$0xff] %v10820_v0 }
  0xdf   : > { %8284 = vmatmul.mubr.msk.f32.gmra.mrb[10].mxu0 %vm265_vm1, %v10804_v39  ;;  %v10830_v39 = vld [vmem:[#allocation2 + $0x129] sm:$0xff] }
  0xe0   : > { %8286 = vmatprep.mubr.msk.f32.mxu0 %vm265_vm1, %v10806_v3  ;;  %v10828_v3 = vld [vmem:[#allocation2 + $0x111] sm:$0xff]  ;;  %12397 = vst [vmem:[#allocation25_spill] sm:$0xff] %v10830_v39 }
  0xe1   : > { %12396 = vst [vmem:[#allocation24_spill] sm:$0xff] %v10828_v3 }
  0xe3   : > { %8287 = vmatmul.mubr.msk.f32.gmra.mrb[12].mxu0 %vm265_vm1, %v10812_v40  ;;  %v10838_v40 = vld [vmem:[#allocation2 + $0x149] sm:$0xff] }
  0xe4   : > { %8289 = vmatprep.mubr.msk.f32.mxu0 %vm265_vm1, %v10814_v5  ;;  %v10836_v5 = vld [vmem:[#allocation2 + $0x131] sm:$0xff]  ;;  %12399 = vst [vmem:[#allocation27_spill] sm:$0xff] %v10838_v40 }
  0xe5   : > { %12398 = vst [vmem:[#allocation26_spill] sm:$0xff] %v10836_v5 }
  0xe7   : > { %8290 = vmatmul.mubr.msk.f32.gmra.mrb[14].mxu0 %vm265_vm1, %v10820_v0  ;;  %v10846_v0 = vld [vmem:[#allocation2 + $0x169] sm:$0xff] }
  0xe8   : > { %8292 = vmatprep.mubr.msk.f32.mxu0 %vm265_vm1, %v10822_v63  ;;  %v10844_v63 = vld [vmem:[#allocation2 + $0x151] sm:$0xff]  ;;  %12401 = vst [vmem:[#allocation29_spill] sm:$0xff] %v10846_v0 }
  0xe9   : > { %12400 = vst [vmem:[#allocation28_spill] sm:$0xff] %v10844_v63 }
  0xeb   : > { %8293 = vmatmul.mubr.msk.f32.gmra.mrb[16].mxu0 %vm265_vm1, %v10828_v3  ;;  %v10854_v3 = vld [vmem:[#allocation2 + $0x189] sm:$0xff] }
  0xec   : > { %8295 = vmatprep.mubr.msk.f32.mxu0 %vm265_vm1, %v10830_v39  ;;  %v10852_v39 = vld [vmem:[#allocation2 + $0x171] sm:$0xff]  ;;  %12403 = vst [vmem:[#allocation31_spill] sm:$0xff] %v10854_v3 }
  0xed   : > { %12402 = vst [vmem:[#allocation30_spill] sm:$0xff] %v10852_v39 }
  0xef   : > { %8296 = vmatmul.mubr.msk.f32.gmra.mrb[18].mxu0 %vm265_vm1, %v10836_v5  ;;  %v10862_v5 = vld [vmem:[#allocation2 + $0x1a9] sm:$0xff] }
  0xf0   : > { %8298 = vmatprep.mubr.msk.f32.mxu0 %vm265_vm1, %v10838_v40  ;;  %v10860_v40 = vld [vmem:[#allocation2 + $0x191] sm:$0xff]  ;;  %12404 = vst [vmem:[#allocation32_spill] sm:$0xff] %v10862_v5 }
  0xf3   : > { %8299 = vmatmul.mubr.msk.f32.gmra.mrb[20].mxu0 %vm265_vm1, %v10844_v63  ;;  %v10870_v63 = vld [vmem:[#allocation2 + $0x1c9] sm:$0xff] }
  0xf4   : > { %8301 = vmatprep.mubr.msk.f32.mxu0 %vm265_vm1, %v10846_v0  ;;  %v10868_v0 = vld [vmem:[#allocation2 + $0x1b1] sm:$0xff]  ;;  %12405 = vst [vmem:[#allocation33_spill] sm:$0xff] %v10870_v63 }
  0xf7   : > { %8302 = vmatmul.mubr.msk.f32.gmra.mrb[22].mxu0 %vm265_vm1, %v10852_v39  ;;  %v10878_v39 = vld [vmem:[#allocation2 + $0x1e9] sm:$0xff] }
  0xf8   : > { %8304 = vmatprep.mubr.msk.f32.mxu0 %vm265_vm1, %v10854_v3  ;;  %v10876_v3 = vld [vmem:[#allocation2 + $0x1d1] sm:$0xff]  ;;  %12406 = vst [vmem:[#allocation34_spill] sm:$0xff] %v10878_v39 }
  0xfb   : > { %8305 = vmatmul.mubr.msk.f32.gmra.mrb[24].mxu0 %vm265_vm1, %v10860_v40 }
  0xfc   : > { %8307 = vmatprep.mubr.msk.f32.mxu0 %vm265_vm1, %v10862_v5  ;;  %v10884_v5 = vld [vmem:[#allocation2 + $0x1f1] sm:$0xff] }
  0xff   : > { %8308 = vmatmul.mubr.msk.f32.gmra.mrb[26].mxu0 %vm265_vm1, %v10868_v0 }
 0x100   : > { %8310 = vmatprep.mubr.msk.f32.mxu0 %vm265_vm1, %v10870_v63  ;;  %v7166_v63 = vld [vmem:[%s12290_s1 + $0x14] sm:$0xf] }
 0x103   : > { %8311 = vmatmul.mubr.msk.f32.gmra.mrb[28].mxu0 %vm265_vm1, %v10876_v3 }
 0x104   : > { %8313 = vmatprep.mubr.msk.f32.mxu0 %vm265_vm1, %v10878_v39 }
 0x107   : > { %8314 = vmatmul.mubr.msk.f32.gmra.mrb[30].mxu0 %vm265_vm1, %v10884_v5 }
 0x108   : > { %8318 = vmatprep.mubr.msk.f32.mxu0 %vm265_vm1, %v10623_v4  ;;  %v10958_v4 = vld [vmem:[#allocation2 + $0x20f] sm:$0xff] }
 0x10b   : > { %8319 = vmatmul.mubr.msk.f32.vlgmr.msra.gmra.mrb[0].mxu0 %vm265_vm1, %v10635_v6  ;;  %v7200_v6 = vld [vmem:[%s12290_s1 + $0x18] sm:$0xf] }
 0x10c   : > { %8367 = vmatpush3.msk.msra.mxu0 %vm567_vm0, %v10763_v1  ;;  %8321 = vmatprep.mubr.msk.f32.mxu0 %vm265_vm1, %v10637_v7  ;;  %v10952_v1 = vld [vmem:[#allocation2 + $0x207] sm:$0xff] }
 0x10d   : > { %8416 = vmatprep.subr.msk.mxu0 %vm567_vm0, %v7166_v63 }
 0x10f   : > { %8322 = vmatmul.mubr.msk.f32.gmra.mrb[2].mxu0 %vm265_vm1, %v10645_v8 }
 0x110   : > { %8324 = vmatprep.mubr.msk.f32.mxu0 %vm265_vm1, %v10647_v10 }
 0x113   : > { %8325 = vmatmul.mubr.msk.f32.gmra.mrb[4].mxu0 %vm265_vm1, %v10653_v9 }
 0x114   : > { %8327 = vmatprep.mubr.msk.f32.mxu0 %vm265_vm1, %v10655_v11 }
 0x117   : > { %8328 = vmatmul.mubr.msk.f32.gmra.mrb[6].mxu0 %vm265_vm1, %v10661_v12 }
 0x118   : > { %8330 = vmatprep.mubr.msk.f32.mxu0 %vm265_vm1, %v10663_v13 }
 0x11b   : > { %8331 = vmatmul.mubr.msk.f32.gmra.mrb[8].mxu0 %vm265_vm1, %v10669_v14 }
 0x11c   : > { %8333 = vmatprep.mubr.msk.f32.mxu0 %vm265_vm1, %v10671_v15 }
 0x11f   : > { %8334 = vmatmul.mubr.msk.f32.gmra.mrb[10].mxu0 %vm265_vm1, %v10677_v16 }
 0x120   : > { %8336 = vmatprep.mubr.msk.f32.mxu0 %vm265_vm1, %v10679_v17 }
 0x123   : > { %8337 = vmatmul.mubr.msk.f32.gmra.mrb[12].mxu0 %vm265_vm1, %v10685_v18 }
 0x124   : > { %8339 = vmatprep.mubr.msk.f32.mxu0 %vm265_vm1, %v10687_v19 }
 0x127   : > { %8340 = vmatmul.mubr.msk.f32.gmra.mrb[14].mxu0 %vm265_vm1, %v10693_v20 }
 0x128   : > { %8342 = vmatprep.mubr.msk.f32.mxu0 %vm265_vm1, %v10695_v21 }
 0x12b   : > { %8343 = vmatmul.mubr.msk.f32.gmra.mrb[16].mxu0 %vm265_vm1, %v10701_v22 }
 0x12c   : > { %8345 = vmatprep.mubr.msk.f32.mxu0 %vm265_vm1, %v10703_v23 }
 0x12f   : > { %8346 = vmatmul.mubr.msk.f32.gmra.mrb[18].mxu0 %vm265_vm1, %v10709_v24 }
 0x130   : > { %8348 = vmatprep.mubr.msk.f32.mxu0 %vm265_vm1, %v10711_v25 }
 0x133   : > { %8349 = vmatmul.mubr.msk.f32.gmra.mrb[20].mxu0 %vm265_vm1, %v10717_v26 }
 0x134   : > { %8351 = vmatprep.mubr.msk.f32.mxu0 %vm265_vm1, %v10719_v27 }
 0x137   : > { %8352 = vmatmul.mubr.msk.f32.gmra.mrb[22].mxu0 %vm265_vm1, %v10725_v31 }
 0x138   : > { %8354 = vmatprep.mubr.msk.f32.mxu0 %vm265_vm1, %v10727_v32 }
 0x13b   : > { %8355 = vmatmul.mubr.msk.f32.gmra.mrb[24].mxu0 %vm265_vm1, %v10733_v37 }
 0x13c   : > { %8357 = vmatprep.mubr.msk.f32.mxu0 %vm265_vm1, %v10735_v38 }
 0x13f   : > { %8358 = vmatmul.mubr.msk.f32.gmra.mrb[26].mxu0 %vm265_vm1, %v10745_v41 }
 0x140   : > { %8360 = vmatprep.mubr.msk.f32.mxu0 %vm265_vm1, %v10747_v42 }
 0x143   : > { %8361 = vmatmul.mubr.msk.f32.gmra.mrb[28].mxu0 %vm265_vm1, %v10753_v2 }
 0x144   : > { %8363 = vmatprep.mubr.msk.f32.mxu0 %vm265_vm1, %v10952_v1 }
 0x147   : > { %8364 = vmatmul.mubr.msk.f32.gmra.mrb[30].mxu0 %vm265_vm1, %v10958_v4 }
 0x148   : > { %8368 = vmatprep.mubr.msk.f32.mxu0 %vm265_vm1, %v10483_v28  ;;  %v12407_v28 = vld [vmem:[#allocation6_spill] sm:$0xff] }
 0x14b   : > { %8369 = vmatmul.mubr.msk.f32.vlgmr.msra.gmra.mrb[0].mxu0 %vm265_vm1, %v10485_v29  ;;  %v12408_v29 = vld [vmem:[#allocation7_spill] sm:$0xff] }
 0x14c   : > { %8417 = vmatpush3.msk.msra.mxu0 %vm567_vm0, %v7166_v63  ;;  %8371 = vmatprep.mubr.msk.f32.mxu0 %vm265_vm1, %v10487_v30  ;;  %v11025_v30 = vld [vmem:[#allocation2 + $0x208] sm:$0xff]  ;;  %v7234_v63 = vld [vmem:[%s12290_s1 + $0x1c] sm:$0xf] }
 0x14d   : > { %8466 = vmatprep.subr.msk.mxu0 %vm567_vm0, %v7200_v6  ;;  %12409 = vst [vmem:[#allocation35_spill] sm:$0xff] %v11025_v30 }
 0x14f   : > { %8372 = vmatmul.mubr.msk.f32.gmra.mrb[2].mxu0 %vm265_vm1, %v10500_v33  ;;  %v12410_v33 = vld [vmem:[#allocation8_spill] sm:$0xff] }
 0x150   : > { %8374 = vmatprep.mubr.msk.f32.mxu0 %vm265_vm1, %v10504_v34  ;;  %v11031_v34 = vld [vmem:[#allocation2 + $0x210] sm:$0xff] }
 0x151   : > { %12411 = vst [vmem:[#allocation36_spill] sm:$0xff] %v11031_v34 }
 0x153   : > { %8375 = vmatmul.mubr.msk.f32.gmra.mrb[4].mxu0 %vm265_vm1, %v10510_v35  ;;  %v12412_v35 = vld [vmem:[#allocation9_spill] sm:$0xff] }
 0x154   : > { %8377 = vmatprep.mubr.msk.f32.mxu0 %vm265_vm1, %v10512_v36 }
 0x157   : > { %8378 = vmatmul.mubr.msk.f32.gmra.mrb[6].mxu0 %vm265_vm1, %v10530_v43 }
 0x158   : > { %8380 = vmatprep.mubr.msk.f32.mxu0 %vm265_vm1, %v10532_v44 }
 0x15b   : > { %8381 = vmatmul.mubr.msk.f32.gmra.mrb[8].mxu0 %vm265_vm1, %v10538_v45 }
 0x15c   : > { %8383 = vmatprep.mubr.msk.f32.mxu0 %vm265_vm1, %v10540_v46 }
 0x15f   : > { %8384 = vmatmul.mubr.msk.f32.gmra.mrb[10].mxu0 %vm265_vm1, %v10546_v47 }
 0x160   : > { %8386 = vmatprep.mubr.msk.f32.mxu0 %vm265_vm1, %v10548_v48 }
 0x163   : > { %8387 = vmatmul.mubr.msk.f32.gmra.mrb[12].mxu0 %vm265_vm1, %v10554_v49 }
 0x164   : > { %8389 = vmatprep.mubr.msk.f32.mxu0 %vm265_vm1, %v10556_v50 }
 0x167   : > { %8390 = vmatmul.mubr.msk.f32.gmra.mrb[14].mxu0 %vm265_vm1, %v10562_v51 }
 0x168   : > { %8392 = vmatprep.mubr.msk.f32.mxu0 %vm265_vm1, %v10564_v52 }
 0x16b   : > { %8393 = vmatmul.mubr.msk.f32.gmra.mrb[16].mxu0 %vm265_vm1, %v10570_v53 }
 0x16c   : > { %8395 = vmatprep.mubr.msk.f32.mxu0 %vm265_vm1, %v10572_v54 }
 0x16f   : > { %8396 = vmatmul.mubr.msk.f32.gmra.mrb[18].mxu0 %vm265_vm1, %v10578_v55 }
 0x170   : > { %8398 = vmatprep.mubr.msk.f32.mxu0 %vm265_vm1, %v10580_v56 }
 0x173   : > { %8399 = vmatmul.mubr.msk.f32.gmra.mrb[20].mxu0 %vm265_vm1, %v10586_v57 }
 0x174   : > { %8401 = vmatprep.mubr.msk.f32.mxu0 %vm265_vm1, %v10588_v58 }
 0x177   : > { %8402 = vmatmul.mubr.msk.f32.gmra.mrb[22].mxu0 %vm265_vm1, %v10594_v59 }
 0x178   : > { %8404 = vmatprep.mubr.msk.f32.mxu0 %vm265_vm1, %v10596_v60 }
 0x17b   : > { %8405 = vmatmul.mubr.msk.f32.gmra.mrb[24].mxu0 %vm265_vm1, %v10602_v61 }
 0x17c   : > { %8407 = vmatprep.mubr.msk.f32.mxu0 %vm265_vm1, %v10604_v62  ;;  %v12422_v62 = vld [vmem:[#allocation19_spill] sm:$0xff] }
 0x17f   : > { %8408 = vmatmul.mubr.msk.f32.gmra.mrb[26].mxu0 %vm265_vm1, %v12407_v28  ;;  %v12418_v28 = vld [vmem:[#allocation15_spill] sm:$0xff] }
 0x180   : > { %8410 = vmatprep.mubr.msk.f32.mxu0 %vm265_vm1, %v12408_v29  ;;  %v12413_v29 = vld [vmem:[#allocation10_spill] sm:$0xff] }
 0x183   : > { %8411 = vmatmul.mubr.msk.f32.gmra.mrb[28].mxu0 %vm265_vm1, %v12410_v33  ;;  %v12414_v33 = vld [vmem:[#allocation11_spill] sm:$0xff] }
 0x184   : > { %8413 = vmatprep.mubr.msk.f32.mxu0 %vm265_vm1, %v11025_v30  ;;  %v12415_v30 = vld [vmem:[#allocation12_spill] sm:$0xff] }
 0x187   : > { %8414 = vmatmul.mubr.msk.f32.gmra.mrb[30].mxu0 %vm265_vm1, %v11031_v34  ;;  %v12416_v34 = vld [vmem:[#allocation13_spill] sm:$0xff] }
 0x188   : > { %8418 = vmatprep.mubr.msk.f32.mxu0 %vm265_vm1, %v12412_v35  ;;  %v12417_v35 = vld [vmem:[#allocation14_spill] sm:$0xff] }
 0x18b   : > { %8419 = vmatmul.mubr.msk.f32.vlgmr.msra.gmra.mrb[0].mxu0 %vm265_vm1, %v12413_v29  ;;  %v12419_v29 = vld [vmem:[#allocation16_spill] sm:$0xff] }
 0x18c   : > { %8467 = vmatpush3.msk.msra.mxu0 %vm567_vm0, %v7200_v6  ;;  %8421 = vmatprep.mubr.msk.f32.mxu0 %vm265_vm1, %v12414_v33  ;;  %v12420_v6 = vld [vmem:[#allocation17_spill] sm:$0xff]  ;;  %v12421_v33 = vld [vmem:[#allocation18_spill] sm:$0xff] }
 0x18d   : > { %8516 = vmatprep.subr.msk.mxu0 %vm567_vm0, %v7234_v63 }
 0x18f   : > { %8422 = vmatmul.mubr.msk.f32.gmra.mrb[2].mxu0 %vm265_vm1, %v12415_v30  ;;  %v12423_v30 = vld [vmem:[#allocation20_spill] sm:$0xff] }
 0x190   : > { %8424 = vmatprep.mubr.msk.f32.mxu0 %vm265_vm1, %v12416_v34  ;;  %v12424_v34 = vld [vmem:[#allocation21_spill] sm:$0xff] }
 0x193   : > { %8425 = vmatmul.mubr.msk.f32.gmra.mrb[4].mxu0 %vm265_vm1, %v12417_v35  ;;  %v12425_v35 = vld [vmem:[#allocation22_spill] sm:$0xff] }
 0x194   : > { %8427 = vmatprep.mubr.msk.f32.mxu0 %vm265_vm1, %v12418_v28  ;;  %v12426_v28 = vld [vmem:[#allocation23_spill] sm:$0xff] }
 0x197   : > { %8428 = vmatmul.mubr.msk.f32.gmra.mrb[6].mxu0 %vm265_vm1, %v12419_v29  ;;  %v12427_v29 = vld [vmem:[#allocation24_spill] sm:$0xff] }
 0x198   : > { %8430 = vmatprep.mubr.msk.f32.mxu0 %vm265_vm1, %v12420_v6  ;;  %v12428_v6 = vld [vmem:[#allocation25_spill] sm:$0xff] }
 0x19b   : > { %8431 = vmatmul.mubr.msk.f32.gmra.mrb[8].mxu0 %vm265_vm1, %v12421_v33  ;;  %v12429_v33 = vld [vmem:[#allocation26_spill] sm:$0xff] }
 0x19c   : > { %8433 = vmatprep.mubr.msk.f32.mxu0 %vm265_vm1, %v12422_v62  ;;  %v12430_v62 = vld [vmem:[#allocation27_spill] sm:$0xff] }
 0x19f   : > { %8434 = vmatmul.mubr.msk.f32.gmra.mrb[10].mxu0 %vm265_vm1, %v12423_v30  ;;  %v12431_v30 = vld [vmem:[#allocation28_spill] sm:$0xff] }
 0x1a0   : > { %8436 = vmatprep.mubr.msk.f32.mxu0 %vm265_vm1, %v12424_v34  ;;  %v12432_v34 = vld [vmem:[#allocation29_spill] sm:$0xff] }
 0x1a3   : > { %8437 = vmatmul.mubr.msk.f32.gmra.mrb[12].mxu0 %vm265_vm1, %v12425_v35  ;;  %v12433_v35 = vld [vmem:[#allocation30_spill] sm:$0xff] }
 0x1a4   : > { %8439 = vmatprep.mubr.msk.f32.mxu0 %vm265_vm1, %v12426_v28  ;;  %v12434_v28 = vld [vmem:[#allocation31_spill] sm:$0xff] }
 0x1a7   : > { %8440 = vmatmul.mubr.msk.f32.gmra.mrb[14].mxu0 %vm265_vm1, %v12427_v29 }
 0x1a8   : > { %8442 = vmatprep.mubr.msk.f32.mxu0 %vm265_vm1, %v12428_v6  ;;  %v12435_v6 = vld [vmem:[#allocation32_spill] sm:$0xff] }
 0x1ab   : > { %8443 = vmatmul.mubr.msk.f32.gmra.mrb[16].mxu0 %vm265_vm1, %v12429_v33 }
 0x1ac   : > { %8445 = vmatprep.mubr.msk.f32.mxu0 %vm265_vm1, %v12430_v62  ;;  %v12436_v62 = vld [vmem:[#allocation33_spill] sm:$0xff] }
 0x1af   : > { %8446 = vmatmul.mubr.msk.f32.gmra.mrb[18].mxu0 %vm265_vm1, %v12431_v30 }
 0x1b0   : > { %8448 = vmatprep.mubr.msk.f32.mxu0 %vm265_vm1, %v12432_v34 }
 0x1b3   : > { %8449 = vmatmul.mubr.msk.f32.gmra.mrb[20].mxu0 %vm265_vm1, %v12433_v35  ;;  %v11098_v35 = vld [vmem:[#allocation2 + $0x209] sm:$0xff] }
 0x1b4   : > { %8451 = vmatprep.mubr.msk.f32.mxu0 %vm265_vm1, %v12434_v28 }
 0x1b7   : > { %8452 = vmatmul.mubr.msk.f32.gmra.mrb[22].mxu0 %vm265_vm1, %v10860_v40 }
 0x1b8   : > { %8454 = vmatprep.mubr.msk.f32.mxu0 %vm265_vm1, %v12435_v6  ;;  %v11104_v6 = vld [vmem:[#allocation2 + $0x211] sm:$0xff] }
 0x1bb   : > { %8455 = vmatmul.mubr.msk.f32.gmra.mrb[24].mxu0 %vm265_vm1, %v10868_v0 }
 0x1bc   : > { %8457 = vmatprep.mubr.msk.f32.mxu0 %vm265_vm1, %v12436_v62 }
 0x1bf   : > { %8458 = vmatmul.mubr.msk.f32.gmra.mrb[26].mxu0 %vm265_vm1, %v10876_v3 }
 0x1c0   : > { %8460 = vmatprep.mubr.msk.f32.mxu0 %vm265_vm1, %v10878_v39  ;;  %v7268_v39 = vld [vmem:[%s12290_s1 + $0x20] sm:$0xf] }
 0x1c3   : > { %8461 = vmatmul.mubr.msk.f32.gmra.mrb[28].mxu0 %vm265_vm1, %v10884_v5 }
 0x1c4   : > { %8463 = vmatprep.mubr.msk.f32.mxu0 %vm265_vm1, %v11098_v35 }
 0x1c7   : > { %8464 = vmatmul.mubr.msk.f32.gmra.mrb[30].mxu0 %vm265_vm1, %v11104_v6 }
 0x1c8   : > { %8468 = vmatprep.mubr.msk.f32.mxu0 %vm265_vm1, %v10637_v7  ;;  %v2711_v7 = vld [vmem:[#allocation2 + $0x227] sm:$0xff] }
 0x1cb   : > { %8469 = vmatmul.mubr.msk.f32.vlgmr.msra.gmra.mrb[0].mxu0 %vm265_vm1, %v10645_v8  ;;  %v2712_v8 = vld [vmem:[#allocation2 + $0x22f] sm:$0xff] }
 0x1cc   : > { %8517 = vmatpush3.msk.msra.mxu0 %vm567_vm0, %v7234_v63  ;;  %8471 = vmatprep.mubr.msk.f32.mxu0 %vm265_vm1, %v10647_v10  ;;  %v3071_v10 = vld [vmem:[#allocation2 + $0x48] sm:$0xff] }
 0x1cd   : > { %8566 = vmatprep.subr.msk.mxu0 %vm567_vm0, %v7268_v39  ;;  %v4060_v63 = vld [vmem:[%s12292_s3 + $0x8] sm:$0xff] }
 0x1cf   : > { %8472 = vmatmul.mubr.msk.f32.gmra.mrb[2].mxu0 %vm265_vm1, %v10653_v9  ;;  %v7303_v9 = vld [vmem:[%s12292_s3 + $0x80] sm:$0xff] }
 0x1d0   : > { %8474 = vmatprep.mubr.msk.f32.mxu0 %vm265_vm1, %v10655_v11  ;;  %v7304_v11 = vld [vmem:[%s12292_s3 + $0x88] sm:$0xff] }
 0x1d3   : > { %8475 = vmatmul.mubr.msk.f32.gmra.mrb[4].mxu0 %vm265_vm1, %v10661_v12  ;;  %v3072_v12 = vld [vmem:[#allocation2 + $0x50] sm:$0xff] }
 0x1d4   : > { %8477 = vmatprep.mubr.msk.f32.mxu0 %vm265_vm1, %v10663_v13  ;;  %v11182_v13 = vpack.c.bf16 %v7304_v11, %v7303_v9 }
 0x1d6   : > { %9624 = vmatprep.subr.bf16.mxu1 %v11182_v13 }
 0x1d7   : > { %8478 = vmatmul.mubr.msk.f32.gmra.mrb[6].mxu0 %vm265_vm1, %v10669_v14  ;;  %v7305_v14 = vld [vmem:[%s12292_s3 + $0x90] sm:$0xff]  ;;  %9632 = vmatpush3.bf16.msra.mxu1 %v11182_v13 }
 0x1d8   : > { %8480 = vmatprep.mubr.msk.f32.mxu0 %vm265_vm1, %v10671_v15  ;;  %v7306_v15 = vld [vmem:[%s12292_s3 + $0x98] sm:$0xff] }
 0x1db   : > { %8481 = vmatmul.mubr.msk.f32.gmra.mrb[8].mxu0 %vm265_vm1, %v10677_v16  ;;  %v3073_v16 = vld [vmem:[#allocation2 + $0x68] sm:$0xff] }
 0x1dc   : > { %8483 = vmatprep.mubr.msk.f32.mxu0 %vm265_vm1, %v10679_v17  ;;  %v11192_v17 = vpack.c.bf16 %v7306_v15, %v7305_v14 }
 0x1de   : > { %9625 = vmatprep.subr.bf16.mxu1 %v11192_v17 }
 0x1df   : > { %8484 = vmatmul.mubr.msk.f32.gmra.mrb[10].mxu0 %vm265_vm1, %v10685_v18  ;;  %v7307_v18 = vld [vmem:[%s12292_s3 + $0xa0] sm:$0xff]  ;;  %9633 = vmatpush3.bf16.msra.mxu1 %v11192_v17 }
 0x1e0   : > { %8486 = vmatprep.mubr.msk.f32.mxu0 %vm265_vm1, %v10687_v19  ;;  %v7308_v19 = vld [vmem:[%s12292_s3 + $0xa8] sm:$0xff] }
 0x1e3   : > { %8487 = vmatmul.mubr.msk.f32.gmra.mrb[12].mxu0 %vm265_vm1, %v10693_v20  ;;  %v3074_v20 = vld [vmem:[#allocation2 + $0x70] sm:$0xff] }
 0x1e4   : > { %8489 = vmatprep.mubr.msk.f32.mxu0 %vm265_vm1, %v10695_v21  ;;  %v9344_v21 = vpack.c.bf16 %v7308_v19, %v7307_v18 }
 0x1e6   : > { %9626 = vmatprep.subr.bf16.mxu1 %v9344_v21 }
 0x1e7   : > { %8490 = vmatmul.mubr.msk.f32.gmra.mrb[14].mxu0 %vm265_vm1, %v10701_v22  ;;  %v7309_v22 = vld [vmem:[%s12292_s3 + $0xb0] sm:$0xff]  ;;  %9634 = vmatpush3.bf16.msra.mxu1 %v9344_v21 }
 0x1e8   : > { %8492 = vmatprep.mubr.msk.f32.mxu0 %vm265_vm1, %v10703_v23  ;;  %v7310_v23 = vld [vmem:[%s12292_s3 + $0xb8] sm:$0xff] }
 0x1eb   : > { %8493 = vmatmul.mubr.msk.f32.gmra.mrb[16].mxu0 %vm265_vm1, %v10709_v24  ;;  %v9348_v24 = vpack.c.bf16 %v7310_v23, %v7309_v22  ;;  %v4061_v22 = vld [vmem:[%s12292_s3 + $0x10] sm:$0xff]  ;;  %v4062_v23 = vld [vmem:[%s12292_s3 + $0x18] sm:$0xff] }
 0x1ec   : > { %8495 = vmatprep.mubr.msk.f32.mxu0 %vm265_vm1, %v10711_v25  ;;  %v7311_v25 = vld [vmem:[%s12292_s3 + $0xc0] sm:$0xff] }
 0x1ed   : > { %9627 = vmatprep.subr.bf16.mxu1 %v9348_v24 }
 0x1ee   : > { %9635 = vmatpush3.bf16.msra.mxu1 %v9348_v24 }
 0x1ef   : > { %8496 = vmatmul.mubr.msk.f32.gmra.mrb[18].mxu0 %vm265_vm1, %v10717_v26  ;;  %v7312_v26 = vld [vmem:[%s12292_s3 + $0xc8] sm:$0xff] }
 0x1f0   : > { %8498 = vmatprep.mubr.msk.f32.mxu0 %vm265_vm1, %v10719_v27  ;;  %v9352_v27 = vpack.c.bf16 %v7312_v26, %v7311_v25 }
 0x1f2   : > { %9628 = vmatprep.subr.bf16.mxu1 %v9352_v27 }
 0x1f3   : > { %8499 = vmatmul.mubr.msk.f32.gmra.mrb[20].mxu0 %vm265_vm1, %v10725_v31  ;;  %9636 = vmatpush3.bf16.msra.mxu1 %v9352_v27 }
 0x1f4   : > { %8501 = vmatprep.mubr.msk.f32.mxu0 %vm265_vm1, %v10727_v32  ;;  %v12453_v32 = vld [vmem:[#allocation21_spill] sm:$0xff] }
 0x1f7   : > { %8502 = vmatmul.mubr.msk.f32.gmra.mrb[22].mxu0 %vm265_vm1, %v10733_v37  ;;  %v12454_v37 = vld [vmem:[#allocation22_spill] sm:$0xff] }
 0x1f8   : > { %8504 = vmatprep.mubr.msk.f32.mxu0 %vm265_vm1, %v10735_v38  ;;  %v12455_v38 = vld [vmem:[#allocation23_spill] sm:$0xff] }
 0x1fb   : > { %8505 = vmatmul.mubr.msk.f32.gmra.mrb[24].mxu0 %vm265_vm1, %v10745_v41  ;;  %v12456_v41 = vld [vmem:[#allocation25_spill] sm:$0xff] }
 0x1fc   : > { %8507 = vmatprep.mubr.msk.f32.mxu0 %vm265_vm1, %v10747_v42  ;;  %v12457_v42 = vld [vmem:[#allocation27_spill] sm:$0xff] }
 0x1ff   : > { %8508 = vmatmul.mubr.msk.f32.gmra.mrb[26].mxu0 %vm265_vm1, %v10753_v2  ;;  %v12458_v2 = vld [vmem:[#allocation30_spill] sm:$0xff] }
 0x200   : > { %8510 = vmatprep.mubr.msk.f32.mxu0 %vm265_vm1, %v10952_v1  ;;  %v12460_v1 = vld [vmem:[#allocation34_spill] sm:$0xff] }
 0x203   : > { %8511 = vmatmul.mubr.msk.f32.gmra.mrb[28].mxu0 %vm265_vm1, %v10958_v4 }
 0x204   : > { %8513 = vmatprep.mubr.msk.f32.mxu0 %vm265_vm1, %v2711_v7 }
 0x207   : > { %8514 = vmatmul.mubr.msk.f32.gmra.mrb[30].mxu0 %vm265_vm1, %v2712_v8 }
 0x208   : > { %8518 = vmatprep.mubr.msk.f32.mxu0 %vm265_vm1, %v3071_v10 }
 0x20b   : > { %8519 = vmatmul.mubr.msk.f32.vlgmr.msra.gmra.mrb[0].mxu0 %vm265_vm1, %v3072_v12 }
 0x20c   : > { %8567 = vmatpush3.msk.msra.mxu0 %vm567_vm0, %v7268_v39  ;;  %8521 = vmatprep.mubr.msk.f32.mxu0 %vm265_vm1, %v3073_v16  ;;  %v12459_v39 = vld [vmem:[#allocation32_spill] sm:$0xff] }
 0x20d   : > { %9337 = vmatprep.subr.bf16.mxu0 %v11182_v13 }
 0x20f   : > { %8522 = vmatmul.mubr.msk.f32.gmra.mrb[2].mxu0 %vm265_vm1, %v3074_v20 }
 0x210   : > { %8524 = vmatprep.mubr.msk.f32.mxu0 %vm265_vm1, %v10512_v36  ;;  %v7313_v36 = vld [vmem:[%s12292_s3 + $0xd0] sm:$0xff] }
 0x213   : > { %8525 = vmatmul.mubr.msk.f32.gmra.mrb[4].mxu0 %vm265_vm1, %v10530_v43  ;;  %v7314_v43 = vld [vmem:[%s12292_s3 + $0xd8] sm:$0xff] }
 0x214   : > { %8527 = vmatprep.mubr.msk.f32.mxu0 %vm265_vm1, %v10532_v44  ;;  %v9356_v31 = vpack.c.bf16 %v7314_v43, %v7313_v36  ;;  %v12437_v44 = vld [vmem:[#allocation5_spill] sm:$0xff]  ;;  %v9372_v43 = vpack.c.bf16 %v4062_v23, %v4061_v22  ;;  %v7320_v23 = vld [vmem:[%s12292_s3 + $0x108] sm:$0xff] }
 0x215   : > { %v7319_v22 = vld [vmem:[%s12292_s3 + $0x100] sm:$0xff] }
 0x216   : > { %9629 = vmatprep.subr.bf16.mxu1 %v9356_v31 }
 0x217   : > { %8528 = vmatmul.mubr.msk.f32.gmra.mrb[6].mxu0 %vm265_vm1, %v10538_v45  ;;  %9637 = vmatpush3.bf16.msra.mxu1 %v9356_v31  ;;  %v12438_v45 = vld [vmem:[#allocation6_spill] sm:$0xff] }
 0x218   : > { %8530 = vmatprep.mubr.msk.f32.mxu0 %vm265_vm1, %v10540_v46  ;;  %v12439_v46 = vld [vmem:[#allocation7_spill] sm:$0xff] }
 0x21b   : > { %8531 = vmatmul.mubr.msk.f32.gmra.mrb[8].mxu0 %vm265_vm1, %v10546_v47  ;;  %v12440_v47 = vld [vmem:[#allocation8_spill] sm:$0xff] }
 0x21c   : > { %8533 = vmatprep.mubr.msk.f32.mxu0 %vm265_vm1, %v10548_v48  ;;  %v12441_v48 = vld [vmem:[#allocation35_spill] sm:$0xff] }
 0x21f   : > { %8534 = vmatmul.mubr.msk.f32.gmra.mrb[10].mxu0 %vm265_vm1, %v10554_v49  ;;  %v3101_v49 = vld [vmem:[#allocation2 + $0x228] sm:$0xff] }
 0x220   : > { %8536 = vmatprep.mubr.msk.f32.mxu0 %vm265_vm1, %v10556_v50  ;;  %v12442_v50 = vld [vmem:[#allocation36_spill] sm:$0xff] }
 0x223   : > { %8537 = vmatmul.mubr.msk.f32.gmra.mrb[12].mxu0 %vm265_vm1, %v10562_v51  ;;  %v3102_v51 = vld [vmem:[#allocation2 + $0x230] sm:$0xff] }
 0x224   : > { %8539 = vmatprep.mubr.msk.f32.mxu0 %vm265_vm1, %v10564_v52  ;;  %v12443_v52 = vld [vmem:[#allocation11_spill] sm:$0xff] }
 0x227   : > { %8540 = vmatmul.mubr.msk.f32.gmra.mrb[14].mxu0 %vm265_vm1, %v10570_v53  ;;  %v12444_v53 = vld [vmem:[#allocation12_spill] sm:$0xff] }
 0x228   : > { %8542 = vmatprep.mubr.msk.f32.mxu0 %vm265_vm1, %v10572_v54  ;;  %v12445_v54 = vld [vmem:[#allocation13_spill] sm:$0xff] }
 0x22b   : > { %8543 = vmatmul.mubr.msk.f32.gmra.mrb[16].mxu0 %vm265_vm1, %v10578_v55  ;;  %v12446_v55 = vld [vmem:[#allocation14_spill] sm:$0xff] }
 0x22c   : > { %8545 = vmatprep.mubr.msk.f32.mxu0 %vm265_vm1, %v10580_v56  ;;  %v12447_v56 = vld [vmem:[#allocation15_spill] sm:$0xff] }
 0x22f   : > { %8546 = vmatmul.mubr.msk.f32.gmra.mrb[18].mxu0 %vm265_vm1, %v10586_v57  ;;  %v12448_v57 = vld [vmem:[#allocation16_spill] sm:$0xff] }
 0x230   : > { %8548 = vmatprep.mubr.msk.f32.mxu0 %vm265_vm1, %v10588_v58  ;;  %v12449_v58 = vld [vmem:[#allocation17_spill] sm:$0xff] }
 0x233   : > { %8549 = vmatmul.mubr.msk.f32.gmra.mrb[20].mxu0 %vm265_vm1, %v10594_v59  ;;  %v12450_v59 = vld [vmem:[#allocation18_spill] sm:$0xff] }
 0x234   : > { %8551 = vmatprep.mubr.msk.f32.mxu0 %vm265_vm1, %v10596_v60  ;;  %v12451_v60 = vld [vmem:[#allocation19_spill] sm:$0xff] }
 0x237   : > { %8552 = vmatmul.mubr.msk.f32.gmra.mrb[22].mxu0 %vm265_vm1, %v10602_v61  ;;  %v12452_v61 = vld [vmem:[#allocation20_spill] sm:$0xff] }
 0x238   : > { %8554 = vmatprep.mubr.msk.f32.mxu0 %vm265_vm1, %v12437_v44  ;;  %v4063_v44 = vld [vmem:[%s12292_s3 + $0x20] sm:$0xff] }
 0x23b   : > { %8555 = vmatmul.mubr.msk.f32.gmra.mrb[24].mxu0 %vm265_vm1, %v12438_v45  ;;  %v4064_v45 = vld [vmem:[%s12292_s3 + $0x28] sm:$0xff] }
 0x23c   : > { %8557 = vmatprep.mubr.msk.f32.mxu0 %vm265_vm1, %v12439_v46 }
 0x23f   : > { %8558 = vmatmul.mubr.msk.f32.gmra.mrb[26].mxu0 %vm265_vm1, %v12440_v47 }
 0x240   : > { %8560 = vmatprep.mubr.msk.f32.mxu0 %vm265_vm1, %v12441_v48 }
 0x243   : > { %8561 = vmatmul.mubr.msk.f32.gmra.mrb[28].mxu0 %vm265_vm1, %v12442_v50 }
 0x244   : > { %8563 = vmatprep.mubr.msk.f32.mxu0 %vm265_vm1, %v3101_v49 }
 0x247   : > { %8564 = vmatmul.mubr.msk.f32.gmra.mrb[30].mxu0 %vm265_vm1, %v3102_v51  ;;  %v9376_v51 = vpack.c.bf16 %v4064_v45, %v4063_v44 }
 0x248   : > { %8568 = vmatprep.mubr.msk.f32.mxu0 %vm265_vm1, %v12443_v52 }
 0x24b   : > { %8569 = vmatmul.mubr.msk.f32.vlgmr.msra.gmra.mrb[0].mxu0 %vm265_vm1, %v12444_v53  ;;  %v4065_v53 = vld [vmem:[%s12292_s3 + $0x30] sm:$0xff] }
 0x24c   : > { %8571 = vmatprep.mubr.msk.f32.mxu0 %vm265_vm1, %v12445_v54  ;;  %9339 = vmatpush3.bf16.msra.mxu0 %v11182_v13  ;;  %v4066_v54 = vld [vmem:[%s12292_s3 + $0x38] sm:$0xff] }
 0x24d   : > { %9341 = vmatprep.subr.bf16.mxu0 %v11192_v17 }
 0x24f   : > { %8572 = vmatmul.mubr.msk.f32.gmra.mrb[2].mxu0 %vm265_vm1, %v12446_v55 }
 0x250   : > { %8574 = vmatprep.mubr.msk.f32.mxu0 %vm265_vm1, %v12447_v56  ;;  %9343 = vmatpush3.bf16.msra.mxu0 %v11192_v17 }
 0x251   : > { %9345 = vmatprep.subr.bf16.mxu0 %v9344_v21 }
 0x253   : > { %8575 = vmatmul.mubr.msk.f32.gmra.mrb[4].mxu0 %vm265_vm1, %v12448_v57 }
 0x254   : > { %8577 = vmatprep.mubr.msk.f32.mxu0 %vm265_vm1, %v12449_v58  ;;  %9347 = vmatpush3.bf16.msra.mxu0 %v9344_v21 }
 0x255   : > { %9349 = vmatprep.subr.bf16.mxu0 %v9348_v24 }
 0x257   : > { %8578 = vmatmul.mubr.msk.f32.gmra.mrb[6].mxu0 %vm265_vm1, %v12450_v59 }
 0x258   : > { %8580 = vmatprep.mubr.msk.f32.mxu0 %vm265_vm1, %v12451_v60  ;;  %9351 = vmatpush3.bf16.msra.mxu0 %v9348_v24  ;;  %v9380_v60 = vpack.c.bf16 %v4066_v54, %v4065_v53 }
 0x259   : > { %9353 = vmatprep.subr.bf16.mxu0 %v9352_v27 }
 0x25b   : > { %8581 = vmatmul.mubr.msk.f32.gmra.mrb[8].mxu0 %vm265_vm1, %v12452_v61 }
 0x25c   : > { %8583 = vmatprep.mubr.msk.f32.mxu0 %vm265_vm1, %v12453_v32  ;;  %9355 = vmatpush3.bf16.msra.mxu0 %v9352_v27  ;;  %v4067_v32 = vld [vmem:[%s12292_s3 + $0x40] sm:$0xff] }
 0x25d   : > { %9357 = vmatprep.subr.bf16.mxu0 %v9356_v31 }
 0x25f   : > { %8584 = vmatmul.mubr.msk.f32.gmra.mrb[10].mxu0 %vm265_vm1, %v12454_v37  ;;  %v4068_v37 = vld [vmem:[%s12292_s3 + $0x48] sm:$0xff] }
 0x260   : > { %8586 = vmatprep.mubr.msk.f32.mxu0 %vm265_vm1, %v12455_v38  ;;  %9359 = vmatpush3.bf16.msra.mxu0 %v9356_v31 }
 0x263   : > { %8587 = vmatmul.mubr.msk.f32.gmra.mrb[12].mxu0 %vm265_vm1, %v12427_v29  ;;  %v11365_v29 = vld [vmem:[%s12291_s2] ss:$0 sm:$0xff] }
 0x264   : > { %8589 = vmatprep.mubr.msk.f32.mxu0 %vm265_vm1, %v12456_v41 }
 0x267   : > { %8590 = vmatmul.mubr.msk.f32.gmra.mrb[14].mxu0 %vm265_vm1, %v12429_v33 }
 0x268   : > { %8592 = vmatprep.mubr.msk.f32.mxu0 %vm265_vm1, %v12457_v42 }
 0x26b   : > { %8593 = vmatmul.mubr.msk.f32.gmra.mrb[16].mxu0 %vm265_vm1, %v12431_v30  ;;  %v7318_v30 = vld [vmem:[%s12292_s3 + $0xf8] sm:$0xff] }
 0x26c   : > { %8595 = vmatprep.mubr.msk.f32.mxu0 %vm265_vm1, %v12432_v34  ;;  %v4059_v34 = vld [vmem:[%s12292_s3] sm:$0xff] }
 0x26f   : > { %8596 = vmatmul.mubr.msk.f32.gmra.mrb[18].mxu0 %vm265_vm1, %v12458_v2 }
 0x270   : > { %8598 = vmatprep.mubr.msk.f32.mxu0 %vm265_vm1, %v12434_v28  ;;  %v7317_v28 = vld [vmem:[%s12292_s3 + $0xf0] sm:$0xff] }
 0x271   : > { %v9364_v33 = vpack.c.bf16 %v7318_v30, %v7317_v28 }
 0x273   : > { %8599 = vmatmul.mubr.msk.f32.gmra.mrb[20].mxu0 %vm265_vm1, %v10860_v40  ;;  %v3491_v40 = vld [vmem:[#allocation2 + $0x229] sm:$0xff] }
 0x274   : > { %8601 = vmatprep.mubr.msk.f32.mxu0 %vm265_vm1, %v12459_v39 }
 0x277   : > { %8602 = vmatmul.mubr.msk.f32.gmra.mrb[22].mxu0 %vm265_vm1, %v10868_v0  ;;  %v3492_v0 = vld [vmem:[#allocation2 + $0x231] sm:$0xff] }
 0x278   : > { %8604 = vmatprep.mubr.msk.f32.mxu0 %vm265_vm1, %v12436_v62  ;;  %v10161_v62 = vld [vmem:[#allocation3] sm:$0xff] }
 0x27b   : > { %8605 = vmatmul.mubr.msk.f32.gmra.mrb[24].mxu0 %vm265_vm1, %v10876_v3  ;;  %v7315_v3 = vld [vmem:[%s12292_s3 + $0xe0] sm:$0xff] }
 0x27c   : > { %8607 = vmatprep.mubr.msk.f32.mxu0 %vm265_vm1, %v12460_v1  ;;  %v9384_v1 = vpack.c.bf16 %v4068_v37, %v4067_v32 }
 0x27f   : > { %8608 = vmatmul.mubr.msk.f32.gmra.mrb[26].mxu0 %vm265_vm1, %v10884_v5  ;;  %v7316_v5 = vld [vmem:[%s12292_s3 + $0xe8] sm:$0xff] }
 0x280   : > { %8610 = vmatprep.mubr.msk.f32.mxu0 %vm265_vm1, %v11098_v35  ;;  %v9360_v4 = vpack.c.bf16 %v7316_v5, %v7315_v3  ;;  %v9368_v35 = vpack.c.bf16 %v4060_v63, %v4059_v34  ;;  %v4071_v63 = vld [vmem:[%s12292_s3 + $0x60] sm:$0xff] }
 0x282   : > { %9361 = vmatprep.subr.bf16.mxu0 %v9360_v4  ;;  %9630 = vmatprep.subr.bf16.mxu1 %v9360_v4 }
 0x283   : > { %8611 = vmatmul.mubr.msk.f32.gmra.mrb[28].mxu0 %vm265_vm1, %v11104_v6  ;;  %9638 = vmatpush3.bf16.msra.mxu1 %v9360_v4 }
 0x284   : > { %8613 = vmatprep.mubr.msk.f32.mxu0 %vm265_vm1, %v3491_v40  ;;  %9363 = vmatpush3.bf16.msra.mxu0 %v9360_v4 }
 0x285   : > { %9365 = vmatprep.subr.bf16.mxu0 %v9364_v33  ;;  %9631 = vmatprep.subr.bf16.mxu1 %v9364_v33 }
 0x287   : > { %8614 = vmatmul.mubr.msk.f32.gmra.mrb[30].mxu0 %vm265_vm1, %v3492_v0  ;;  %9639 = vmatpush3.bf16.msra.mxu1 %v9364_v33  ;;  %v4069_v0 = vld [vmem:[%s12292_s3 + $0x50] sm:$0xff] }
 0x288   : > { %8648 = vmatprep.mubr.f32.mxu0 %v10161_v62  ;;  %9367 = vmatpush3.bf16.msra.mxu0 %v9364_v33 }
 0x289   : > { %9369 = vmatprep.subr.bf16.mxu1 %v9368_v35 }
 0x28b   : > { %8649 = vmatmul.mubr.f32.vlgmr.msra.gmra.mrb[32].mxu0 %v10161_v62  ;;  %v4070_v62 = vld [vmem:[%s12292_s3 + $0x58] sm:$0xff] }
 0x28c   : > { %v9388_v33 = vpack.c.bf16 %v4070_v62, %v4069_v0 }
 0x31e   : > { %v8570_v6 = vpop.f32.mrb[0].mxu0 }
 0x31f   : > { %v3858_v7 = vadd.f32 %v8570_v6, %v11365_v29  ;;  %v3660_v8 = vpop.f32.mrb[1].mxu0 }
 0x320   : > { %v3857_v10 = vadd.f32 %v11365_v29, %v3660_v8 }
 0x321   : > { %v3890_v9 = vmax.f32 %v3858_v7, 0.0 }
 0x322   : > { %v3889_v11 = vmax.f32 %v3857_v10, 0.0  ;;  %v8573_v12 = vpop.f32.mrb[2].mxu0 }
 0x323   : > { %3995 = vst [vmem:[#allocation3 + $0x30] sm:$0xff] %v3890_v9  ;;  %v3860_v13 = vadd.f32 %v8573_v12, %v11365_v29  ;;  %v3670_v14 = vpop.f32.mrb[3].mxu0 }
 0x324   : > { %3994 = vst [vmem:[#allocation3 + $0x28] sm:$0xff] %v3889_v11  ;;  %v3859_v15 = vadd.f32 %v11365_v29, %v3670_v14  ;;  %8651 = vmatprep.mubr.f32.mxu0 %v3889_v11  ;;  %v4074_v14 = vld [vmem:[%s12292_s3 + $0x78] sm:$0xff] }
 0x325   : > { %v3892_v16 = vmax.f32 %v3860_v13, 0.0  ;;  %8652 = vmatmul.mubr.f32.gmra.mrb[34].mxu0 %v3890_v9  ;;  %v4073_v13 = vld [vmem:[%s12292_s3 + $0x70] sm:$0xff] }
 0x326   : > { %v3891_v17 = vmax.f32 %v3859_v15, 0.0  ;;  %v8576_v18 = vpop.f32.mrb[4].mxu0 }
 0x327   : > { %3997 = vst [vmem:[#allocation3 + $0x50] sm:$0xff] %v3892_v16  ;;  %v3862_v19 = vadd.f32 %v8576_v18, %v11365_v29  ;;  %v3680_v20 = vpop.f32.mrb[5].mxu0 }
 0x328   : > { %3996 = vst [vmem:[#allocation3 + $0x48] sm:$0xff] %v3891_v17  ;;  %v3861_v21 = vadd.f32 %v11365_v29, %v3680_v20  ;;  %8654 = vmatprep.mubr.f32.mxu0 %v3891_v17  ;;  %v9396_v20 = vpack.c.bf16 %v4074_v14, %v4073_v13 }
 0x329   : > { %v3894_v24 = vmax.f32 %v3862_v19, 0.0  ;;  %8655 = vmatmul.mubr.f32.gmra.mrb[36].mxu0 %v3892_v16 }
 0x32a   : > { %v3893_v25 = vmax.f32 %v3861_v21, 0.0  ;;  %v8579_v26 = vpop.f32.mrb[6].mxu0 }
 0x32b   : > { %3999 = vst [vmem:[#allocation3 + $0x70] sm:$0xff] %v3894_v24  ;;  %v3864_v27 = vadd.f32 %v8579_v26, %v11365_v29  ;;  %v3690_v36 = vpop.f32.mrb[7].mxu0 }
 0x32c   : > { %3998 = vst [vmem:[#allocation3 + $0x68] sm:$0xff] %v3893_v25  ;;  %v3863_v31 = vadd.f32 %v11365_v29, %v3690_v36  ;;  %8657 = vmatprep.mubr.f32.mxu1 %v3893_v25 }
 0x32d   : > { %v3896_v46 = vmax.f32 %v3864_v27, 0.0  ;;  %8658 = vmatmul.mubr.f32.vlgmr.msra.gmra.mrb[0].mxu1 %v3894_v24 }
 0x32e   : > { %v3895_v47 = vmax.f32 %v3863_v31, 0.0  ;;  %v8582_v48 = vpop.f32.mrb[8].mxu0  ;;  %9371 = vmatpush3.bf16.msra.mxu1 %v9368_v35  ;;  %v4072_v35 = vld [vmem:[%s12292_s3 + $0x68] sm:$0xff] }
 0x32f   : > { %4001 = vst [vmem:[#allocation3 + $0x90] sm:$0xff] %v3896_v46  ;;  %v3866_v49 = vadd.f32 %v8582_v48, %v11365_v29  ;;  %v3700_v50 = vpop.f32.mrb[9].mxu0  ;;  %9373 = vmatprep.subr.bf16.mxu1 %v9372_v43  ;;  %v9392_v11 = vpack.c.bf16 %v4072_v35, %v4071_v63  ;;  %v7323_v63 = vld [vmem:[%s12292_s3 + $0x120] sm:$0xff]  ;;  %v7324_v35 = vld [vmem:[%s12292_s3 + $0x128] sm:$0xff] }
 0x330   : > { %4000 = vst [vmem:[#allocation3 + $0x88] sm:$0xff] %v3895_v47  ;;  %v3865_v52 = vadd.f32 %v11365_v29, %v3700_v50  ;;  %8660 = vmatprep.mubr.f32.mxu1 %v3895_v47  ;;  %v11548_v14 = vld [vmem:[#allocation3 + $0x4f] sm:$0xff] }
 0x331   : > { %v3898_v55 = vmax.f32 %v3866_v49, 0.0  ;;  %8661 = vmatmul.mubr.f32.gmra.mrb[2].mxu1 %v3896_v46 }
 0x332   : > { %v3897_v56 = vmax.f32 %v3865_v52, 0.0  ;;  %v8585_v57 = vpop.f32.mrb[10].mxu0  ;;  %9375 = vmatpush3.bf16.msra.mxu1 %v9372_v43  ;;  %v11453_v43 = vpack.c.bf16 %v7320_v23, %v7319_v22  ;;  %v7329_v22 = vld [vmem:[%s12292_s3 + $0x150] sm:$0xff]  ;;  %v7330_v23 = vld [vmem:[%s12292_s3 + $0x158] sm:$0xff] }
 0x333   : > { %4003 = vst [vmem:[#allocation3 + $0xb0] sm:$0xff] %v3898_v55  ;;  %v3868_v58 = vadd.f32 %v8585_v57, %v11365_v29  ;;  %v3710_v59 = vpop.f32.mrb[11].mxu0  ;;  %9377 = vmatprep.subr.bf16.mxu1 %v9376_v51 }
 0x334   : > { %4002 = vst [vmem:[#allocation3 + $0xa8] sm:$0xff] %v3897_v56  ;;  %v3867_v61 = vadd.f32 %v11365_v29, %v3710_v59  ;;  %8663 = vmatprep.mubr.f32.mxu1 %v3897_v56 }
 0x335   : > { %v3900_v38 = vmax.f32 %v3868_v58, 0.0  ;;  %8664 = vmatmul.mubr.f32.gmra.mrb[4].mxu1 %v3898_v55 }
 0x336   : > { %v3899_v41 = vmax.f32 %v3867_v61, 0.0  ;;  %v8588_v42 = vpop.f32.mrb[12].mxu0  ;;  %9379 = vmatpush3.bf16.msra.mxu1 %v9376_v51 }
 0x337   : > { %4005 = vst [vmem:[#allocation3 + $0xd0] sm:$0xff] %v3900_v38  ;;  %v3870_v2 = vadd.f32 %v8588_v42, %v11365_v29  ;;  %v3720_v39 = vpop.f32.mrb[13].mxu0  ;;  %9381 = vmatprep.subr.bf16.mxu1 %v9380_v60 }
 0x338   : > { %4004 = vst [vmem:[#allocation3 + $0xc8] sm:$0xff] %v3899_v41  ;;  %v3869_v40 = vadd.f32 %v11365_v29, %v3720_v39  ;;  %8666 = vmatprep.mubr.f32.mxu1 %v3899_v41 }
 0x339   : > { %v3902_v3 = vmax.f32 %v3870_v2, 0.0  ;;  %8667 = vmatmul.mubr.f32.gmra.mrb[6].mxu1 %v3900_v38 }
 0x33a   : > { %v3901_v5 = vmax.f32 %v3869_v40, 0.0  ;;  %v8591_v4 = vpop.f32.mrb[14].mxu0  ;;  %9383 = vmatpush3.bf16.msra.mxu1 %v9380_v60 }
 0x33b   : > { %4007 = vst [vmem:[#allocation3 + $0xf0] sm:$0xff] %v3902_v3  ;;  %v3872_v28 = vadd.f32 %v8591_v4, %v11365_v29  ;;  %v3730_v30 = vpop.f32.mrb[15].mxu0  ;;  %9385 = vmatprep.subr.bf16.mxu1 %v9384_v1  ;;  %v7321_v4 = vld [vmem:[%s12292_s3 + $0x110] sm:$0xff] }
 0x33c   : > { %4006 = vst [vmem:[#allocation3 + $0xe8] sm:$0xff] %v3901_v5  ;;  %v3871_v34 = vadd.f32 %v11365_v29, %v3730_v30  ;;  %8669 = vmatprep.mubr.f32.mxu1 %v3901_v5 }
 0x33d   : > { %v3904_v6 = vmax.f32 %v3872_v28, 0.0  ;;  %8670 = vmatmul.mubr.f32.gmra.mrb[8].mxu1 %v3902_v3  ;;  %v4027_v3 = vld [vmem:[#allocation3 + $0x7] sm:$0xff]  ;;  %v7322_v28 = vld [vmem:[%s12292_s3 + $0x118] sm:$0xff] }
 0x33e   : > { %v11419_v7 = vmax.f32 %v3871_v34, 0.0  ;;  %v8594_v8 = vpop.f32.mrb[16].mxu0  ;;  %9387 = vmatpush3.bf16.msra.mxu1 %v9384_v1  ;;  %v4028_v34 = vld [vmem:[#allocation3 + $0xf] sm:$0xff] }
 0x33f   : > { %4009 = vst [vmem:[#allocation3 + $0x110] sm:$0xff] %v3904_v6  ;;  %v3874_v10 = vadd.f32 %v8594_v8, %v11365_v29  ;;  %v3740_v9 = vpop.f32.mrb[17].mxu0  ;;  %9389 = vmatprep.subr.bf16.mxu1 %v9388_v33  ;;  %v9408_v8 = vpack.c.bf16 %v7324_v35, %v7323_v63 }
 0x340   : > { %4008 = vst [vmem:[#allocation3 + $0x108] sm:$0xff] %v11419_v7  ;;  %v3873_v12 = vadd.f32 %v11365_v29, %v3740_v9  ;;  %8672 = vmatprep.mubr.f32.mxu1 %v11419_v7  ;;  %v7325_v9 = vld [vmem:[%s12292_s3 + $0x130] sm:$0xff] }
 0x341   : > { %v11431_v15 = vmax.f32 %v3874_v10, 0.0  ;;  %8673 = vmatmul.mubr.f32.gmra.mrb[10].mxu1 %v3904_v6  ;;  %v11532_v6 = vld [vmem:[#allocation3 + $0x27] sm:$0xff]  ;;  %v11536_v10 = vld [vmem:[#allocation3 + $0x2f] sm:$0xff] }
 0x342   : > { %v11433_v16 = vmax.f32 %v3873_v12, 0.0  ;;  %v8597_v17 = vpop.f32.mrb[18].mxu0  ;;  %9391 = vmatpush3.bf16.msra.mxu1 %v9388_v33  ;;  %v11545_v12 = vld [vmem:[#allocation3 + $0x47] sm:$0xff] }
 0x343   : > { %4011 = vst [vmem:[#allocation3 + $0x130] sm:$0xff] %v11431_v15  ;;  %v3876_v18 = vadd.f32 %v8597_v17, %v11365_v29  ;;  %v3750_v19 = vpop.f32.mrb[19].mxu0  ;;  %9393 = vmatprep.subr.bf16.mxu1 %v9392_v11  ;;  %v7327_v17 = vld [vmem:[%s12292_s3 + $0x140] sm:$0xff] }
 0x344   : > { %4010 = vst [vmem:[#allocation3 + $0x128] sm:$0xff] %v11433_v16  ;;  %v3875_v21 = vadd.f32 %v11365_v29, %v3750_v19  ;;  %8675 = vmatprep.mubr.f32.mxu1 %v11433_v16  ;;  %v11557_v19 = vld [vmem:[#allocation3 + $0x67] sm:$0xff] }
 0x345   : > { %v11446_v24 = vmax.f32 %v3876_v18, 0.0  ;;  %8676 = vmatmul.mubr.f32.gmra.mrb[12].mxu1 %v11431_v15  ;;  %v7328_v18 = vld [vmem:[%s12292_s3 + $0x148] sm:$0xff] }
 0x346   : > { %v11449_v25 = vmax.f32 %v3875_v21, 0.0  ;;  %v8600_v26 = vpop.f32.mrb[20].mxu0  ;;  %9395 = vmatpush3.bf16.msra.mxu1 %v9392_v11  ;;  %v7326_v11 = vld [vmem:[%s12292_s3 + $0x138] sm:$0xff]  ;;  %v11560_v21 = vld [vmem:[#allocation3 + $0x6f] sm:$0xff] }
 0x347   : > { %4013 = vst [vmem:[#allocation3 + $0x150] sm:$0xff] %v11446_v24  ;;  %v3878_v27 = vadd.f32 %v8600_v26, %v11365_v29  ;;  %v3760_v36 = vpop.f32.mrb[21].mxu0  ;;  %9397 = vmatprep.subr.bf16.mxu1 %v9396_v20  ;;  %v9412_v13 = vpack.c.bf16 %v7326_v11, %v7325_v9  ;;  %v11569_v26 = vld [vmem:[#allocation3 + $0x87] sm:$0xff] }
 0x348   : > { %4012 = vst [vmem:[#allocation3 + $0x148] sm:$0xff] %v11449_v25  ;;  %v3877_v31 = vadd.f32 %v11365_v29, %v3760_v36  ;;  %8678 = vmatprep.mubr.f32.mxu1 %v11449_v25  ;;  %v11572_v36 = vld [vmem:[#allocation3 + $0x8f] sm:$0xff] }
 0x349   : > { %v11458_v44 = vmax.f32 %v3878_v27, 0.0  ;;  %8679 = vmatmul.mubr.f32.gmra.mrb[14].mxu1 %v11446_v24  ;;  %v9420_v27 = vpack.c.bf16 %v7330_v23, %v7329_v22  ;;  %v7337_v22 = vld [vmem:[%s12292_s3 + $0x190] sm:$0xff]  ;;  %v7338_v23 = vld [vmem:[%s12292_s3 + $0x198] sm:$0xff] }
 0x34a   : > { %v11461_v45 = vmax.f32 %v3877_v31, 0.0  ;;  %v8603_v46 = vpop.f32.mrb[22].mxu0  ;;  %9399 = vmatpush3.bf16.msra.mxu1 %v9396_v20  ;;  %v9416_v20 = vpack.c.bf16 %v7328_v18, %v7327_v17  ;;  %v7332_v31 = vld [vmem:[%s12292_s3 + $0x168] sm:$0xff] }
 0x34b   : > { %4015 = vst [vmem:[#allocation3 + $0x170] sm:$0xff] %v11458_v44  ;;  %v3880_v47 = vadd.f32 %v8603_v46, %v11365_v29  ;;  %v3770_v48 = vpop.f32.mrb[23].mxu0  ;;  %9401 = vmatprep.subr.bf16.mxu1 %v11453_v43  ;;  %v11581_v46 = vld [vmem:[#allocation3 + $0xa7] sm:$0xff] }
 0x34c   : > { %4014 = vst [vmem:[#allocation3 + $0x168] sm:$0xff] %v11461_v45  ;;  %v3879_v49 = vadd.f32 %v11365_v29, %v3770_v48  ;;  %8681 = vmatprep.mubr.f32.mxu1 %v11461_v45  ;;  %v11584_v48 = vld [vmem:[#allocation3 + $0xaf] sm:$0xff] }
 0x34d   : > { %v11469_v50 = vmax.f32 %v3880_v47, 0.0  ;;  %8682 = vmatmul.mubr.f32.gmra.mrb[16].mxu1 %v11458_v44  ;;  %v4574_v18 = vld [vmem:[#allocation3 + $0x9] sm:$0xff] }
 0x34e   : > { %v11472_v51 = vmax.f32 %v3879_v49, 0.0  ;;  %v8606_v52 = vpop.f32.mrb[24].mxu0  ;;  %v7333_v49 = vld [vmem:[%s12292_s3 + $0x170] sm:$0xff] }
 0x34f   : > { %4017 = vst [vmem:[#allocation3 + $0x190] sm:$0xff] %v11469_v50  ;;  %v3882_v53 = vadd.f32 %v8606_v52, %v11365_v29  ;;  %v3780_v54 = vpop.f32.mrb[25].mxu0  ;;  %v7334_v52 = vld [vmem:[%s12292_s3 + $0x178] sm:$0xff] }
 0x350   : > { %4016 = vst [vmem:[#allocation3 + $0x188] sm:$0xff] %v11472_v51  ;;  %v3881_v55 = vadd.f32 %v11365_v29, %v3780_v54  ;;  %8684 = vmatprep.mubr.f32.mxu1 %v11472_v51 }
 0x351   : > { %v11479_v56 = vmax.f32 %v3882_v53, 0.0  ;;  %8685 = vmatmul.mubr.f32.gmra.mrb[18].mxu1 %v11469_v50  ;;  %v11593_v53 = vld [vmem:[#allocation3 + $0xc7] sm:$0xff] }
 0x352   : > { %v11482_v57 = vmax.f32 %v3881_v55, 0.0  ;;  %v8609_v58 = vpop.f32.mrb[26].mxu0 }
 0x353   : > { %4019 = vst [vmem:[#allocation3 + $0x1b0] sm:$0xff] %v11479_v56  ;;  %v3884_v59 = vadd.f32 %v8609_v58, %v11365_v29  ;;  %v3790_v60 = vpop.f32.mrb[27].mxu0  ;;  %v9428_v58 = vpack.c.bf16 %v7334_v52, %v7333_v49  ;;  %v11675_v49 = vld [vmem:[#allocation3 + $0x29] sm:$0xff] }
 0x354   : > { %4018 = vst [vmem:[#allocation3 + $0x1a8] sm:$0xff] %v11482_v57  ;;  %v3883_v61 = vadd.f32 %v11365_v29, %v3790_v60  ;;  %8687 = vmatprep.mubr.f32.mxu1 %v11482_v57  ;;  %v7335_v60 = vld [vmem:[%s12292_s3 + $0x180] sm:$0xff] }
 0x355   : > { %v11489_v32 = vmax.f32 %v3884_v59, 0.0  ;;  %8688 = vmatmul.mubr.f32.gmra.mrb[20].mxu1 %v11479_v56  ;;  %v11600_v59 = vld [vmem:[#allocation3 + $0xcf] sm:$0xff] }
 0x356   : > { %v11492_v37 = vmax.f32 %v3883_v61, 0.0  ;;  %v8612_v38 = vpop.f32.mrb[28].mxu0  ;;  %v7336_v61 = vld [vmem:[%s12292_s3 + $0x188] sm:$0xff] }
 0x357   : > { %4021 = vst [vmem:[#allocation3 + $0x1d0] sm:$0xff] %v11489_v32  ;;  %v3886_v41 = vadd.f32 %v8612_v38, %v11365_v29  ;;  %v3800_v42 = vpop.f32.mrb[29].mxu0  ;;  %v11609_v38 = vld [vmem:[#allocation3 + $0xe7] sm:$0xff]  ;;  %v11642_v35 = vld [vmem:[#allocation3 + $0x18f] sm:$0xff] }
 0x358   : > { %4020 = vst [vmem:[#allocation3 + $0x1c8] sm:$0xff] %v11492_v37  ;;  %v3885_v2 = vadd.f32 %v11365_v29, %v3800_v42  ;;  %8690 = vmatprep.mubr.f32.mxu1 %v11492_v37  ;;  %v11612_v42 = vld [vmem:[#allocation3 + $0xef] sm:$0xff]  ;;  %v11639_v63 = vld [vmem:[#allocation3 + $0x187] sm:$0xff] }
 0x359   : > { %v11499_v39 = vmax.f32 %v3886_v41, 0.0  ;;  %8691 = vmatmul.mubr.f32.gmra.mrb[22].mxu1 %v11489_v32  ;;  %v9432_v41 = vpack.c.bf16 %v7336_v61, %v7335_v60  ;;  %v7341_v60 = vld [vmem:[%s12292_s3 + $0x1b0] sm:$0xff]  ;;  %v7342_v61 = vld [vmem:[%s12292_s3 + $0x1b8] sm:$0xff] }
 0x35a   : > { %v11502_v1 = vmax.f32 %v3885_v2, 0.0  ;;  %v8615_v40 = vpop.f32.mrb[30].mxu0  ;;  %v11615_v2 = vld [vmem:[#allocation3 + $0x107] sm:$0xff] }
 0x35b   : > { %4023 = vst [vmem:[#allocation3 + $0x1f0] sm:$0xff] %v11499_v39  ;;  %v11506_v0 = vadd.f32 %v8615_v40, %v11365_v29  ;;  %v3810_v62 = vpop.f32.mrb[31].mxu0  ;;  %v11618_v40 = vld [vmem:[#allocation3 + $0x10f] sm:$0xff] }
 0x35c   : > { %4022 = vst [vmem:[#allocation3 + $0x1e8] sm:$0xff] %v11502_v1  ;;  %v11510_v5 = vadd.f32 %v11365_v29, %v3810_v62  ;;  %8693 = vmatprep.mubr.f32.mxu1 %v11502_v1  ;;  %v9404_v29 = vpack.c.bf16 %v7322_v28, %v7321_v4  ;;  %v11621_v62 = vld [vmem:[#allocation3 + $0x127] sm:$0xff]  ;;  %v11630_v28 = vld [vmem:[#allocation3 + $0x14f] sm:$0xff] }
 0x35d   : > { %v12354_v30 = vmax.f32 %v11506_v0, 0.0  ;;  %8694 = vmatmul.mubr.f32.gmra.mrb[24].mxu1 %v11499_v39  ;;  %v11627_v4 = vld [vmem:[#allocation3 + $0x147] sm:$0xff]  ;;  %v11648_v9 = vld [vmem:[#allocation3 + $0x1af] sm:$0xff] }
 0x35e   : > { %v12355_v33 = vmax.f32 %v11510_v5, 0.0  ;;  %8728 = vmatprep.mubr.f32.mxu1 %v4027_v3  ;;  %v11595_v54 = vpop.f32.mrb[32].mxu0  ;;  %v11624_v3 = vld [vmem:[#allocation3 + $0x12f] sm:$0xff] }
 0x35f   : > { %4025 = vst [vmem:[#allocation3 + $0x210] sm:$0xff] %v12354_v30  ;;  %12461 = vst [vmem:[#allocation9_spill] sm:$0xff] %v11595_v54  ;;  %v11598_v55 = vpop.f32.mrb[33].mxu0  ;;  %v11651_v11 = vld [vmem:[#allocation3 + $0x1c7] sm:$0xff]  ;;  %v7350_v54 = vld [vmem:[%s12292_s3 + $0x1f8] sm:$0xff] }
 0x360   : > { %4024 = vst [vmem:[#allocation3 + $0x208] sm:$0xff] %v12355_v33  ;;  %12462 = vst [vmem:[#allocation10_spill] sm:$0xff] %v11598_v55  ;;  %v11711_v30 = vld [vmem:[#allocation3 + $0x89] sm:$0xff] }
 0x361   : > { %8729 = vmatmul.mubr.f32.vlgmr.msra.gmra.mrb[26].mxu1 %v4028_v34  ;;  %v11633_v34 = vld [vmem:[#allocation3 + $0x167] sm:$0xff] }
 0x362   : > { %9403 = vmatpush3.bf16.msra.mxu1 %v11453_v43  ;;  %8731 = vmatprep.mubr.f32.mxu1 %v11532_v6  ;;  %v7331_v43 = vld [vmem:[%s12292_s3 + $0x160] sm:$0xff]  ;;  %v7348_v33 = vld [vmem:[%s12292_s3 + $0x1e8] sm:$0xff] }
 0x363   : > { %9405 = vmatprep.subr.bf16.mxu1 %v9404_v29  ;;  %v9424_v47 = vpack.c.bf16 %v7332_v31, %v7331_v43  ;;  %v11657_v17 = vld [vmem:[#allocation3 + $0x1e7] sm:$0xff]  ;;  %v9436_v43 = vpack.c.bf16 %v7338_v23, %v7337_v22  ;;  %v11690_v22 = vld [vmem:[#allocation3 + $0x51] sm:$0xff] }
 0x364   : > { %v7339_v31 = vld [vmem:[%s12292_s3 + $0x1a0] sm:$0xff]  ;;  %v11723_v55 = vld [vmem:[#allocation3 + $0xa9] sm:$0xff] }
 0x365   : > { %8732 = vmatmul.mubr.f32.gmra.mrb[28].mxu1 %v11536_v10  ;;  %v7343_v23 = vld [vmem:[%s12292_s3 + $0x1c0] sm:$0xff]  ;;  %12464 = vst [vmem:[#allocation26_spill] sm:$0xff] %v11723_v55 }
 0x366   : > { %8734 = vmatprep.mubr.f32.mxu1 %v11545_v12  ;;  %9407 = vmatpush3.bf16.msra.mxu1 %v9404_v29  ;;  %v11636_v29 = vld [vmem:[#allocation3 + $0x16f] sm:$0xff] }
 0x367   : > { %9409 = vmatprep.subr.bf16.mxu1 %v9408_v8 }
 0x369   : > { %8735 = vmatmul.mubr.f32.gmra.mrb[30].mxu1 %v11548_v14 }
 0x36a   : > { %8737 = vmatprep.mubr.f32.mxu1 %v11557_v19  ;;  %9411 = vmatpush3.bf16.msra.mxu1 %v9408_v8  ;;  %v11645_v8 = vld [vmem:[#allocation3 + $0x1a7] sm:$0xff] }
 0x36b   : > { %9413 = vmatprep.subr.bf16.mxu1 %v9412_v13 }
 0x36d   : > { %8738 = vmatmul.mubr.f32.gmra.mrb[0].mxu1 %v11560_v21 }
 0x36e   : > { %8740 = vmatprep.mubr.f32.mxu1 %v11569_v26  ;;  %9415 = vmatpush3.bf16.msra.mxu1 %v9412_v13  ;;  %v11654_v13 = vld [vmem:[#allocation3 + $0x1cf] sm:$0xff] }
 0x36f   : > { %9417 = vmatprep.subr.bf16.mxu1 %v9416_v20 }
 0x371   : > { %8741 = vmatmul.mubr.f32.gmra.mrb[2].mxu1 %v11572_v36 }
 0x372   : > { %8743 = vmatprep.mubr.f32.mxu1 %v11581_v46  ;;  %9419 = vmatpush3.bf16.msra.mxu1 %v9416_v20  ;;  %v11660_v20 = vld [vmem:[#allocation3 + $0x1ef] sm:$0xff] }
 0x373   : > { %9421 = vmatprep.subr.bf16.mxu1 %v9420_v27 }
 0x375   : > { %8744 = vmatmul.mubr.f32.gmra.mrb[4].mxu1 %v11584_v48 }
 0x376   : > { %8746 = vmatprep.mubr.f32.mxu1 %v11593_v53  ;;  %9423 = vmatpush3.bf16.msra.mxu1 %v9420_v27  ;;  %v4575_v27 = vld [vmem:[#allocation3 + $0x11] sm:$0xff] }
 0x377   : > { %9425 = vmatprep.subr.bf16.mxu1 %v9424_v47 }
 0x379   : > { %8747 = vmatmul.mubr.f32.gmra.mrb[6].mxu1 %v11600_v59 }
 0x37a   : > { %8749 = vmatprep.mubr.f32.mxu1 %v11609_v38  ;;  %9427 = vmatpush3.bf16.msra.mxu1 %v9424_v47  ;;  %v7340_v47 = vld [vmem:[%s12292_s3 + $0x1a8] sm:$0xff] }
 0x37b   : > { %9429 = vmatprep.subr.bf16.mxu1 %v9428_v58  ;;  %v9440_v52 = vpack.c.bf16 %v7340_v47, %v7339_v31  ;;  %v11699_v31 = vld [vmem:[#allocation3 + $0x69] sm:$0xff]  ;;  %v11702_v47 = vld [vmem:[#allocation3 + $0x71] sm:$0xff] }
 0x37d   : > { %8750 = vmatmul.mubr.f32.gmra.mrb[8].mxu1 %v11612_v42 }
 0x37e   : > { %8752 = vmatprep.mubr.f32.mxu1 %v11615_v2  ;;  %9431 = vmatpush3.bf16.msra.mxu1 %v9428_v58  ;;  %v11678_v58 = vld [vmem:[#allocation3 + $0x31] sm:$0xff] }
 0x37f   : > { %9433 = vmatprep.subr.bf16.mxu1 %v9432_v41 }
 0x381   : > { %8753 = vmatmul.mubr.f32.gmra.mrb[10].mxu1 %v11618_v40 }
 0x382   : > { %8755 = vmatprep.mubr.f32.mxu1 %v11621_v62 }
 0x385   : > { %8756 = vmatmul.mubr.f32.gmra.mrb[12].mxu1 %v11624_v3 }
 0x386   : > { %8758 = vmatprep.mubr.f32.mxu1 %v11627_v4 }
 0x389   : > { %8759 = vmatmul.mubr.f32.gmra.mrb[14].mxu1 %v11630_v28 }
 0x38a   : > { %8761 = vmatprep.mubr.f32.mxu1 %v11633_v34 }
 0x38d   : > { %8762 = vmatmul.mubr.f32.gmra.mrb[16].mxu1 %v11636_v29 }
 0x38e   : > { %8764 = vmatprep.mubr.f32.mxu1 %v11639_v63 }
 0x391   : > { %8765 = vmatmul.mubr.f32.gmra.mrb[18].mxu1 %v11642_v35 }
 0x392   : > { %8767 = vmatprep.mubr.f32.mxu1 %v11645_v8 }
 0x395   : > { %8768 = vmatmul.mubr.f32.gmra.mrb[20].mxu1 %v11648_v9 }
 0x396   : > { %8770 = vmatprep.mubr.f32.mxu1 %v11651_v11 }
 0x399   : > { %8771 = vmatmul.mubr.f32.gmra.mrb[22].mxu1 %v11654_v13 }
 0x39a   : > { %8773 = vmatprep.mubr.f32.mxu1 %v11657_v17 }
 0x39d   : > { %8774 = vmatmul.mubr.f32.gmra.mrb[24].mxu1 %v11660_v20 }
 0x39e   : > { %8808 = vmatprep.mubr.f32.mxu1 %v4574_v18  ;;  %v11687_v18 = vld [vmem:[#allocation3 + $0x49] sm:$0xff] }
 0x3a1   : > { %8809 = vmatmul.mubr.f32.vlgmr.msra.gmra.mrb[26].mxu1 %v4575_v27  ;;  %v7344_v27 = vld [vmem:[%s12292_s3 + $0x1c8] sm:$0xff] }
 0x3a2   : > { %9435 = vmatpush3.bf16.msra.mxu1 %v9432_v41  ;;  %8811 = vmatprep.mubr.f32.mxu1 %v11675_v49  ;;  %v9444_v41 = vpack.c.bf16 %v7342_v61, %v7341_v60  ;;  %v7345_v60 = vld [vmem:[%s12292_s3 + $0x1d0] sm:$0xff]  ;;  %v7346_v61 = vld [vmem:[%s12292_s3 + $0x1d8] sm:$0xff] }
 0x3a3   : > { %9437 = vmatprep.subr.bf16.mxu1 %v9436_v43 }
 0x3a5   : > { %8812 = vmatmul.mubr.f32.gmra.mrb[28].mxu1 %v11678_v58 }
 0x3a6   : > { %8814 = vmatprep.mubr.f32.mxu1 %v11687_v18  ;;  %9439 = vmatpush3.bf16.msra.mxu1 %v9436_v43  ;;  %v9448_v43 = vpack.c.bf16 %v7344_v27, %v7343_v23  ;;  %v11714_v23 = vld [vmem:[#allocation3 + $0x91] sm:$0xff]  ;;  %v7347_v27 = vld [vmem:[%s12292_s3 + $0x1e0] sm:$0xff] }
 0x3a7   : > { %9441 = vmatprep.subr.bf16.mxu1 %v9440_v52  ;;  %12463 = vst [vmem:[#allocation24_spill] sm:$0xff] %v11714_v23 }
 0x3a9   : > { %8815 = vmatmul.mubr.f32.gmra.mrb[30].mxu1 %v11690_v22 }
 0x3aa   : > { %8817 = vmatprep.mubr.f32.mxu1 %v11699_v31  ;;  %9443 = vmatpush3.bf16.msra.mxu1 %v9440_v52  ;;  %v9452_v52 = vpack.c.bf16 %v7346_v61, %v7345_v60  ;;  %v11726_v60 = vld [vmem:[#allocation3 + $0xb1] sm:$0xff] }
 0x3ab   : > { %9445 = vmatprep.subr.bf16.mxu1 %v9444_v41  ;;  %12465 = vst [vmem:[#allocation28_spill] sm:$0xff] %v11726_v60  ;;  %v7349_v61 = vld [vmem:[%s12292_s3 + $0x1f0] sm:$0xff] }
 0x3ad   : > { %8818 = vmatmul.mubr.f32.gmra.mrb[0].mxu1 %v11702_v47 }
 0x3ae   : > { %8820 = vmatprep.mubr.f32.mxu1 %v11711_v30  ;;  %9447 = vmatpush3.bf16.msra.mxu1 %v9444_v41  ;;  %v9456_v41 = vpack.c.bf16 %v7348_v33, %v7347_v27  ;;  %v11738_v33 = vld [vmem:[#allocation3 + $0xd1] sm:$0xff]  ;;  %v7351_v27 = vld [vmem:[%s12292_s3 + $0x200] sm:$0xff] }
 0x3af   : > { %9449 = vmatprep.subr.bf16.mxu1 %v9448_v43  ;;  %12467 = vst [vmem:[#allocation31_spill] sm:$0xff] %v11738_v33 }
 0x3b1   : > { %8821 = vmatmul.mubr.f32.gmra.mrb[2].mxu1 %v11714_v23  ;;  %v11735_v23 = vld [vmem:[#allocation3 + $0xc9] sm:$0xff] }
 0x3b2   : > { %8823 = vmatprep.mubr.f32.mxu1 %v11723_v55  ;;  %9451 = vmatpush3.bf16.msra.mxu1 %v9448_v43  ;;  %12466 = vst [vmem:[#allocation29_spill] sm:$0xff] %v11735_v23  ;;  %v9460_v43 = vpack.c.bf16 %v7350_v54, %v7349_v61  ;;  %v7352_v55 = vld [vmem:[%s12292_s3 + $0x208] sm:$0xff]  ;;  %v11750_v54 = vld [vmem:[#allocation3 + $0xf1] sm:$0xff] }
 0x3b3   : > { %9453 = vmatprep.subr.bf16.mxu1 %v9452_v52  ;;  %v11753_v61 = vld [vmem:[#allocation3 + $0x109] sm:$0xff] }
 0x3b4   : > { %12468 = vst [vmem:[#allocation33_spill] sm:$0xff] %v11753_v61 }
 0x3b5   : > { %8824 = vmatmul.mubr.f32.gmra.mrb[4].mxu1 %v11726_v60  ;;  %v11747_v60 = vld [vmem:[#allocation3 + $0xe9] sm:$0xff] }
 0x3b6   : > { %8826 = vmatprep.mubr.f32.mxu1 %v11735_v23  ;;  %9455 = vmatpush3.bf16.msra.mxu1 %v9452_v52  ;;  %v9464_v52 = vpack.c.bf16 %v7352_v55, %v7351_v27  ;;  %v11756_v23 = vld [vmem:[#allocation3 + $0x111] sm:$0xff]  ;;  %v11765_v55 = vld [vmem:[#allocation3 + $0x149] sm:$0xff] }
 0x3b7   : > { %9457 = vmatprep.subr.bf16.mxu1 %v9456_v41  ;;  %12469 = vst [vmem:[#allocation5_spill] sm:$0xff] %v11756_v23  ;;  %12472 = vst [vmem:[#allocation8_spill] sm:$0xff] %v11765_v55  ;;  %v11768_v27 = vld [vmem:[#allocation3 + $0x151] sm:$0xff] }
 0x3b8   : > { %12473 = vst [vmem:[#allocation35_spill] sm:$0xff] %v11768_v27 }
 0x3b9   : > { %8827 = vmatmul.mubr.f32.gmra.mrb[6].mxu1 %v11738_v33  ;;  %v11759_v33 = vld [vmem:[#allocation3 + $0x129] sm:$0xff] }
 0x3ba   : > { %8829 = vmatprep.mubr.f32.mxu1 %v11747_v60  ;;  %9459 = vmatpush3.bf16.msra.mxu1 %v9456_v41  ;;  %12470 = vst [vmem:[#allocation6_spill] sm:$0xff] %v11759_v33  ;;  %v11762_v41 = vld [vmem:[#allocation3 + $0x131] sm:$0xff] }
 0x3bb   : > { %9461 = vmatprep.subr.bf16.mxu1 %v9460_v43  ;;  %12471 = vst [vmem:[#allocation7_spill] sm:$0xff] %v11762_v41 }
 0x3bd   : > { %8830 = vmatmul.mubr.f32.gmra.mrb[8].mxu1 %v11750_v54 }
 0x3be   : > { %8832 = vmatprep.mubr.f32.mxu1 %v11753_v61  ;;  %9463 = vmatpush3.bf16.msra.mxu1 %v9460_v43  ;;  %v11771_v43 = vld [vmem:[#allocation3 + $0x169] sm:$0xff] }
 0x3bf   : > { %9465 = vmatprep.subr.bf16.mxu1 %v9464_v52  ;;  %12474 = vst [vmem:[#allocation36_spill] sm:$0xff] %v11771_v43 }
 0x3c1   : > { %8833 = vmatmul.mubr.f32.gmra.mrb[10].mxu1 %v11756_v23  ;;  %v11774_v23 = vld [vmem:[#allocation3 + $0x171] sm:$0xff] }
 0x3c2   : > { %8835 = vmatprep.mubr.f32.mxu1 %v11759_v33  ;;  %12475 = vst [vmem:[#allocation11_spill] sm:$0xff] %v11774_v23  ;;  %v11777_v33 = vld [vmem:[#allocation3 + $0x189] sm:$0xff] }
 0x3c3   : > { %12476 = vst [vmem:[#allocation12_spill] sm:$0xff] %v11777_v33 }
 0x3c5   : > { %8836 = vmatmul.mubr.f32.gmra.mrb[12].mxu1 %v11762_v41  ;;  %v11780_v41 = vld [vmem:[#allocation3 + $0x191] sm:$0xff] }
 0x3c6   : > { %8838 = vmatprep.mubr.f32.mxu1 %v11765_v55  ;;  %12477 = vst [vmem:[#allocation13_spill] sm:$0xff] %v11780_v41  ;;  %v11783_v55 = vld [vmem:[#allocation3 + $0x1a9] sm:$0xff] }
 0x3c7   : > { %12478 = vst [vmem:[#allocation14_spill] sm:$0xff] %v11783_v55 }
 0x3c9   : > { %8839 = vmatmul.mubr.f32.gmra.mrb[14].mxu1 %v11768_v27  ;;  %v11786_v27 = vld [vmem:[#allocation3 + $0x1b1] sm:$0xff] }
 0x3ca   : > { %8841 = vmatprep.mubr.f32.mxu1 %v11771_v43  ;;  %12479 = vst [vmem:[#allocation15_spill] sm:$0xff] %v11786_v27  ;;  %v11789_v43 = vld [vmem:[#allocation3 + $0x1c9] sm:$0xff] }
 0x3cb   : > { %12480 = vst [vmem:[#allocation16_spill] sm:$0xff] %v11789_v43 }
 0x3cd   : > { %8842 = vmatmul.mubr.f32.gmra.mrb[16].mxu1 %v11774_v23  ;;  %v11792_v23 = vld [vmem:[#allocation3 + $0x1d1] sm:$0xff] }
 0x3ce   : > { %8844 = vmatprep.mubr.f32.mxu1 %v11777_v33  ;;  %12481 = vst [vmem:[#allocation17_spill] sm:$0xff] %v11792_v23  ;;  %v11795_v33 = vld [vmem:[#allocation3 + $0x1e9] sm:$0xff] }
 0x3cf   : > { %12482 = vst [vmem:[#allocation18_spill] sm:$0xff] %v11795_v33 }
 0x3d1   : > { %8845 = vmatmul.mubr.f32.gmra.mrb[18].mxu1 %v11780_v41  ;;  %v11798_v41 = vld [vmem:[#allocation3 + $0x1f1] sm:$0xff] }
 0x3d2   : > { %8847 = vmatprep.mubr.f32.mxu1 %v11783_v55  ;;  %v7353_v55 = vld [vmem:[%s12292_s3 + $0x210] sm:$0xff] }
 0x3d5   : > { %8848 = vmatmul.mubr.f32.gmra.mrb[20].mxu1 %v11786_v27  ;;  %v7354_v27 = vld [vmem:[%s12292_s3 + $0x218] sm:$0xff] }
 0x3d6   : > { %8850 = vmatprep.mubr.f32.mxu1 %v11789_v43  ;;  %v9468_v43 = vpack.c.bf16 %v7354_v27, %v7353_v55  ;;  %v7358_v55 = vld [vmem:[%s12292_s3 + $0x238] sm:$0xff] }
 0x3d9   : > { %8851 = vmatmul.mubr.f32.gmra.mrb[22].mxu1 %v11792_v23  ;;  %v7355_v23 = vld [vmem:[%s12292_s3 + $0x220] sm:$0xff] }
 0x3da   : > { %8853 = vmatprep.mubr.f32.mxu1 %v11795_v33  ;;  %v7356_v33 = vld [vmem:[%s12292_s3 + $0x228] sm:$0xff] }
 0x3db   : > { %v9472_v61 = vpack.c.bf16 %v7356_v33, %v7355_v23  ;;  %v7360_v23 = vld [vmem:[%s12292_s3 + $0x248] sm:$0xff]  ;;  %v7362_v33 = vld [vmem:[%s12292_s3 + $0x258] sm:$0xff] }
 0x3dd   : > { %8854 = vmatmul.mubr.f32.gmra.mrb[24].mxu1 %v11798_v41 }
 0x3de   : > { %8888 = vmatprep.mubr.f32.mxu1 %v11532_v6  ;;  %v7357_v6 = vld [vmem:[%s12292_s3 + $0x230] sm:$0xff] }
 0x3e1   : > { %8889 = vmatmul.mubr.f32.vlgmr.msra.gmra.mrb[26].mxu1 %v11536_v10  ;;  %v9476_v10 = vpack.c.bf16 %v7358_v55, %v7357_v6 }
 0x3e2   : > { %9467 = vmatpush3.bf16.msra.mxu1 %v9464_v52  ;;  %8891 = vmatprep.mubr.f32.mxu1 %v11545_v12  ;;  %v7359_v12 = vld [vmem:[%s12292_s3 + $0x240] sm:$0xff]  ;;  %v7364_v52 = vld [vmem:[%s12292_s3 + $0x268] sm:$0xff] }
 0x3e3   : > { %9469 = vmatprep.subr.bf16.mxu1 %v9468_v43 }
 0x3e5   : > { %8892 = vmatmul.mubr.f32.gmra.mrb[28].mxu1 %v11548_v14  ;;  %v9480_v14 = vpack.c.bf16 %v7360_v23, %v7359_v12  ;;  %v7376_v12 = vld [vmem:[%s12292_s3 + $0x2c8] sm:$0xff] }
 0x3e6   : > { %8894 = vmatprep.mubr.f32.mxu1 %v11557_v19  ;;  %9471 = vmatpush3.bf16.msra.mxu1 %v9468_v43  ;;  %v7361_v19 = vld [vmem:[%s12292_s3 + $0x250] sm:$0xff]  ;;  %v7368_v43 = vld [vmem:[%s12292_s3 + $0x288] sm:$0xff] }
 0x3e7   : > { %9473 = vmatprep.subr.bf16.mxu1 %v9472_v61  ;;  %v11929_v23 = vld [vmem:[#allocation3 + $0x88] sm:$0xff] }
 0x3e9   : > { %8895 = vmatmul.mubr.f32.gmra.mrb[30].mxu1 %v11560_v21  ;;  %v9484_v21 = vpack.c.bf16 %v7362_v33, %v7361_v19  ;;  %v11932_v19 = vld [vmem:[#allocation3 + $0x90] sm:$0xff] }
 0x3ea   : > { %8897 = vmatprep.mubr.f32.mxu1 %v11569_v26  ;;  %9475 = vmatpush3.bf16.msra.mxu1 %v9472_v61  ;;  %v7363_v26 = vld [vmem:[%s12292_s3 + $0x260] sm:$0xff]  ;;  %v7366_v61 = vld [vmem:[%s12292_s3 + $0x278] sm:$0xff]  ;;  %v7377_v33 = vld [vmem:[%s12292_s3 + $0x2d0] sm:$0xff] }
 0x3eb   : > { %9477 = vmatprep.subr.bf16.mxu1 %v9476_v10 }
 0x3ed   : > { %8898 = vmatmul.mubr.f32.gmra.mrb[0].mxu1 %v11572_v36  ;;  %v9488_v36 = vpack.c.bf16 %v7364_v52, %v7363_v26  ;;  %v11941_v26 = vld [vmem:[#allocation3 + $0xa8] sm:$0xff] }
 0x3ee   : > { %8900 = vmatprep.mubr.f32.mxu1 %v11581_v46  ;;  %9479 = vmatpush3.bf16.msra.mxu1 %v9476_v10  ;;  %v7365_v46 = vld [vmem:[%s12292_s3 + $0x270] sm:$0xff]  ;;  %v7375_v10 = vld [vmem:[%s12292_s3 + $0x2c0] sm:$0xff] }
 0x3ef   : > { %9481 = vmatprep.subr.bf16.mxu1 %v9480_v14 }
 0x3f1   : > { %8901 = vmatmul.mubr.f32.gmra.mrb[2].mxu1 %v11584_v48  ;;  %v9492_v48 = vpack.c.bf16 %v7366_v61, %v7365_v46  ;;  %v7379_v46 = vld [vmem:[%s12292_s3 + $0x2e0] sm:$0xff]  ;;  %v7380_v61 = vld [vmem:[%s12292_s3 + $0x2e8] sm:$0xff] }
 0x3f2   : > { %8903 = vmatprep.mubr.f32.mxu1 %v11593_v53  ;;  %9483 = vmatpush3.bf16.msra.mxu1 %v9480_v14  ;;  %v7367_v53 = vld [vmem:[%s12292_s3 + $0x280] sm:$0xff]  ;;  %v9512_v14 = vpack.c.bf16 %v7376_v12, %v7375_v10 }
 0x3f3   : > { %9485 = vmatprep.subr.bf16.mxu1 %v9484_v21  ;;  %v7399_v12 = vld [vmem:[%s12292_s3 + $0x380] sm:$0xff] }
 0x3f5   : > { %8904 = vmatmul.mubr.f32.gmra.mrb[4].mxu1 %v11600_v59  ;;  %v9496_v59 = vpack.c.bf16 %v7368_v43, %v7367_v53  ;;  %v9520_v53 = vpack.c.bf16 %v7380_v61, %v7379_v46  ;;  %v11956_v43 = vld [vmem:[#allocation3 + $0xd0] sm:$0xff]  ;;  %v12494_v61 = vld [vmem:[#allocation8_spill] sm:$0xff] }
 0x3f6   : > { %8906 = vmatprep.mubr.f32.mxu1 %v11609_v38  ;;  %9487 = vmatpush3.bf16.msra.mxu1 %v9484_v21  ;;  %v7378_v21 = vld [vmem:[%s12292_s3 + $0x2d8] sm:$0xff]  ;;  %v12493_v46 = vld [vmem:[#allocation7_spill] sm:$0xff] }
 0x3f7   : > { %9489 = vmatprep.subr.bf16.mxu1 %v9488_v36  ;;  %v9516_v52 = vpack.c.bf16 %v7378_v21, %v7377_v33  ;;  %v12490_v33 = vld [vmem:[#allocation33_spill] sm:$0xff] }
 0x3f8   : > { %v11856_v27 = vpop.f32.mrb[34].mxu0 }
 0x3f9   : > { %v11864_v6 = vpop.f32.mrb[35].mxu0  ;;  %8907 = vmatmul.mubr.f32.gmra.mrb[6].mxu1 %v11612_v42  ;;  %v11887_v42 = vld [vmem:[#allocation3 + $0x207] sm:$0xff] }
 0x3fa   : > { %8909 = vmatprep.mubr.f32.mxu1 %v11615_v2  ;;  %9491 = vmatpush3.bf16.msra.mxu1 %v9488_v36  ;;  %v11890_v2 = vld [vmem:[#allocation3 + $0x20f] sm:$0xff] }
 0x3fb   : > { %9493 = vmatprep.subr.bf16.mxu1 %v9492_v48  ;;  %v11944_v36 = vld [vmem:[#allocation3 + $0xb0] sm:$0xff] }
 0x3fc   : > { %v11868_v38 = vpop.f32.mrb[36].mxu0 }
 0x3fd   : > { %v11870_v55 = vpop.f32.mrb[37].mxu0  ;;  %8910 = vmatmul.mubr.f32.gmra.mrb[8].mxu1 %v11618_v40  ;;  %v7369_v40 = vld [vmem:[%s12292_s3 + $0x290] sm:$0xff] }
 0x3fe   : > { %8912 = vmatprep.mubr.f32.mxu1 %v11621_v62  ;;  %9495 = vmatpush3.bf16.msra.mxu1 %v9492_v48  ;;  %v7370_v62 = vld [vmem:[%s12292_s3 + $0x298] sm:$0xff]  ;;  %v11953_v48 = vld [vmem:[#allocation3 + $0xc8] sm:$0xff] }
 0x3ff   : > { %9497 = vmatprep.subr.bf16.mxu1 %v9496_v59 }
 0x401   : > { %8913 = vmatmul.mubr.f32.gmra.mrb[10].mxu1 %v11624_v3  ;;  %v5186_v3 = vld [vmem:[#allocation3 + $0x28] sm:$0xff] }
 0x402   : > { %8915 = vmatprep.mubr.f32.mxu1 %v11627_v4  ;;  %v9500_v4 = vpack.c.bf16 %v7370_v62, %v7369_v40  ;;  %v7382_v40 = vld [vmem:[%s12292_s3 + $0x2f8] sm:$0xff]  ;;  %v11965_v62 = vld [vmem:[#allocation3 + $0xe8] sm:$0xff] }
 0x405   : > { %8916 = vmatmul.mubr.f32.gmra.mrb[12].mxu1 %v11630_v28  ;;  %v5187_v28 = vld [vmem:[#allocation3 + $0x30] sm:$0xff] }
 0x406   : > { %8918 = vmatprep.mubr.f32.mxu1 %v11633_v34  ;;  %v7371_v34 = vld [vmem:[%s12292_s3 + $0x2a0] sm:$0xff] }
 0x409   : > { %8919 = vmatmul.mubr.f32.gmra.mrb[14].mxu1 %v11636_v29  ;;  %v7372_v29 = vld [vmem:[%s12292_s3 + $0x2a8] sm:$0xff] }
 0x40a   : > { %8921 = vmatprep.mubr.f32.mxu1 %v11639_v63  ;;  %v11905_v63 = vld [vmem:[#allocation3 + $0x48] sm:$0xff] }
 0x40d   : > { %8922 = vmatmul.mubr.f32.gmra.mrb[16].mxu1 %v11642_v35  ;;  %v9504_v35 = vpack.c.bf16 %v7372_v29, %v7371_v34  ;;  %v7384_v34 = vld [vmem:[%s12292_s3 + $0x308] sm:$0xff] }
 0x40e   : > { %8924 = vmatprep.mubr.f32.mxu1 %v11645_v8  ;;  %v11908_v8 = vld [vmem:[#allocation3 + $0x50] sm:$0xff] }
 0x411   : > { %8925 = vmatmul.mubr.f32.gmra.mrb[18].mxu1 %v11648_v9  ;;  %v7373_v9 = vld [vmem:[%s12292_s3 + $0x2b0] sm:$0xff] }
 0x412   : > { %8927 = vmatprep.mubr.f32.mxu1 %v11651_v11  ;;  %v7374_v11 = vld [vmem:[%s12292_s3 + $0x2b8] sm:$0xff] }
 0x415   : > { %8928 = vmatmul.mubr.f32.gmra.mrb[20].mxu1 %v11654_v13  ;;  %v11917_v13 = vld [vmem:[#allocation3 + $0x68] sm:$0xff] }
 0x416   : > { %8930 = vmatprep.mubr.f32.mxu1 %v11657_v17  ;;  %v9508_v17 = vpack.c.bf16 %v7374_v11, %v7373_v9  ;;  %v7397_v9 = vld [vmem:[%s12292_s3 + $0x370] sm:$0xff]  ;;  %v7398_v11 = vld [vmem:[%s12292_s3 + $0x378] sm:$0xff] }
 0x417   : > { %v9556_v10 = vpack.c.bf16 %v7398_v11, %v7397_v9  ;;  %v7410_v9 = vld [vmem:[%s12292_s3 + $0x3d8] sm:$0xff]  ;;  %v5807_v11 = vld [vmem:[#allocation3 + $0xc7] sm:$0xff] }
 0x419   : > { %8931 = vmatmul.mubr.f32.gmra.mrb[22].mxu1 %v11660_v20  ;;  %v11920_v20 = vld [vmem:[#allocation3 + $0x70] sm:$0xff] }
 0x41a   : > { %8933 = vmatprep.mubr.f32.mxu1 %v11887_v42 }
 0x41d   : > { %8934 = vmatmul.mubr.f32.gmra.mrb[24].mxu1 %v11890_v2 }
 0x41e   : > { %8968 = vmatprep.mubr.f32.mxu1 %v5186_v3 }
 0x421   : > { %8969 = vmatmul.mubr.f32.vlgmr.msra.gmra.mrb[26].mxu1 %v5187_v28  ;;  %v7383_v28 = vld [vmem:[%s12292_s3 + $0x300] sm:$0xff] }
 0x422   : > { %9499 = vmatpush3.bf16.msra.mxu1 %v9496_v59  ;;  %8971 = vmatprep.mubr.f32.mxu1 %v11905_v63  ;;  %v7381_v59 = vld [vmem:[%s12292_s3 + $0x2f0] sm:$0xff]  ;;  %v9528_v29 = vpack.c.bf16 %v7384_v34, %v7383_v28  ;;  %v12500_v28 = vld [vmem:[#allocation14_spill] sm:$0xff] }
 0x423   : > { %9501 = vmatprep.subr.bf16.mxu1 %v9500_v4  ;;  %v9524_v3 = vpack.c.bf16 %v7382_v40, %v7381_v59  ;;  %v12496_v59 = vld [vmem:[#allocation36_spill] sm:$0xff]  ;;  %v12501_v34 = vld [vmem:[#allocation15_spill] sm:$0xff] }
 0x424   : > { %v12498_v40 = vld [vmem:[#allocation12_spill] sm:$0xff] }
 0x425   : > { %8972 = vmatmul.mubr.f32.gmra.mrb[28].mxu1 %v11908_v8 }
 0x426   : > { %8974 = vmatprep.mubr.f32.mxu1 %v11917_v13  ;;  %9503 = vmatpush3.bf16.msra.mxu1 %v9500_v4  ;;  %v11968_v4 = vld [vmem:[#allocation3 + $0xf0] sm:$0xff] }
 0x427   : > { %9505 = vmatprep.subr.bf16.mxu1 %v9504_v35 }
 0x429   : > { %8975 = vmatmul.mubr.f32.gmra.mrb[30].mxu1 %v11920_v20 }
 0x42a   : > { %8977 = vmatprep.mubr.f32.mxu1 %v11929_v23  ;;  %9507 = vmatpush3.bf16.msra.mxu1 %v9504_v35  ;;  %v11978_v35 = vld [vmem:[#allocation3 + $0x110] sm:$0xff] }
 0x42b   : > { %9509 = vmatprep.subr.bf16.mxu1 %v9508_v17 }
 0x42d   : > { %8978 = vmatmul.mubr.f32.gmra.mrb[0].mxu1 %v11932_v19 }
 0x42e   : > { %8980 = vmatprep.mubr.f32.mxu1 %v11941_v26  ;;  %9511 = vmatpush3.bf16.msra.mxu1 %v9508_v17  ;;  %v12489_v17 = vld [vmem:[#allocation31_spill] sm:$0xff] }
 0x42f   : > { %9513 = vmatprep.subr.bf16.mxu1 %v9512_v14 }
 0x431   : > { %8981 = vmatmul.mubr.f32.gmra.mrb[2].mxu1 %v11944_v36 }
 0x432   : > { %8983 = vmatprep.mubr.f32.mxu1 %v11953_v48  ;;  %9515 = vmatpush3.bf16.msra.mxu1 %v9512_v14  ;;  %v7400_v14 = vld [vmem:[%s12292_s3 + $0x388] sm:$0xff] }
 0x433   : > { %9517 = vmatprep.subr.bf16.mxu1 %v9516_v52  ;;  %v9560_v21 = vpack.c.bf16 %v7400_v14, %v7399_v12  ;;  %v7411_v12 = vld [vmem:[%s12292_s3 + $0x3e0] sm:$0xff]  ;;  %v7412_v14 = vld [vmem:[%s12292_s3 + $0x3e8] sm:$0xff] }
 0x435   : > { %8984 = vmatmul.mubr.f32.gmra.mrb[4].mxu1 %v11956_v43 }
 0x436   : > { %8986 = vmatprep.mubr.f32.mxu1 %v11965_v62  ;;  %9519 = vmatpush3.bf16.msra.mxu1 %v9516_v52  ;;  %v12491_v52 = vld [vmem:[#allocation5_spill] sm:$0xff] }
 0x437   : > { %9521 = vmatprep.subr.bf16.mxu1 %v9520_v53 }
 0x439   : > { %8987 = vmatmul.mubr.f32.gmra.mrb[6].mxu1 %v11968_v4 }
 0x43a   : > { %8989 = vmatprep.mubr.f32.mxu1 %v11419_v7  ;;  %9523 = vmatpush3.bf16.msra.mxu1 %v9520_v53  ;;  %v12483_v7 = vmax.f32 %v11510_v5, 0.0  ;;  %v12485_v5 = vld [vmem:[#allocation24_spill] sm:$0xff]  ;;  %v12495_v53 = vld [vmem:[#allocation35_spill] sm:$0xff] }
 0x43b   : > { %9525 = vmatprep.subr.bf16.mxu1 %v9524_v3 }
 0x43d   : > { %8990 = vmatmul.mubr.f32.gmra.mrb[8].mxu1 %v11978_v35 }
 0x43e   : > { %8992 = vmatprep.mubr.f32.mxu1 %v11433_v16  ;;  %9527 = vmatpush3.bf16.msra.mxu1 %v9524_v3  ;;  %v7386_v16 = vld [vmem:[%s12292_s3 + $0x318] sm:$0xff]  ;;  %v12499_v3 = vld [vmem:[#allocation13_spill] sm:$0xff] }
 0x43f   : > { %9529 = vmatprep.subr.bf16.mxu1 %v9528_v29 }
 0x441   : > { %8993 = vmatmul.mubr.f32.gmra.mrb[10].mxu1 %v11431_v15  ;;  %v7385_v15 = vld [vmem:[%s12292_s3 + $0x310] sm:$0xff] }
 0x442   : > { %8995 = vmatprep.mubr.f32.mxu1 %v11449_v25  ;;  %v9532_v25 = vpack.c.bf16 %v7386_v16, %v7385_v15  ;;  %v12504_v15 = vld [vmem:[#allocation18_spill] sm:$0xff] }
 0x443   : > { %v12077_v16 = vld [vmem:[#allocation3 + $0x209] sm:$0xff] }
 0x445   : > { %8996 = vmatmul.mubr.f32.gmra.mrb[12].mxu1 %v11446_v24  ;;  %v12484_v24 = vmax.f32 %v11506_v0, 0.0  ;;  %v7394_v0 = vld [vmem:[%s12292_s3 + $0x358] sm:$0xff] }
 0x446   : > { %8998 = vmatprep.mubr.f32.mxu1 %v11461_v45  ;;  %v7388_v45 = vld [vmem:[%s12292_s3 + $0x328] sm:$0xff] }
 0x449   : > { %8999 = vmatmul.mubr.f32.gmra.mrb[14].mxu1 %v11458_v44  ;;  %v7387_v44 = vld [vmem:[%s12292_s3 + $0x320] sm:$0xff] }
 0x44a   : > { %9001 = vmatprep.mubr.f32.mxu1 %v11472_v51  ;;  %v7389_v51 = vld [vmem:[%s12292_s3 + $0x330] sm:$0xff] }
 0x44d   : > { %9002 = vmatmul.mubr.f32.gmra.mrb[16].mxu1 %v11469_v50  ;;  %v9536_v50 = vpack.c.bf16 %v7388_v45, %v7387_v44  ;;  %v7402_v44 = vld [vmem:[%s12292_s3 + $0x398] sm:$0xff]  ;;  %v5799_v45 = vld [vmem:[#allocation3 + $0x47] sm:$0xff] }
 0x44e   : > { %9004 = vmatprep.mubr.f32.mxu1 %v11482_v57 }
 0x451   : > { %9005 = vmatmul.mubr.f32.gmra.mrb[18].mxu1 %v11479_v56  ;;  %v7390_v56 = vld [vmem:[%s12292_s3 + $0x338] sm:$0xff] }
 0x452   : > { %9007 = vmatprep.mubr.f32.mxu1 %v11492_v37  ;;  %v9540_v57 = vpack.c.bf16 %v7390_v56, %v7389_v51  ;;  %v7392_v37 = vld [vmem:[%s12292_s3 + $0x348] sm:$0xff]  ;;  %v7403_v51 = vld [vmem:[%s12292_s3 + $0x3a0] sm:$0xff] }
 0x453   : > { %v7404_v56 = vld [vmem:[%s12292_s3 + $0x3a8] sm:$0xff] }
 0x455   : > { %9008 = vmatmul.mubr.f32.gmra.mrb[20].mxu1 %v11489_v32  ;;  %v7391_v32 = vld [vmem:[%s12292_s3 + $0x340] sm:$0xff] }
 0x456   : > { %9010 = vmatprep.mubr.f32.mxu1 %v11502_v1  ;;  %v7393_v1 = vld [vmem:[%s12292_s3 + $0x350] sm:$0xff] }
 0x459   : > { %9011 = vmatmul.mubr.f32.gmra.mrb[22].mxu1 %v11499_v39  ;;  %v9544_v39 = vpack.c.bf16 %v7392_v37, %v7391_v32  ;;  %v9568_v32 = vpack.c.bf16 %v7404_v56, %v7403_v51  ;;  %v5802_v37 = vld [vmem:[#allocation3 + $0x6f] sm:$0xff]  ;;  %v5823_v51 = vld [vmem:[#allocation3 + $0x1c7] sm:$0xff] }
 0x45a   : > { %9013 = vmatprep.mubr.f32.mxu1 %v12483_v7  ;;  %v12503_v7 = vld [vmem:[#allocation17_spill] sm:$0xff]  ;;  %v5824_v56 = vld [vmem:[#allocation3 + $0x1cf] sm:$0xff] }
 0x45d   : > { %9014 = vmatmul.mubr.f32.gmra.mrb[24].mxu1 %v12484_v24  ;;  %v12080_v24 = vld [vmem:[#allocation3 + $0x211] sm:$0xff] }
 0x45e   : > { %9048 = vmatprep.mubr.f32.mxu1 %v11675_v49  ;;  %v12486_v49 = vld [vmem:[#allocation26_spill] sm:$0xff] }
 0x461   : > { %9049 = vmatmul.mubr.f32.vlgmr.msra.gmra.mrb[26].mxu1 %v11678_v58  ;;  %v9548_v58 = vpack.c.bf16 %v7394_v0, %v7393_v1  ;;  %v7406_v1 = vld [vmem:[%s12292_s3 + $0x3b8] sm:$0xff]  ;;  %v5803_v0 = vld [vmem:[#allocation3 + $0x87] sm:$0xff] }
 0x462   : > { %9531 = vmatpush3.bf16.msra.mxu1 %v9528_v29  ;;  %9051 = vmatprep.mubr.f32.mxu1 %v11687_v18  ;;  %v7396_v18 = vld [vmem:[%s12292_s3 + $0x368] sm:$0xff]  ;;  %v12502_v29 = vld [vmem:[#allocation16_spill] sm:$0xff] }
 0x463   : > { %9533 = vmatprep.subr.bf16.mxu1 %v9532_v25 }
 0x465   : > { %9052 = vmatmul.mubr.f32.gmra.mrb[28].mxu1 %v11690_v22  ;;  %v12487_v22 = vld [vmem:[#allocation28_spill] sm:$0xff] }
 0x466   : > { %9054 = vmatprep.mubr.f32.mxu1 %v11699_v31  ;;  %9535 = vmatpush3.bf16.msra.mxu1 %v9532_v25  ;;  %v12488_v31 = vld [vmem:[#allocation29_spill] sm:$0xff]  ;;  %v7401_v25 = vld [vmem:[%s12292_s3 + $0x390] sm:$0xff] }
 0x467   : > { %9537 = vmatprep.subr.bf16.mxu1 %v9536_v50 }
 0x469   : > { %9055 = vmatmul.mubr.f32.gmra.mrb[30].mxu1 %v11702_v47 }
 0x46a   : > { %9057 = vmatprep.mubr.f32.mxu1 %v11711_v30  ;;  %9539 = vmatpush3.bf16.msra.mxu1 %v9536_v50  ;;  %v7395_v30 = vld [vmem:[%s12292_s3 + $0x360] sm:$0xff]  ;;  %v9564_v50 = vpack.c.bf16 %v7402_v44, %v7401_v25  ;;  %v5818_v25 = vld [vmem:[#allocation3 + $0x16f] sm:$0xff] }
 0x46b   : > { %9541 = vmatprep.subr.bf16.mxu1 %v9540_v57  ;;  %v9552_v47 = vpack.c.bf16 %v7396_v18, %v7395_v30  ;;  %v7408_v30 = vld [vmem:[%s12292_s3 + $0x3c8] sm:$0xff] }
 0x46c   : > { %v5805_v18 = vld [vmem:[#allocation3 + $0xa7] sm:$0xff] }
 0x46d   : > { %9058 = vmatmul.mubr.f32.gmra.mrb[0].mxu1 %v12485_v5  ;;  %v5819_v44 = vld [vmem:[#allocation3 + $0x187] sm:$0xff] }
 0x46e   : > { %9060 = vmatprep.mubr.f32.mxu1 %v12486_v49  ;;  %9543 = vmatpush3.bf16.msra.mxu1 %v9540_v57  ;;  %v5801_v57 = vld [vmem:[#allocation3 + $0x67] sm:$0xff]  ;;  %v5804_v49 = vld [vmem:[#allocation3 + $0x8f] sm:$0xff] }
 0x46f   : > { %9545 = vmatprep.subr.bf16.mxu1 %v9544_v39 }
 0x471   : > { %9061 = vmatmul.mubr.f32.gmra.mrb[2].mxu1 %v12487_v22 }
 0x472   : > { %9063 = vmatprep.mubr.f32.mxu1 %v12488_v31  ;;  %9547 = vmatpush3.bf16.msra.mxu1 %v9544_v39  ;;  %v7405_v39 = vld [vmem:[%s12292_s3 + $0x3b0] sm:$0xff] }
 0x473   : > { %9549 = vmatprep.subr.bf16.mxu1 %v9548_v58  ;;  %v9572_v5 = vpack.c.bf16 %v7406_v1, %v7405_v39  ;;  %v5806_v31 = vld [vmem:[#allocation3 + $0xaf] sm:$0xff] }
 0x474   : > { %v5830_v39 = vld [vmem:[#allocation3 + $0x22f] sm:$0xff] }
 0x475   : > { %9064 = vmatmul.mubr.f32.gmra.mrb[4].mxu1 %v12489_v17  ;;  %v7417_v1 = vld [vmem:[%s12292_s3 + $0x410] sm:$0xff] }
 0x476   : > { %9066 = vmatprep.mubr.f32.mxu1 %v11747_v60  ;;  %9551 = vmatpush3.bf16.msra.mxu1 %v9548_v58  ;;  %v12492_v60 = vld [vmem:[#allocation6_spill] sm:$0xff]  ;;  %v7407_v58 = vld [vmem:[%s12292_s3 + $0x3c0] sm:$0xff] }
 0x477   : > { %9553 = vmatprep.subr.bf16.mxu1 %v9552_v47  ;;  %v9576_v22 = vpack.c.bf16 %v7408_v30, %v7407_v58  ;;  %v7422_v58 = vld [vmem:[%s12292_s3 + $0x438] sm:$0xff]  ;;  %v7424_v30 = vld [vmem:[%s12292_s3 + $0x448] sm:$0xff] }
 0x479   : > { %9067 = vmatmul.mubr.f32.gmra.mrb[6].mxu1 %v11750_v54  ;;  %v12497_v54 = vld [vmem:[#allocation11_spill] sm:$0xff] }
 0x47a   : > { %9069 = vmatprep.mubr.f32.mxu1 %v12490_v33  ;;  %9555 = vmatpush3.bf16.msra.mxu1 %v9552_v47  ;;  %v7409_v47 = vld [vmem:[%s12292_s3 + $0x3d0] sm:$0xff]  ;;  %v5809_v33 = vld [vmem:[#allocation3 + $0xe7] sm:$0xff] }
 0x47b   : > { %9557 = vmatprep.subr.bf16.mxu1 %v9556_v10  ;;  %v9580_v17 = vpack.c.bf16 %v7410_v9, %v7409_v47  ;;  %v6117_v47 = vld [vmem:[#allocation3 + $0x108] sm:$0xff]  ;;  %v6120_v9 = vld [vmem:[#allocation3 + $0x130] sm:$0xff] }
 0x47d   : > { %9070 = vmatmul.mubr.f32.gmra.mrb[8].mxu1 %v12491_v52  ;;  %v5810_v52 = vld [vmem:[#allocation3 + $0xef] sm:$0xff] }
 0x47e   : > { %9072 = vmatprep.mubr.f32.mxu1 %v12492_v60  ;;  %9559 = vmatpush3.bf16.msra.mxu1 %v9556_v10  ;;  %v5808_v10 = vld [vmem:[#allocation3 + $0xcf] sm:$0xff] }
 0x47f   : > { %9561 = vmatprep.subr.bf16.mxu1 %v9560_v21  ;;  %v7413_v60 = vld [vmem:[%s12292_s3 + $0x3f0] sm:$0xff] }
 0x481   : > { %9073 = vmatmul.mubr.f32.gmra.mrb[10].mxu1 %v12493_v46  ;;  %v7414_v46 = vld [vmem:[%s12292_s3 + $0x3f8] sm:$0xff] }
 0x482   : > { %9075 = vmatprep.mubr.f32.mxu1 %v12494_v61  ;;  %v5811_v61 = vld [vmem:[#allocation3 + $0x107] sm:$0xff] }
 0x485   : > { %9076 = vmatmul.mubr.f32.gmra.mrb[12].mxu1 %v12495_v53  ;;  %v9588_v53 = vpack.c.bf16 %v7414_v46, %v7413_v60  ;;  %v6131_v60 = vld [vmem:[#allocation3 + $0x1e8] sm:$0xff]  ;;  %v6132_v46 = vld [vmem:[#allocation3 + $0x1f0] sm:$0xff] }
 0x486   : > { %9078 = vmatprep.mubr.f32.mxu1 %v12496_v59  ;;  %v5812_v59 = vld [vmem:[#allocation3 + $0x10f] sm:$0xff] }
 0x489   : > { %9079 = vmatmul.mubr.f32.gmra.mrb[14].mxu1 %v12497_v54  ;;  %v7415_v54 = vld [vmem:[%s12292_s3 + $0x400] sm:$0xff] }
 0x48a   : > { %9081 = vmatprep.mubr.f32.mxu1 %v12498_v40  ;;  %v7416_v40 = vld [vmem:[%s12292_s3 + $0x408] sm:$0xff] }
 0x48d   : > { %9082 = vmatmul.mubr.f32.gmra.mrb[16].mxu1 %v12499_v3  ;;  %v5813_v3 = vld [vmem:[#allocation3 + $0x127] sm:$0xff] }
 0x48e   : > { %9084 = vmatprep.mubr.f32.mxu1 %v12500_v28  ;;  %v9592_v28 = vpack.c.bf16 %v7416_v40, %v7415_v54  ;;  %v6411_v54 = vld [vmem:[#allocation3 + $0x49] sm:$0xff]  ;;  %v6412_v40 = vld [vmem:[#allocation3 + $0x51] sm:$0xff] }
 0x491   : > { %9085 = vmatmul.mubr.f32.gmra.mrb[18].mxu1 %v12501_v34  ;;  %v5814_v34 = vld [vmem:[#allocation3 + $0x12f] sm:$0xff] }
 0x492   : > { %9087 = vmatprep.mubr.f32.mxu1 %v12502_v29  ;;  %v5815_v29 = vld [vmem:[#allocation3 + $0x147] sm:$0xff] }
 0x495   : > { %9088 = vmatmul.mubr.f32.gmra.mrb[20].mxu1 %v12503_v7  ;;  %v5816_v7 = vld [vmem:[#allocation3 + $0x14f] sm:$0xff] }
 0x496   : > { %9090 = vmatprep.mubr.f32.mxu1 %v12504_v15  ;;  %v5817_v15 = vld [vmem:[#allocation3 + $0x167] sm:$0xff] }
 0x499   : > { %9091 = vmatmul.mubr.f32.gmra.mrb[22].mxu1 %v11798_v41  ;;  %v5800_v41 = vld [vmem:[#allocation3 + $0x4f] sm:$0xff] }
 0x49a   : > { %9093 = vmatprep.mubr.f32.mxu1 %v12077_v16 }
 0x49d   : > { %9094 = vmatmul.mubr.f32.gmra.mrb[24].mxu1 %v12080_v24 }
 0x49e   : > { %9128 = vmatprep.mubr.f32.mxu1 %v5799_v45  ;;  %v5820_v45 = vld [vmem:[#allocation3 + $0x18f] sm:$0xff] }
 0x4a1   : > { %9129 = vmatmul.mubr.f32.vlgmr.msra.gmra.mrb[26].mxu1 %v5800_v41  ;;  %v5822_v41 = vld [vmem:[#allocation3 + $0x1af] sm:$0xff] }
 0x4a2   : > { %9563 = vmatpush3.bf16.msra.mxu1 %v9560_v21  ;;  %9131 = vmatprep.mubr.f32.mxu1 %v5801_v57  ;;  %v9584_v21 = vpack.c.bf16 %v7412_v14, %v7411_v12  ;;  %v5825_v57 = vld [vmem:[#allocation3 + $0x1e7] sm:$0xff]  ;;  %v6126_v14 = vld [vmem:[#allocation3 + $0x190] sm:$0xff] }
 0x4a3   : > { %9565 = vmatprep.subr.bf16.mxu1 %v9564_v50  ;;  %v6125_v12 = vld [vmem:[#allocation3 + $0x188] sm:$0xff] }
 0x4a5   : > { %9132 = vmatmul.mubr.f32.gmra.mrb[28].mxu1 %v5802_v37  ;;  %v5829_v37 = vld [vmem:[#allocation3 + $0x227] sm:$0xff] }
 0x4a6   : > { %9134 = vmatprep.mubr.f32.mxu1 %v5803_v0  ;;  %9567 = vmatpush3.bf16.msra.mxu1 %v9564_v50  ;;  %v5821_v50 = vld [vmem:[#allocation3 + $0x1a7] sm:$0xff]  ;;  %v7418_v0 = vld [vmem:[%s12292_s3 + $0x418] sm:$0xff] }
 0x4a7   : > { %9569 = vmatprep.subr.bf16.mxu1 %v9568_v32 }
 0x4a9   : > { %9135 = vmatmul.mubr.f32.gmra.mrb[30].mxu1 %v5804_v49 }
 0x4aa   : > { %9137 = vmatprep.mubr.f32.mxu1 %v5805_v18  ;;  %9571 = vmatpush3.bf16.msra.mxu1 %v9568_v32  ;;  %v5826_v32 = vld [vmem:[#allocation3 + $0x1ef] sm:$0xff]  ;;  %v7426_v18 = vld [vmem:[%s12292_s3 + $0x458] sm:$0xff] }
 0x4ab   : > { %9573 = vmatprep.subr.bf16.mxu1 %v9572_v5 }
 0x4ad   : > { %9138 = vmatmul.mubr.f32.gmra.mrb[0].mxu1 %v5806_v31  ;;  %v7430_v31 = vld [vmem:[%s12292_s3 + $0x478] sm:$0xff] }
 0x4ae   : > { %9140 = vmatprep.mubr.f32.mxu1 %v5807_v11  ;;  %9575 = vmatpush3.bf16.msra.mxu1 %v9572_v5  ;;  %v9596_v5 = vpack.c.bf16 %v7418_v0, %v7417_v1  ;;  %v6121_v11 = vld [vmem:[#allocation3 + $0x148] sm:$0xff]  ;;  %v6430_v1 = vld [vmem:[#allocation3 + $0x171] sm:$0xff] }
 0x4af   : > { %9577 = vmatprep.subr.bf16.mxu1 %v9576_v22  ;;  %v6431_v0 = vld [vmem:[#allocation3 + $0x189] sm:$0xff] }
 0x4b1   : > { %9141 = vmatmul.mubr.f32.gmra.mrb[2].mxu1 %v5808_v10  ;;  %v6123_v10 = vld [vmem:[#allocation3 + $0x168] sm:$0xff] }
 0x4b2   : > { %9143 = vmatprep.mubr.f32.mxu1 %v5809_v33  ;;  %9579 = vmatpush3.bf16.msra.mxu1 %v9576_v22  ;;  %v7428_v22 = vld [vmem:[%s12292_s3 + $0x468] sm:$0xff]  ;;  %v6128_v33 = vld [vmem:[#allocation3 + $0x1b0] sm:$0xff] }
 0x4b3   : > { %9581 = vmatprep.subr.bf16.mxu1 %v9580_v17 }
 0x4b5   : > { %9144 = vmatmul.mubr.f32.gmra.mrb[4].mxu1 %v5810_v52  ;;  %v6130_v52 = vld [vmem:[#allocation3 + $0x1d0] sm:$0xff] }
 0x4b6   : > { %9146 = vmatprep.mubr.f32.mxu1 %v5811_v61  ;;  %9583 = vmatpush3.bf16.msra.mxu1 %v9580_v17  ;;  %v6122_v17 = vld [vmem:[#allocation3 + $0x150] sm:$0xff]  ;;  %v6133_v61 = vld [vmem:[#allocation3 + $0x208] sm:$0xff] }
 0x4b7   : > { %9585 = vmatprep.subr.bf16.mxu1 %v9584_v21 }
 0x4b9   : > { %9147 = vmatmul.mubr.f32.gmra.mrb[6].mxu1 %v5812_v59  ;;  %v10162_v59 = vld [vmem:[#allocation3] sm:$0xff] }
 0x4ba   : > { %9149 = vmatprep.mubr.f32.mxu1 %v5813_v3  ;;  %9587 = vmatpush3.bf16.msra.mxu1 %v9584_v21  ;;  %v6129_v21 = vld [vmem:[#allocation3 + $0x1c8] sm:$0xff] }
 0x4bb   : > { %9589 = vmatprep.subr.bf16.mxu1 %v9588_v53  ;;  %v6413_v3 = vld [vmem:[#allocation3 + $0x69] sm:$0xff] }
 0x4bd   : > { %9150 = vmatmul.mubr.f32.gmra.mrb[8].mxu1 %v5814_v34  ;;  %v6415_v34 = vld [vmem:[#allocation3 + $0x89] sm:$0xff] }
 0x4be   : > { %9152 = vmatprep.mubr.f32.mxu1 %v5815_v29  ;;  %9591 = vmatpush3.bf16.msra.mxu1 %v9588_v53  ;;  %v6134_v53 = vld [vmem:[#allocation3 + $0x210] sm:$0xff] }
 0x4bf   : > { %9593 = vmatprep.subr.bf16.mxu1 %v9592_v28  ;;  %v6416_v29 = vld [vmem:[#allocation3 + $0x91] sm:$0xff] }
 0x4c1   : > { %9153 = vmatmul.mubr.f32.gmra.mrb[10].mxu1 %v5816_v7  ;;  %v6417_v7 = vld [vmem:[#allocation3 + $0xa9] sm:$0xff] }
 0x4c2   : > { %9155 = vmatprep.mubr.f32.mxu1 %v5817_v15  ;;  %v6418_v15 = vld [vmem:[#allocation3 + $0xb1] sm:$0xff] }
 0x4c5   : > { %9156 = vmatmul.mubr.f32.gmra.mrb[12].mxu1 %v5818_v25  ;;  %v6419_v25 = vld [vmem:[#allocation3 + $0xc9] sm:$0xff] }
 0x4c6   : > { %9158 = vmatprep.mubr.f32.mxu1 %v5819_v44  ;;  %v6420_v44 = vld [vmem:[#allocation3 + $0xd1] sm:$0xff] }
 0x4c9   : > { %9159 = vmatmul.mubr.f32.gmra.mrb[14].mxu1 %v5820_v45  ;;  %v6421_v45 = vld [vmem:[#allocation3 + $0xe9] sm:$0xff] }
 0x4ca   : > { %9161 = vmatprep.mubr.f32.mxu1 %v5821_v50  ;;  %v6422_v50 = vld [vmem:[#allocation3 + $0xf1] sm:$0xff] }
 0x4cd   : > { %9162 = vmatmul.mubr.f32.gmra.mrb[16].mxu1 %v5822_v41  ;;  %v6423_v41 = vld [vmem:[#allocation3 + $0x109] sm:$0xff] }
 0x4ce   : > { %9164 = vmatprep.mubr.f32.mxu1 %v5823_v51  ;;  %v6424_v51 = vld [vmem:[#allocation3 + $0x111] sm:$0xff] }
 0x4d1   : > { %9165 = vmatmul.mubr.f32.gmra.mrb[18].mxu1 %v5824_v56  ;;  %v6425_v56 = vld [vmem:[#allocation3 + $0x129] sm:$0xff] }
 0x4d2   : > { %9167 = vmatprep.mubr.f32.mxu1 %v5825_v57  ;;  %v6426_v57 = vld [vmem:[#allocation3 + $0x131] sm:$0xff] }
 0x4d5   : > { %9168 = vmatmul.mubr.f32.gmra.mrb[20].mxu1 %v5826_v32  ;;  %v6427_v32 = vld [vmem:[#allocation3 + $0x149] sm:$0xff] }
 0x4d6   : > { %9170 = vmatprep.mubr.f32.mxu1 %v11887_v42  ;;  %v7419_v42 = vld [vmem:[%s12292_s3 + $0x420] sm:$0xff] }
 0x4d9   : > { %9171 = vmatmul.mubr.f32.gmra.mrb[22].mxu1 %v11890_v2  ;;  %v7420_v2 = vld [vmem:[%s12292_s3 + $0x428] sm:$0xff] }
 0x4da   : > { %9173 = vmatprep.mubr.f32.mxu1 %v5829_v37  ;;  %v9600_v49 = vpack.c.bf16 %v7420_v2, %v7419_v42  ;;  %v6428_v37 = vld [vmem:[#allocation3 + $0x151] sm:$0xff]  ;;  %v6433_v42 = vld [vmem:[#allocation3 + $0x1a9] sm:$0xff] }
 0x4db   : > { %v6434_v2 = vld [vmem:[#allocation3 + $0x1b1] sm:$0xff] }
 0x4dd   : > { %9174 = vmatmul.mubr.f32.gmra.mrb[24].mxu1 %v5830_v39  ;;  %v6429_v39 = vld [vmem:[#allocation3 + $0x169] sm:$0xff] }
 0x4de   : > { %9208 = vmatprep.mubr.f32.mxu1 %v11905_v63  ;;  %v7421_v63 = vld [vmem:[%s12292_s3 + $0x430] sm:$0xff] }
 0x4e1   : > { %9209 = vmatmul.mubr.f32.vlgmr.msra.gmra.mrb[26].mxu1 %v11908_v8  ;;  %v9604_v8 = vpack.c.bf16 %v7422_v58, %v7421_v63  ;;  %v6436_v63 = vld [vmem:[#allocation3 + $0x1d1] sm:$0xff]  ;;  %v6437_v58 = vld [vmem:[#allocation3 + $0x1e9] sm:$0xff] }
 0x4e2   : > { %9595 = vmatpush3.bf16.msra.mxu1 %v9592_v28  ;;  %9211 = vmatprep.mubr.f32.mxu1 %v11917_v13  ;;  %v7423_v13 = vld [vmem:[%s12292_s3 + $0x440] sm:$0xff]  ;;  %v6414_v28 = vld [vmem:[#allocation3 + $0x71] sm:$0xff] }
 0x4e3   : > { %9597 = vmatprep.subr.bf16.mxu1 %v9596_v5 }
 0x4e5   : > { %9212 = vmatmul.mubr.f32.gmra.mrb[28].mxu1 %v11920_v20  ;;  %v9608_v20 = vpack.c.bf16 %v7424_v30, %v7423_v13  ;;  %v6441_v13 = vld [vmem:[#allocation3 + $0x229] sm:$0xff]  ;;  %v6442_v30 = vld [vmem:[#allocation3 + $0x231] sm:$0xff] }
 0x4e6   : > { %9214 = vmatprep.mubr.f32.mxu1 %v11929_v23  ;;  %9599 = vmatpush3.bf16.msra.mxu1 %v9596_v5  ;;  %v7425_v23 = vld [vmem:[%s12292_s3 + $0x450] sm:$0xff] }
 0x4e7   : > { %9601 = vmatprep.subr.bf16.mxu1 %v9600_v49  ;;  %v6432_v5 = vld [vmem:[#allocation3 + $0x191] sm:$0xff] }
 0x4e9   : > { %9215 = vmatmul.mubr.f32.gmra.mrb[30].mxu1 %v11932_v19  ;;  %v9612_v19 = vpack.c.bf16 %v7426_v18, %v7425_v23  ;;  %v12505_v18 = vld [vmem:[#allocation9_spill] sm:$0xff] }
 0x4ea   : > { %9217 = vmatprep.mubr.f32.mxu1 %v11941_v26  ;;  %9603 = vmatpush3.bf16.msra.mxu1 %v9600_v49  ;;  %v7427_v26 = vld [vmem:[%s12292_s3 + $0x460] sm:$0xff]  ;;  %v6435_v49 = vld [vmem:[#allocation3 + $0x1c9] sm:$0xff] }
 0x4eb   : > { %9605 = vmatprep.subr.bf16.mxu1 %v9604_v8 }
 0x4ed   : > { %9218 = vmatmul.mubr.f32.gmra.mrb[0].mxu1 %v11944_v36  ;;  %v9616_v36 = vpack.c.bf16 %v7428_v22, %v7427_v26  ;;  %v12506_v22 = vld [vmem:[#allocation10_spill] sm:$0xff] }
 0x4ee   : > { %9220 = vmatprep.mubr.f32.mxu1 %v11953_v48  ;;  %9607 = vmatpush3.bf16.msra.mxu1 %v9604_v8  ;;  %v7429_v48 = vld [vmem:[%s12292_s3 + $0x470] sm:$0xff] }
 0x4ef   : > { %9609 = vmatprep.subr.bf16.mxu1 %v9608_v20  ;;  %v6438_v8 = vld [vmem:[#allocation3 + $0x1f1] sm:$0xff] }
 0x4f1   : > { %9221 = vmatmul.mubr.f32.gmra.mrb[2].mxu1 %v11956_v43  ;;  %v9620_v43 = vpack.c.bf16 %v7430_v31, %v7429_v48 }
 0x4f2   : > { %9223 = vmatprep.mubr.f32.mxu1 %v11965_v62  ;;  %9611 = vmatpush3.bf16.msra.mxu1 %v9608_v20  ;;  %v6119_v62 = vld [vmem:[#allocation3 + $0x128] sm:$0xff]  ;;  %v12193_v20 = vld [vmem:[%s12293_s4] ss:$0 sm:$0xff] }
 0x4f3   : > { %9613 = vmatprep.subr.bf16.mxu1 %v9612_v19 }
 0x4f5   : > { %9224 = vmatmul.mubr.f32.gmra.mrb[4].mxu1 %v11968_v4  ;;  %v6124_v4 = vld [vmem:[#allocation3 + $0x170] sm:$0xff] }
 0x4f6   : > { %9226 = vmatprep.mubr.f32.mxu1 %v6117_v47  ;;  %9615 = vmatpush3.bf16.msra.mxu1 %v9612_v19 }
 0x4f7   : > { %9617 = vmatprep.subr.bf16.mxu1 %v9616_v36 }
 0x4f9   : > { %9227 = vmatmul.mubr.f32.gmra.mrb[6].mxu1 %v11978_v35  ;;  %v6127_v35 = vld [vmem:[#allocation3 + $0x1a8] sm:$0xff] }
 0x4fa   : > { %9229 = vmatprep.mubr.f32.mxu1 %v6119_v62  ;;  %9619 = vmatpush3.bf16.msra.mxu1 %v9616_v36 }
 0x4fb   : > { %9621 = vmatprep.subr.bf16.mxu1 %v9620_v43 }
 0x4fd   : > { %9230 = vmatmul.mubr.f32.gmra.mrb[8].mxu1 %v6120_v9 }
 0x4fe   : > { %9232 = vmatprep.mubr.f32.mxu1 %v6121_v11  ;;  %9623 = vmatpush3.bf16.msra.mxu1 %v9620_v43 }
 0x501   : > { %9233 = vmatmul.mubr.f32.gmra.mrb[10].mxu1 %v6122_v17 }
 0x502   : > { %9235 = vmatprep.mubr.f32.mxu1 %v6123_v10 }
 0x505   : > { %9236 = vmatmul.mubr.f32.gmra.mrb[12].mxu1 %v6124_v4 }
 0x506   : > { %9238 = vmatprep.mubr.f32.mxu1 %v6125_v12 }
 0x509   : > { %9239 = vmatmul.mubr.f32.gmra.mrb[14].mxu1 %v6126_v14 }
 0x50a   : > { %9241 = vmatprep.mubr.f32.mxu1 %v6127_v35 }
 0x50d   : > { %9242 = vmatmul.mubr.f32.gmra.mrb[16].mxu1 %v6128_v33 }
 0x50e   : > { %9244 = vmatprep.mubr.f32.mxu1 %v6129_v21 }
 0x511   : > { %9245 = vmatmul.mubr.f32.gmra.mrb[18].mxu1 %v6130_v52 }
 0x512   : > { %9247 = vmatprep.mubr.f32.mxu1 %v6131_v60 }
 0x515   : > { %9248 = vmatmul.mubr.f32.gmra.mrb[20].mxu1 %v6132_v46 }
 0x516   : > { %9250 = vmatprep.mubr.f32.mxu1 %v6133_v61 }
 0x519   : > { %9251 = vmatmul.mubr.f32.gmra.mrb[22].mxu1 %v6134_v53 }
 0x51a   : > { %9253 = vmatprep.mubr.f32.mxu1 %v10162_v59 }
 0x51d   : > { %9254 = vmatmul.mubr.f32.gmra.mrb[24].mxu1 %v10162_v59 }
 0x51e   : > { %9288 = vmatprep.mubr.f32.mxu1 %v6411_v54 }
 0x521   : > { %9289 = vmatmul.mubr.f32.vlgmr.msra.gmra.mrb[26].mxu1 %v6412_v40 }
 0x522   : > { %9291 = vmatprep.mubr.f32.mxu1 %v6413_v3 }
 0x525   : > { %9292 = vmatmul.mubr.f32.gmra.mrb[28].mxu1 %v6414_v28 }
 0x526   : > { %9294 = vmatprep.mubr.f32.mxu1 %v6415_v34 }
 0x529   : > { %9295 = vmatmul.mubr.f32.gmra.mrb[30].mxu1 %v6416_v29 }
 0x52a   : > { %9297 = vmatprep.mubr.f32.mxu1 %v6417_v7 }
 0x52d   : > { %9298 = vmatmul.mubr.f32.gmra.mrb[0].mxu1 %v6418_v15 }
 0x52e   : > { %9300 = vmatprep.mubr.f32.mxu1 %v6419_v25 }
 0x531   : > { %9301 = vmatmul.mubr.f32.gmra.mrb[2].mxu1 %v6420_v44 }
 0x532   : > { %9303 = vmatprep.mubr.f32.mxu1 %v6421_v45 }
 0x535   : > { %9304 = vmatmul.mubr.f32.gmra.mrb[4].mxu1 %v6422_v50 }
 0x536   : > { %9306 = vmatprep.mubr.f32.mxu1 %v6423_v41 }
 0x539   : > { %9307 = vmatmul.mubr.f32.gmra.mrb[6].mxu1 %v6424_v51 }
 0x53a   : > { %9309 = vmatprep.mubr.f32.mxu1 %v6425_v56 }
 0x53d   : > { %9310 = vmatmul.mubr.f32.gmra.mrb[8].mxu1 %v6426_v57 }
 0x53e   : > { %9312 = vmatprep.mubr.f32.mxu1 %v6427_v32 }
 0x541   : > { %9313 = vmatmul.mubr.f32.gmra.mrb[10].mxu1 %v6428_v37 }
 0x542   : > { %9315 = vmatprep.mubr.f32.mxu1 %v6429_v39 }
 0x545   : > { %9316 = vmatmul.mubr.f32.gmra.mrb[12].mxu1 %v6430_v1 }
 0x546   : > { %9318 = vmatprep.mubr.f32.mxu1 %v6431_v0 }
 0x549   : > { %9319 = vmatmul.mubr.f32.gmra.mrb[14].mxu1 %v6432_v5 }
 0x54a   : > { %9321 = vmatprep.mubr.f32.mxu1 %v6433_v42 }
 0x54d   : > { %9322 = vmatmul.mubr.f32.gmra.mrb[16].mxu1 %v6434_v2 }
 0x54e   : > { %9324 = vmatprep.mubr.f32.mxu1 %v6435_v49 }
 0x551   : > { %9325 = vmatmul.mubr.f32.gmra.mrb[18].mxu1 %v6436_v63 }
 0x552   : > { %9327 = vmatprep.mubr.f32.mxu1 %v6437_v58 }
 0x555   : > { %9328 = vmatmul.mubr.f32.gmra.mrb[20].mxu1 %v6438_v8 }
 0x556   : > { %9330 = vmatprep.mubr.f32.mxu1 %v12077_v16 }
 0x559   : > { %9331 = vmatmul.mubr.f32.gmra.mrb[22].mxu1 %v12080_v24 }
 0x55a   : > { %9333 = vmatprep.mubr.f32.mxu1 %v6441_v13 }
 0x55d   : > { %9334 = vmatmul.mubr.f32.gmra.mrb[24].mxu1 %v6442_v30 }
 0x5f4   : > { %v9290_v23 = vpop.f32.mrb[26].mxu1 }
 0x5f5   : > { %v9640_v19 = vadd.f32 %v9290_v23, %v12505_v18  ;;  %v6526_v26 = vpop.f32.mrb[27].mxu1 }
 0x5f6   : > { %v9641_v36 = vadd.f32 %v6526_v26, %v12506_v22 }
 0x5f7   : > { %v6724_v48 = vadd.f32 %v9640_v19, %v12193_v20 }
 0x5f8   : > { %v6723_v16 = vadd.f32 %v9641_v36, %v12193_v20  ;;  %v9293_v24 = vpop.f32.mrb[28].mxu1 }
 0x5f9   : > { %v6756_v31 = vmax.f32 %v6724_v48, 0.0  ;;  %v9642_v47 = vadd.f32 %v9293_v24, %v11856_v27  ;;  %v6536_v43 = vpop.f32.mrb[29].mxu1 }
 0x5fa   : > { %v6755_v62 = vmax.f32 %v6723_v16, 0.0  ;;  %v9643_v9 = vadd.f32 %v6536_v43, %v11864_v6 }
 0x5fb   : > { %6788 = vst [vmem:[%s12203_s24 + $0x8] sm:$0xff] %v6756_v31  ;;  %v6726_v11 = vadd.f32 %v9642_v47, %v12193_v20 }
 0x5fc   : > { %6787 = vst [vmem:[%s12203_s24] sm:$0xff] %v6755_v62  ;;  %v6725_v17 = vadd.f32 %v9643_v9, %v12193_v20  ;;  %v9296_v10 = vpop.f32.mrb[30].mxu1 }
 0x5fd   : > { %v6758_v4 = vmax.f32 %v6726_v11, 0.0  ;;  %v9644_v12 = vadd.f32 %v9296_v10, %v11868_v38  ;;  %v6546_v14 = vpop.f32.mrb[31].mxu1 }
 0x5fe   : > { %v6757_v35 = vmax.f32 %v6725_v17, 0.0  ;;  %v9645_v27 = vadd.f32 %v6546_v14, %v11870_v55 }
 0x5ff   : > { %6790 = vst [vmem:[%s12203_s24 + $0x18] sm:$0xff] %v6758_v4  ;;  %v6820_v33 = vmax.f32 %v6756_v31, %v6758_v4  ;;  %v6728_v6 = vadd.f32 %v9644_v12, %v12193_v20 }
 0x600   : > { %6789 = vst [vmem:[%s12203_s24 + $0x10] sm:$0xff] %v6757_v35  ;;  %v6819_v21 = vmax.f32 %v6755_v62, %v6757_v35  ;;  %v6727_v52 = vadd.f32 %v9645_v27, %v12193_v20  ;;  %v9299_v60 = vpop.f32.mrb[0].mxu1 }
 0x601   : > { %6836 = vst [vmem:[#allocation4 + $0x8] sm:$0xff] %v6820_v33  ;;  %v6760_v46 = vmax.f32 %v6728_v6, 0.0  ;;  %v6730_v38 = vadd.f32 %v9299_v60, %v12193_v20  ;;  %v6556_v61 = vpop.f32.mrb[1].mxu1 }
 0x602   : > { %6835 = vst [vmem:[#allocation4] sm:$0xff] %v6819_v21  ;;  %v6759_v55 = vmax.f32 %v6727_v52, 0.0  ;;  %v6729_v53 = vadd.f32 %v12193_v20, %v6556_v61 }
 0x603   : > { %6792 = vst [vmem:[%s12203_s24 + $0x28] sm:$0xff] %v6760_v46  ;;  %v6762_v59 = vmax.f32 %v6730_v38, 0.0 }
 0x604   : > { %6791 = vst [vmem:[%s12203_s24 + $0x20] sm:$0xff] %v6759_v55  ;;  %v6761_v54 = vmax.f32 %v6729_v53, 0.0  ;;  %v9302_v40 = vpop.f32.mrb[2].mxu1 }
 0x605   : > { %6794 = vst [vmem:[%s12203_s24 + $0x38] sm:$0xff] %v6762_v59  ;;  %v6822_v3 = vmax.f32 %v6760_v46, %v6762_v59  ;;  %v6732_v28 = vadd.f32 %v9302_v40, %v12193_v20  ;;  %v6566_v34 = vpop.f32.mrb[3].mxu1 }
 0x606   : > { %6793 = vst [vmem:[%s12203_s24 + $0x30] sm:$0xff] %v6761_v54  ;;  %v6821_v29 = vmax.f32 %v6759_v55, %v6761_v54  ;;  %v6731_v7 = vadd.f32 %v12193_v20, %v6566_v34 }
 0x607   : > { %6838 = vst [vmem:[#allocation4 + $0x18] sm:$0xff] %v6822_v3  ;;  %v6764_v15 = vmax.f32 %v6732_v28, 0.0 }
 0x608   : > { %6837 = vst [vmem:[#allocation4 + $0x10] sm:$0xff] %v6821_v29  ;;  %v6763_v25 = vmax.f32 %v6731_v7, 0.0  ;;  %v9305_v44 = vpop.f32.mrb[4].mxu1 }
 0x609   : > { %v6851_v45 = vld [vmem:[#allocation4] ss:$2 sm:$0xff]  ;;  %v6867_v50 = vld [vmem:[#allocation4 + $0x1] ss:$2 sm:$0xff]  ;;  %6796 = vst [vmem:[%s12203_s24 + $0x48] sm:$0xff] %v6764_v15  ;;  %v6734_v41 = vadd.f32 %v9305_v44, %v12193_v20  ;;  %v6576_v51 = vpop.f32.mrb[5].mxu1 }
 0x60a   : > { %v6882_v56 = vmax.f32 %v6851_v45, %v6867_v50  ;;  %6795 = vst [vmem:[%s12203_s24 + $0x40] sm:$0xff] %v6763_v25  ;;  %v6733_v57 = vadd.f32 %v12193_v20, %v6576_v51 }
 0x60b   : > { %v6766_v32 = vmax.f32 %v6734_v41, 0.0 }
 0x60c   : > { %6890 = vst [vmem:[%s12230_s27] sm:$0xff] %v6882_v56  ;;  %v6765_v37 = vmax.f32 %v6733_v57, 0.0  ;;  %v9308_v39 = vpop.f32.mrb[6].mxu1 }
 0x60d   : > { %6798 = vst [vmem:[%s12203_s24 + $0x58] sm:$0xff] %v6766_v32  ;;  %v6824_v1 = vmax.f32 %v6764_v15, %v6766_v32  ;;  %v6736_v0 = vadd.f32 %v9308_v39, %v12193_v20  ;;  %v6586_v5 = vpop.f32.mrb[7].mxu1 }
 0x60e   : > { %6797 = vst [vmem:[%s12203_s24 + $0x50] sm:$0xff] %v6765_v37  ;;  %v6823_v42 = vmax.f32 %v6763_v25, %v6765_v37  ;;  %v6735_v2 = vadd.f32 %v12193_v20, %v6586_v5 }
 0x60f   : > { %v6853_v49 = vld [vmem:[#allocation4 + $0x10] ss:$2 sm:$0xff]  ;;  %v6869_v63 = vld [vmem:[#allocation4 + $0x11] ss:$2 sm:$0xff]  ;;  %6840 = vst [vmem:[#allocation4 + $0x28] sm:$0xff] %v6824_v1  ;;  %v6768_v58 = vmax.f32 %v6736_v0, 0.0 }
 0x610   : > { %v6883_v8 = vmax.f32 %v6853_v49, %v6869_v63  ;;  %6839 = vst [vmem:[#allocation4 + $0x20] sm:$0xff] %v6823_v42  ;;  %v6767_v13 = vmax.f32 %v6735_v2, 0.0  ;;  %v9311_v30 = vpop.f32.mrb[8].mxu1 }
 0x611   : > { %6800 = vst [vmem:[%s12203_s24 + $0x68] sm:$0xff] %v6768_v58  ;;  %v6738_v23 = vadd.f32 %v9311_v30, %v12193_v20  ;;  %v6596_v18 = vpop.f32.mrb[9].mxu1 }
 0x612   : > { %6891 = vst [vmem:[%s12230_s27 + $0x8] sm:$0xff] %v6883_v8  ;;  %6799 = vst [vmem:[%s12203_s24 + $0x60] sm:$0xff] %v6767_v13  ;;  %v6737_v19 = vadd.f32 %v12193_v20, %v6596_v18 }
 0x613   : > { %v6770_v26 = vmax.f32 %v6738_v23, 0.0 }
 0x614   : > { %v6769_v22 = vmax.f32 %v6737_v19, 0.0  ;;  %v9314_v36 = vpop.f32.mrb[10].mxu1 }
 0x615   : > { %6802 = vst [vmem:[%s12203_s24 + $0x78] sm:$0xff] %v6770_v26  ;;  %v6826_v48 = vmax.f32 %v6768_v58, %v6770_v26  ;;  %v6740_v16 = vadd.f32 %v9314_v36, %v12193_v20  ;;  %v6606_v24 = vpop.f32.mrb[11].mxu1 }
 0x616   : > { %6801 = vst [vmem:[%s12203_s24 + $0x70] sm:$0xff] %v6769_v22  ;;  %v6825_v31 = vmax.f32 %v6767_v13, %v6769_v22  ;;  %v6739_v47 = vadd.f32 %v12193_v20, %v6606_v24 }
 0x617   : > { %v6855_v43 = vld [vmem:[#allocation4 + $0x20] ss:$2 sm:$0xff]  ;;  %v6871_v62 = vld [vmem:[#allocation4 + $0x21] ss:$2 sm:$0xff]  ;;  %6842 = vst [vmem:[#allocation4 + $0x38] sm:$0xff] %v6826_v48  ;;  %v6772_v9 = vmax.f32 %v6740_v16, 0.0 }
 0x618   : > { %v6884_v11 = vmax.f32 %v6855_v43, %v6871_v62  ;;  %6841 = vst [vmem:[#allocation4 + $0x30] sm:$0xff] %v6825_v31  ;;  %v6771_v17 = vmax.f32 %v6739_v47, 0.0  ;;  %v9317_v10 = vpop.f32.mrb[12].mxu1 }
 0x619   : > { %6804 = vst [vmem:[%s12203_s24 + $0x88] sm:$0xff] %v6772_v9  ;;  %v6742_v4 = vadd.f32 %v9317_v10, %v12193_v20  ;;  %v6616_v12 = vpop.f32.mrb[13].mxu1 }
 0x61a   : > { %6892 = vst [vmem:[%s12230_s27 + $0x10] sm:$0xff] %v6884_v11  ;;  %6803 = vst [vmem:[%s12203_s24 + $0x80] sm:$0xff] %v6771_v17  ;;  %v6741_v14 = vadd.f32 %v12193_v20, %v6616_v12 }
 0x61b   : > { %v6774_v35 = vmax.f32 %v6742_v4, 0.0 }
 0x61c   : > { %v6773_v27 = vmax.f32 %v6741_v14, 0.0  ;;  %v9320_v33 = vpop.f32.mrb[14].mxu1 }
 0x61d   : > { %6806 = vst [vmem:[%s12203_s24 + $0x98] sm:$0xff] %v6774_v35  ;;  %v6828_v6 = vmax.f32 %v6772_v9, %v6774_v35  ;;  %v6744_v21 = vadd.f32 %v9320_v33, %v12193_v20  ;;  %v6626_v52 = vpop.f32.mrb[15].mxu1 }
 0x61e   : > { %6805 = vst [vmem:[%s12203_s24 + $0x90] sm:$0xff] %v6773_v27  ;;  %v6827_v60 = vmax.f32 %v6771_v17, %v6773_v27  ;;  %v6743_v46 = vadd.f32 %v12193_v20, %v6626_v52 }
 0x61f   : > { %v6857_v38 = vld [vmem:[#allocation4 + $0x30] ss:$2 sm:$0xff]  ;;  %v6873_v61 = vld [vmem:[#allocation4 + $0x31] ss:$2 sm:$0xff]  ;;  %6844 = vst [vmem:[#allocation4 + $0x48] sm:$0xff] %v6828_v6  ;;  %v6776_v55 = vmax.f32 %v6744_v21, 0.0 }
 0x620   : > { %v6885_v53 = vmax.f32 %v6857_v38, %v6873_v61  ;;  %6843 = vst [vmem:[#allocation4 + $0x40] sm:$0xff] %v6827_v60  ;;  %v6775_v59 = vmax.f32 %v6743_v46, 0.0  ;;  %v9323_v54 = vpop.f32.mrb[16].mxu1 }
 0x621   : > { %6808 = vst [vmem:[%s12203_s24 + $0xa8] sm:$0xff] %v6776_v55  ;;  %v6746_v40 = vadd.f32 %v9323_v54, %v12193_v20  ;;  %v6636_v3 = vpop.f32.mrb[17].mxu1 }
 0x622   : > { %6893 = vst [vmem:[%s12230_s27 + $0x18] sm:$0xff] %v6885_v53  ;;  %6807 = vst [vmem:[%s12203_s24 + $0xa0] sm:$0xff] %v6775_v59  ;;  %v6745_v28 = vadd.f32 %v12193_v20, %v6636_v3 }
 0x623   : > { %v6778_v34 = vmax.f32 %v6746_v40, 0.0 }
 0x624   : > { %v6777_v29 = vmax.f32 %v6745_v28, 0.0  ;;  %v9326_v7 = vpop.f32.mrb[18].mxu1 }
 0x625   : > { %6810 = vst [vmem:[%s12203_s24 + $0xb8] sm:$0xff] %v6778_v34  ;;  %v6830_v15 = vmax.f32 %v6776_v55, %v6778_v34  ;;  %v6748_v25 = vadd.f32 %v9326_v7, %v12193_v20  ;;  %v6646_v44 = vpop.f32.mrb[19].mxu1 }
 0x626   : > { %6809 = vst [vmem:[%s12203_s24 + $0xb0] sm:$0xff] %v6777_v29  ;;  %v6829_v45 = vmax.f32 %v6775_v59, %v6777_v29  ;;  %v6747_v50 = vadd.f32 %v12193_v20, %v6646_v44 }
 0x627   : > { %v6859_v41 = vld [vmem:[#allocation4 + $0x40] ss:$2 sm:$0xff]  ;;  %v6875_v51 = vld [vmem:[#allocation4 + $0x41] ss:$2 sm:$0xff]  ;;  %6846 = vst [vmem:[#allocation4 + $0x58] sm:$0xff] %v6830_v15  ;;  %v6780_v56 = vmax.f32 %v6748_v25, 0.0 }
 0x628   : > { %v6886_v57 = vmax.f32 %v6859_v41, %v6875_v51  ;;  %6845 = vst [vmem:[#allocation4 + $0x50] sm:$0xff] %v6829_v45  ;;  %v6779_v32 = vmax.f32 %v6747_v50, 0.0  ;;  %v9329_v37 = vpop.f32.mrb[20].mxu1 }
 0x629   : > { %6812 = vst [vmem:[%s12203_s24 + $0xc8] sm:$0xff] %v6780_v56  ;;  %v6750_v39 = vadd.f32 %v9329_v37, %v12193_v20  ;;  %v6656_v1 = vpop.f32.mrb[21].mxu1 }
 0x62a   : > { %6894 = vst [vmem:[%s12230_s27 + $0x20] sm:$0xff] %v6886_v57  ;;  %6811 = vst [vmem:[%s12203_s24 + $0xc0] sm:$0xff] %v6779_v32  ;;  %v6749_v0 = vadd.f32 %v12193_v20, %v6656_v1 }
 0x62b   : > { %v6782_v5 = vmax.f32 %v6750_v39, 0.0 }
 0x62c   : > { %v6781_v42 = vmax.f32 %v6749_v0, 0.0  ;;  %v9332_v2 = vpop.f32.mrb[22].mxu1 }
 0x62d   : > { %6814 = vst [vmem:[%s12203_s24 + $0xd8] sm:$0xff] %v6782_v5  ;;  %v6832_v49 = vmax.f32 %v6780_v56, %v6782_v5  ;;  %v6752_v63 = vadd.f32 %v9332_v2, %v12193_v20  ;;  %v6666_v58 = vpop.f32.mrb[23].mxu1 }
 0x62e   : > { %6813 = vst [vmem:[%s12203_s24 + $0xd0] sm:$0xff] %v6781_v42  ;;  %v6831_v8 = vmax.f32 %v6779_v32, %v6781_v42  ;;  %v6751_v13 = vadd.f32 %v12193_v20, %v6666_v58 }
 0x62f   : > { %v6861_v30 = vld [vmem:[#allocation4 + $0x50] ss:$2 sm:$0xff]  ;;  %v6877_v23 = vld [vmem:[#allocation4 + $0x51] ss:$2 sm:$0xff]  ;;  %6848 = vst [vmem:[#allocation4 + $0x68] sm:$0xff] %v6832_v49  ;;  %v6784_v18 = vmax.f32 %v6752_v63, 0.0 }
 0x630   : > { %v6887_v19 = vmax.f32 %v6861_v30, %v6877_v23  ;;  %6847 = vst [vmem:[#allocation4 + $0x60] sm:$0xff] %v6831_v8  ;;  %v6783_v26 = vmax.f32 %v6751_v13, 0.0  ;;  %v9335_v22 = vpop.f32.mrb[24].mxu1 }
 0x631   : > { %6816 = vst [vmem:[%s12203_s24 + $0xe8] sm:$0xff] %v6784_v18  ;;  %v6754_v36 = vadd.f32 %v9335_v22, %v12193_v20  ;;  %v6676_v48 = vpop.f32.mrb[25].mxu1 }
 0x632   : > { %6895 = vst [vmem:[%s12230_s27 + $0x28] sm:$0xff] %v6887_v19  ;;  %6815 = vst [vmem:[%s12203_s24 + $0xe0] sm:$0xff] %v6783_v26  ;;  %v6753_v16 = vadd.f32 %v12193_v20, %v6676_v48 }
 0x633   : > { %v6786_v24 = vmax.f32 %v6754_v36, 0.0 }
 0x634   : > { %v6785_v31 = vmax.f32 %v6753_v16, 0.0 }
 0x635   : > { %6818 = vst [vmem:[%s12203_s24 + $0xf8] sm:$0xff] %v6786_v24  ;;  %v6834_v47 = vmax.f32 %v6784_v18, %v6786_v24 }
 0x636   : > { %6817 = vst [vmem:[%s12203_s24 + $0xf0] sm:$0xff] %v6785_v31  ;;  %v6833_v43 = vmax.f32 %v6783_v26, %v6785_v31 }
 0x637   : > { %v6863_v62 = vld [vmem:[#allocation4 + $0x60] ss:$2 sm:$0xff]  ;;  %v6879_v9 = vld [vmem:[#allocation4 + $0x61] ss:$2 sm:$0xff]  ;;  %6850 = vst [vmem:[#allocation4 + $0x78] sm:$0xff] %v6834_v47 }
 0x638   : > { %v6888_v11 = vmax.f32 %v6863_v62, %v6879_v9  ;;  %6849 = vst [vmem:[#allocation4 + $0x70] sm:$0xff] %v6833_v43 }
 0x63a   : > { %6896 = vst [vmem:[%s12230_s27 + $0x30] sm:$0xff] %v6888_v11 }
 0x63f   : > { %v6865_v17 = vld [vmem:[#allocation4 + $0x70] ss:$2 sm:$0xff]  ;;  %v6881_v10 = vld [vmem:[#allocation4 + $0x71] ss:$2 sm:$0xff] }
 0x640   : > { %v6889_v4 = vmax.f32 %v6865_v17, %v6881_v10 }
 0x642   : > { %6897 = vst [vmem:[%s12230_s27 + $0x38] sm:$0xff] %v6889_v4 }
 0x643 PF: > { %s17_s21 = sadd.s32 1, %s10169_s21  }
 0x644   : > { %p14_p4 = scmp.ge.s32.totalorder %s17_s21, 4  }
 0x646   :  { %16 = sbr.rel (!%p14_p4) target bundleno = 1 (0x1), region = 117 }

</bundles_post_ra>
